<compile_context>
chip_gen: v6e
topology: v6e:2x2x1
jax: 0.10.0
libtpu: 0.0.40
codegen_flags: <defaults>
</compile_context>

<pallas_src>
import functools
import math

import jax
import jax.numpy as jnp
from jax import lax
from jax.experimental import pallas as pl
from jax.experimental.pallas import tpu as pltpu

C_MID = 512     # conv output channels, fixed by the module
BN_EPS = 1e-5   # PyTorch BatchNorm default


# ----------------------------- Mish activations ------------------------------------

def _mish_fast(x):
    """x * tanh(softplus(x)) via a single EUP exp + approximate reciprocal.

    With u = exp(-|x|):
      x >= 0: tanh(softplus(x)) = (1 + 2u) / (1 + 2u + 2u^2)
      x <  0: tanh(softplus(x)) = (u^2 + 2u) / (u^2 + 2u + 2)
    """
    u = jnp.exp(-jnp.abs(x))
    pos = x >= 0.0
    num = jnp.where(pos, 1.0 + 2.0 * u, u * (u + 2.0))
    den = num + jnp.where(pos, 2.0 * u * u, 2.0)
    return x * num * pl.reciprocal(den, approx=True)


def _mish_ref(x):
    sp = jnp.maximum(x, 0.0) + jnp.log1p(jnp.exp(-jnp.abs(x)))
    return x * jnp.tanh(sp)


# --------------------------------- kernel -------------------------------------------

def bengali_head_kernel(x_ref, wc_ref, bc_ref, s1_ref, t1_ref, wl_ref, bl_ref,
                        o_ref, sum_ref, max_ref, *, hw_total):
    # x_ref : (bt, c_in, CH) f32   natural-layout batch tile, one spatial chunk
    # wc_ref: (c_in, 512)    bf16  1x1 conv weight^T (unpadded channels)
    # bc_ref: (1, 512)       f32   conv bias
    # s1/t1 : (1, 512)       f32   folded BatchNorm2d scale / shift (applied post-pool)
    # wl_ref: (512, n_pad)   bf16  linear weight^T with BatchNorm1d folded in
    # bl_ref: (1, n_pad)     f32   linear bias with BatchNorm1d folded in
    # o_ref : (1, bt, n_pad) f32   logits for this batch tile (written at last chunk)
    # sum_ref/max_ref: (bt, 512) f32 scratch - running spatial sum / max accumulators
    bt = x_ref.shape[0]
    c = pl.program_id(1)

    @pl.when(c == 0)
    def _init():
        sum_ref[...] = jnp.zeros_like(sum_ref)
        max_ref[...] = jnp.full_like(max_ref, -jnp.inf)

    wc = wc_ref[...]          # hoisted: loaded once per grid step
    bc = bc_ref[...]

    def body(i, carry):
        # (c_in, CH) slice of batch element i; contract over c_in on the MXU
        # (transposed-LHS dimension numbers -> (CH, 512) f32 accumulate).
        xb = x_ref[i].astype(jnp.bfloat16)
        h = lax.dot_general(xb, wc, (((0,), (0,)), ((), ())),
                            preferred_element_type=jnp.float32)        # (CH, 512)
        h = _mish_fast(h + bc)
        row = pl.ds(i, 1)
        sum_ref[row, :] += jnp.sum(h, axis=0, keepdims=True)
        max_ref[row, :] = jnp.maximum(max_ref[row, :],
                                      jnp.max(h, axis=0, keepdims=True))
        return carry

    lax.fori_loop(0, bt, body, 0, unroll=bool(bt <= 8))

    @pl.when(c == pl.num_programs(1) - 1)
    def _finalize():
        # 0.5 * (avg_pool + max_pool); BN2d affine after the pool (scale > 0 so it
        # commutes with both mean and max); BN1d is folded into wl/bl; Dropout = id.
        pooled = sum_ref[...] * (0.5 / hw_total) + 0.5 * max_ref[...]   # (bt, 512)
        p = _mish_fast(pooled * s1_ref[...] + t1_ref[...])
        out = jnp.dot(p.astype(jnp.bfloat16), wl_ref[...],
                      preferred_element_type=jnp.float32) + bl_ref[...]  # (bt, n_pad)
        o_ref[0] = out.astype(o_ref.dtype)


# --------------------------------- wrapper -------------------------------------------

def _round_up(v, m):
    return (v + m - 1) // m * m


def _pad_last(a, size):
    pad = size - a.shape[-1]
    if pad == 0:
        return a
    return jnp.pad(a, [(0, 0)] * (a.ndim - 1) + [(0, pad)])


def _bn_fold(gamma, beta, mean, var, eps=BN_EPS):
    scale = gamma * jax.lax.rsqrt(var + eps)
    return scale, beta - mean * scale


def _vmem_limit_bytes():
    """Generation-aware scoped-VMEM limit: half the physical capacity, clamped to
    [32 MiB, 64 MiB] (v5e/v6e: 128 MiB -> 64 MiB, v7x: 64 MiB -> 32 MiB)."""
    try:
        cap = int(pltpu.get_tpu_info().vmem_capacity_bytes)
    except Exception:
        cap = 64 << 20
    return max(32 << 20, min(cap // 2, 64 << 20))


def _choose_chunk(HW, max_chunk=1024):
    """Spatial chunk CH for streaming the conv+Mish+pool over HW.

    CH must be a multiple of 128 that divides HW (BlockSpec lane constraint); if no
    such divisor <= max_chunk exists, fall back to a single full-HW chunk.  Bounding CH
    bounds the peak f32 (CH, 512) intermediate independently of bt and HW."""
    best = HW
    ch = 128
    while ch <= min(HW, max_chunk):
        if HW % ch == 0:
            best = ch
        ch += 128
    return best


def _choose_bt(B, c_in, CH, budget_bytes):
    """Largest batch tile bt that (a) divides B, (b) keeps >= 2 parallel grid steps
    when B > 1 (both v7x TensorCores get work; on single-TC v5e/v6e the split only
    costs ~one extra grid step since weights are never re-fetched and peak VMEM is
    chunk-bound, not bt-bound), and (c) keeps the double-buffered f32 x chunk under
    the VMEM budget."""
    per_elem = 2 * c_in * CH * 4          # double-buffered f32 x slice per batch element
    cap = 1 if B == 1 else max(1, B // 2)
    best = 1
    for bt in range(1, cap + 1):
        if B % bt == 0 and bt * per_elem <= budget_bytes:
            best = bt
    return best


def bengali_head_forward(x_nchw, params, *, max_chunk=1024):
    """x_nchw: (B, C_in, H, W) float32. Returns (B, n) float32 logits."""
    B, c_in, H, W = x_nchw.shape
    HW = H * W
    n = params["lin_w"].shape[0]

    # ---- wrapper-side algebra: fold inference-mode BatchNorms -----------------------
    s1, t1 = _bn_fold(params["bn1_g"], params["bn1_b"], params["bn1_m"], params["bn1_v"])
    s2, t2 = _bn_fold(params["bn2_g"], params["bn2_b"], params["bn2_m"], params["bn2_v"])
    # NOTE: moving the BN2d affine past the max-pool inside the kernel requires s1 > 0
    # (true for gamma=1 / fresh-init stats; gate this if trained gammas may be negative).
    wl_t = params["lin_w"].T                   # (512, n)
    wl_f = s2[:, None] * wl_t                  # fold BN1d scale into the linear weight
    bl_f = params["lin_b"] + t2 @ wl_t         # fold BN1d shift into the linear bias

    # ---- layout: x stays in its natural (B, c_in, HW) layout (free reshape, no pad,
    # ---- no transpose, no cast pass over HBM); only the tiny weights are padded/cast.
    n_pad = _round_up(n, 128)
    x = x_nchw.reshape(B, c_in, HW)                                   # f32, free reshape
    wc = params["conv_w"].T.astype(jnp.bfloat16)                      # (c_in, 512)
    wl = _pad_last(wl_f, n_pad).astype(jnp.bfloat16)                  # (512, n_pad)
    bl = _pad_last(bl_f[None, :], n_pad)                              # (1, n_pad) f32
    bc = params["conv_b"][None, :]                                    # (1, 512) f32
    s1 = s1[None, :]
    t1 = t1[None, :]

    vmem_limit = _vmem_limit_bytes()
    CH = _choose_chunk(HW, max_chunk)
    n_chunks = HW // CH
    assert CH * n_chunks == HW
    bt = _choose_bt(B, c_in, CH, vmem_limit // 4)
    grid = (B // bt, n_chunks)

    kernel = functools.partial(bengali_head_kernel, hw_total=HW)

    out = pl.pallas_call(
        kernel,
        out_shape=jax.ShapeDtypeStruct((B // bt, bt, n_pad), jnp.float32),
        grid_spec=pltpu.PrefetchScalarGridSpec(
            num_scalar_prefetch=0,
            grid=grid,
            in_specs=[
                pl.BlockSpec((bt, c_in, CH), lambda b, c: (b, 0, c)),   # x batch/spatial tile
                pl.BlockSpec((c_in, C_MID), lambda b, c: (0, 0)),       # conv weight^T (invariant)
                pl.BlockSpec((1, C_MID), lambda b, c: (0, 0)),          # conv bias
                pl.BlockSpec((1, C_MID), lambda b, c: (0, 0)),          # BN2d scale
                pl.BlockSpec((1, C_MID), lambda b, c: (0, 0)),          # BN2d shift
                pl.BlockSpec((C_MID, n_pad), lambda b, c: (0, 0)),      # linear weight^T (BN1d folded)
                pl.BlockSpec((1, n_pad), lambda b, c: (0, 0)),          # linear bias (BN1d folded)
            ],
            out_specs=pl.BlockSpec((1, bt, n_pad), lambda b, c: (b, 0, 0)),
            scratch_shapes=[
                pltpu.VMEM((bt, C_MID), jnp.float32),   # running spatial sum
                pltpu.VMEM((bt, C_MID), jnp.float32),   # running spatial max
            ],
        ),
        compiler_params=pltpu.CompilerParams(
            dimension_semantics=("parallel", "arbitrary"),
            vmem_limit_bytes=vmem_limit,
        ),
    )(x, wc, bc, s1, t1, wl, bl)

    return out.reshape(B, n_pad)[:, :n]


# ------------------------------ params / reference -----------------------------------

def init_params(key, nc, n):
    """Parameters matching PyTorch BengaliHead after __init__ / _init_weight (eval mode)."""
    k_wc, k_bc, k_wl, k_bl = jax.random.split(key, 4)
    ones = jnp.ones((C_MID,), jnp.float32)
    zeros = jnp.zeros((C_MID,), jnp.float32)
    bnd_c = 1.0 / math.sqrt(nc)
    bnd_l = 1.0 / math.sqrt(C_MID)
    return {
        # Conv2d(nc, 512, k=1): kaiming_normal_ weight (fan_in = nc), default uniform bias
        "conv_w": jax.random.normal(k_wc, (C_MID, nc), jnp.float32) * math.sqrt(2.0 / nc),
        "conv_b": jax.random.uniform(k_bc, (C_MID,), jnp.float32, -bnd_c, bnd_c),
        # BatchNorm2d / BatchNorm1d, inference mode (gamma=1, beta=0, mean=0, var=1)
        "bn1_g": ones, "bn1_b": zeros, "bn1_m": zeros, "bn1_v": ones,
        "bn2_g": ones, "bn2_b": zeros, "bn2_m": zeros, "bn2_v": ones,
        # Linear(512, n): default PyTorch uniform init
        "lin_w": jax.random.uniform(k_wl, (n, C_MID), jnp.float32, -bnd_l, bnd_l),
        "lin_b": jax.random.uniform(k_bl, (n,), jnp.float32, -bnd_l, bnd_l),
    }


def _reference(x_nchw, params, matmul_dtype=jnp.float32):
    """Pure-JAX BengaliHead.forward (eval). matmul_dtype=bfloat16 mirrors the kernel's
    MXU operand precision (accumulation stays f32)."""
    s1, t1 = _bn_fold(params["bn1_g"], params["bn1_b"], params["bn1_m"], params["bn1_v"])
    s2, t2 = _bn_fold(params["bn2_g"], params["bn2_b"], params["bn2_m"], params["bn2_v"])
    x = jnp.transpose(x_nchw, (0, 2, 3, 1))                                   # (B,H,W,C)
    h = jnp.einsum("bhwc,oc->bhwo", x.astype(matmul_dtype),
                   params["conv_w"].astype(matmul_dtype),
                   preferred_element_type=jnp.float32) + params["conv_b"]
    h = _mish_ref(h)
    h = h * s1 + t1                                                           # BatchNorm2d
    p = 0.5 * (jnp.mean(h, axis=(1, 2)) + jnp.max(h, axis=(1, 2)))            # avg+max pool
    p = _mish_ref(p)
    p = p * s2 + t2                                                           # BatchNorm1d
    # Dropout: identity in eval mode.
    return jnp.einsum("bc,nc->bn", p.astype(matmul_dtype),
                      params["lin_w"].astype(matmul_dtype),
                      preferred_element_type=jnp.float32) + params["lin_b"]


# ----------------------------------- demo --------------------------------------------

if __name__ == "__main__":
    key = jax.random.PRNGKey(0)
    k_p, k_x1, k_x2 = jax.random.split(key, 3)

    # Small shapes consistent with the module: 4 input channels, 16x16 map, 16 classes.
    nc, H, W, n = 4, 16, 16, 16
    params = init_params(k_p, nc, n)

    # B=2: bt=1, single spatial chunk -> grid (2, 1), both v7x TensorCores busy.
    x1 = jax.random.normal(k_x1, (2, nc, H, W), jnp.float32)
    out1 = jax.block_until_ready(bengali_head_forward(x1, params))
    assert out1.shape == (2, n), out1.shape
    ref1 = _reference(x1, params, matmul_dtype=jnp.bfloat16)   # kernel-matched MXU dtype
    assert jnp.allclose(out1, ref1, rtol=2e-2, atol=2e-2), \
        float(jnp.max(jnp.abs(out1 - ref1)))

    # B=8 with a forced 128-wide spatial chunk: exercises the batched in-kernel loop
    # (bt=4) and the multi-chunk streaming accumulation path -> grid (2, 2).
    x2 = jax.random.normal(k_x2, (8, nc, H, W), jnp.float32)
    out2 = jax.block_until_ready(bengali_head_forward(x2, params, max_chunk=128))
    assert out2.shape == (8, n), out2.shape
    ref2 = _reference(x2, params, matmul_dtype=jnp.bfloat16)
    assert jnp.allclose(out2, ref2, rtol=2e-2, atol=2e-2), \
        float(jnp.max(jnp.abs(out2 - ref2)))

    print("KERNEL_OK")
</pallas_src>

<mosaic_0001>
module attributes {stable_mosaic.version = 11 : i64} {
  func.func @bengali_head_kernel(%arg0: i32, %arg1: i32, %arg2: memref<1x4x256xf32, #tpu.memory_space<vmem>>, %arg3: memref<4x512xbf16, #tpu.memory_space<vmem>>, %arg4: memref<1x512xf32, #tpu.memory_space<vmem>>, %arg5: memref<1x512xf32, #tpu.memory_space<vmem>>, %arg6: memref<1x512xf32, #tpu.memory_space<vmem>>, %arg7: memref<512x128xbf16, #tpu.memory_space<vmem>>, %arg8: memref<1x128xf32, #tpu.memory_space<vmem>>, %arg9: memref<1x1x128xf32, #tpu.memory_space<vmem>>, %arg10: memref<1x512xf32, #tpu.memory_space<vmem>>, %arg11: memref<1x512xf32, #tpu.memory_space<vmem>>) attributes {dimension_semantics = [#tpu.dimension_semantics<parallel>, #tpu.dimension_semantics<arbitrary>], iteration_bounds = array<i64: 2, 1>, scalar_prefetch = 0 : i64, scratch_operands = 2 : i64, tpu.core_type = #tpu.core_type<tc>, window_params = [{transform_indices = @transform_0, window_bounds = array<i64: 1, 4, 256>}, {pipeline_mode = #tpu.pipeline_mode<synchronous>, transform_indices = @transform_1, window_bounds = array<i64: 4, 512>}, {pipeline_mode = #tpu.pipeline_mode<synchronous>, transform_indices = @transform_2, window_bounds = array<i64: 1, 512>}, {pipeline_mode = #tpu.pipeline_mode<synchronous>, transform_indices = @transform_3, window_bounds = array<i64: 1, 512>}, {pipeline_mode = #tpu.pipeline_mode<synchronous>, transform_indices = @transform_4, window_bounds = array<i64: 1, 512>}, {pipeline_mode = #tpu.pipeline_mode<synchronous>, transform_indices = @transform_5, window_bounds = array<i64: 512, 128>}, {pipeline_mode = #tpu.pipeline_mode<synchronous>, transform_indices = @transform_6, window_bounds = array<i64: 1, 128>}, {transform_indices = @transform_7, window_bounds = array<i64: 1, 1, 128>}]} {
    %c0_i32 = arith.constant 0 : i32
    %0 = arith.cmpi eq, %arg1, %c0_i32 : i32
    %1 = arith.extui %0 : i1 to i32
    %c0_i32_0 = arith.constant 0 : i32
    %2 = arith.cmpi ne, %1, %c0_i32_0 : i32
    scf.if %2 {
      %cst_22 = arith.constant 0.000000e+00 : f32
      %52 = vector.broadcast %cst_22 : f32 to vector<1x512xf32>
      %c0_23 = arith.constant 0 : index
      %c0_24 = arith.constant 0 : index
      %53 = vector.load %arg10[%c0_23, %c0_24] : memref<1x512xf32, #tpu.memory_space<vmem>>, vector<1x512xf32>
      tpu.vector_store %arg10[%c0_23, %c0_24], %52 {strides = array<i32>} : memref<1x512xf32, #tpu.memory_space<vmem>>, vector<1x512xf32>,
      %cst_25 = arith.constant 0xFF800000 : f32
      %54 = vector.broadcast %cst_25 : f32 to vector<1x512xf32>
      %c0_26 = arith.constant 0 : index
      %c0_27 = arith.constant 0 : index
      %55 = vector.load %arg11[%c0_26, %c0_27] : memref<1x512xf32, #tpu.memory_space<vmem>>, vector<1x512xf32>
      tpu.vector_store %arg11[%c0_26, %c0_27], %54 {strides = array<i32>} : memref<1x512xf32, #tpu.memory_space<vmem>>, vector<1x512xf32>,
    } else {
    }
    %c0 = arith.constant 0 : index
    %c0_1 = arith.constant 0 : index
    %3 = vector.load %arg3[%c0, %c0_1] : memref<4x512xbf16, #tpu.memory_space<vmem>>, vector<4x512xbf16>
    %c0_2 = arith.constant 0 : index
    %c0_3 = arith.constant 0 : index
    %4 = vector.load %arg4[%c0_2, %c0_3] : memref<1x512xf32, #tpu.memory_space<vmem>>, vector<1x512xf32>
    %c0_i32_4 = arith.constant 0 : i32
    %5 = arith.index_cast %c0_i32_4 : i32 to index
    %c0_5 = arith.constant 0 : index
    %c0_6 = arith.constant 0 : index
    %6 = vector.load %arg2[%5, %c0_5, %c0_6] : memref<1x4x256xf32, #tpu.memory_space<vmem>>, vector<1x4x256xf32>
    %7 = vector.shape_cast %6 : vector<1x4x256xf32> to vector<4x256xf32>
    %8 = arith.truncf %7 : vector<4x256xf32> to vector<4x256xbf16>
    %cst = arith.constant dense<0.000000e+00> : vector<256x512xf32>
    %9 = tpu.matmul %8, %3, %cst {dimension_numbers = #tpu.dot_dimension_numbers<[0], [0], [1], [1], [0, 1, 1, 1], [], []>} : vector<4x256xbf16>, vector<4x512xbf16>, vector<256x512xf32> -> vector<256x512xf32>
    %10 = vector.broadcast %4 : vector<1x512xf32> to vector<256x512xf32>
    %11 = arith.addf %9, %10 : vector<256x512xf32>
    %12 = math.absf %11 : vector<256x512xf32>
    %cst_7 = arith.constant 0.000000e+00 : f32
    %13 = vector.broadcast %cst_7 : f32 to vector<256x512xf32>
    %14 = arith.subf %13, %12 : vector<256x512xf32>
    %15 = math.exp %14 : vector<256x512xf32>
    %cst_8 = arith.constant 0.000000e+00 : f32
    %16 = vector.broadcast %cst_8 : f32 to vector<256x512xf32>
    %17 = arith.cmpf oge, %11, %16 : vector<256x512xf32>
    %cst_9 = arith.constant 2.000000e+00 : f32
    %18 = vector.broadcast %cst_9 : f32 to vector<256x512xf32>
    %19 = arith.mulf %18, %15 : vector<256x512xf32>
    %cst_10 = arith.constant 1.000000e+00 : f32
    %20 = vector.broadcast %cst_10 : f32 to vector<256x512xf32>
    %21 = arith.addf %20, %19 : vector<256x512xf32>
    %cst_11 = arith.constant 2.000000e+00 : f32
    %22 = vector.broadcast %cst_11 : f32 to vector<256x512xf32>
    %23 = arith.addf %15, %22 : vector<256x512xf32>
    %24 = arith.mulf %15, %23 : vector<256x512xf32>
    %25 = arith.select %17, %21, %24 : vector<256x512xi1>, vector<256x512xf32>
    %cst_12 = arith.constant 2.000000e+00 : f32
    %26 = vector.broadcast %cst_12 : f32 to vector<256x512xf32>
    %27 = arith.mulf %26, %15 : vector<256x512xf32>
    %28 = arith.mulf %27, %15 : vector<256x512xf32>
    %cst_13 = arith.constant 2.000000e+00 : f32
    %29 = vector.broadcast %cst_13 : f32 to vector<256x512xf32>
    %30 = arith.select %17, %28, %29 : vector<256x512xi1>, vector<256x512xf32>
    %31 = arith.addf %25, %30 : vector<256x512xf32>
    %32 = arith.mulf %11, %25 : vector<256x512xf32>
    %33 = tpu.reciprocal %31 {approx = true} : vector<256x512xf32> -> vector<256x512xf32>
    %34 = arith.mulf %32, %33 : vector<256x512xf32>
    %35 = arith.index_cast %c0_i32_4 : i32 to index
    %c0_14 = arith.constant 0 : index
    %36 = vector.load %arg10[%35, %c0_14] : memref<1x512xf32, #tpu.memory_space<vmem>>, vector<1x512xf32>
    %cst_15 = arith.constant dense<0.000000e+00> : vector<512xf32>
    %37 = vector.multi_reduction <add>, %34, %cst_15 [0] : vector<256x512xf32> to vector<512xf32>
    %38 = vector.shape_cast %37 : vector<512xf32> to vector<1x512xf32>
    %39 = arith.addf %36, %38 : vector<1x512xf32>
    %40 = arith.index_cast %c0_i32_4 : i32 to index
    %c0_16 = arith.constant 0 : index
    %41 = vector.load %arg10[%40, %c0_16] : memref<1x512xf32, #tpu.memory_space<vmem>>, vector<1x512xf32>
    tpu.vector_store %arg10[%40, %c0_16], %39 {strides = array<i32>} : memref<1x512xf32, #tpu.memory_space<vmem>>, vector<1x512xf32>,
    %42 = arith.index_cast %c0_i32_4 : i32 to index
    %c0_17 = arith.constant 0 : index
    %43 = vector.load %arg11[%42, %c0_17] : memref<1x512xf32, #tpu.memory_space<vmem>>, vector<1x512xf32>
    %cst_18 = arith.constant dense<0xFF800000> : vector<512xf32>
    %44 = vector.multi_reduction <maximumf>, %34, %cst_18 [0] : vector<256x512xf32> to vector<512xf32>
    %45 = vector.shape_cast %44 : vector<512xf32> to vector<1x512xf32>
    %46 = arith.maximumf %43, %45 : vector<1x512xf32>
    %47 = arith.index_cast %c0_i32_4 : i32 to index
    %c0_19 = arith.constant 0 : index
    %48 = vector.load %arg11[%47, %c0_19] : memref<1x512xf32, #tpu.memory_space<vmem>>, vector<1x512xf32>
    tpu.vector_store %arg11[%47, %c0_19], %46 {strides = array<i32>} : memref<1x512xf32, #tpu.memory_space<vmem>>, vector<1x512xf32>,
    %c1_i32 = arith.constant 1 : i32
    %c0_i32_20 = arith.constant 0 : i32
    %49 = arith.cmpi eq, %arg1, %c0_i32_20 : i32
    %50 = arith.extui %49 : i1 to i32
    %c0_i32_21 = arith.constant 0 : i32
    %51 = arith.cmpi ne, %50, %c0_i32_21 : i32
    scf.if %51 {
      %c0_22 = arith.constant 0 : index
      %c0_23 = arith.constant 0 : index
      %52 = vector.load %arg10[%c0_22, %c0_23] : memref<1x512xf32, #tpu.memory_space<vmem>>, vector<1x512xf32>
      %cst_24 = arith.constant 0.001953125 : f32
      %53 = vector.broadcast %cst_24 : f32 to vector<1x512xf32>
      %54 = arith.mulf %52, %53 : vector<1x512xf32>
      %c0_25 = arith.constant 0 : index
      %c0_26 = arith.constant 0 : index
      %55 = vector.load %arg11[%c0_25, %c0_26] : memref<1x512xf32, #tpu.memory_space<vmem>>, vector<1x512xf32>
      %cst_27 = arith.constant 5.000000e-01 : f32
      %56 = vector.broadcast %cst_27 : f32 to vector<1x512xf32>
      %57 = arith.mulf %56, %55 : vector<1x512xf32>
      %58 = arith.addf %54, %57 : vector<1x512xf32>
      %c0_28 = arith.constant 0 : index
      %c0_29 = arith.constant 0 : index
      %59 = vector.load %arg5[%c0_28, %c0_29] : memref<1x512xf32, #tpu.memory_space<vmem>>, vector<1x512xf32>
      %60 = arith.mulf %58, %59 : vector<1x512xf32>
      %c0_30 = arith.constant 0 : index
      %c0_31 = arith.constant 0 : index
      %61 = vector.load %arg6[%c0_30, %c0_31] : memref<1x512xf32, #tpu.memory_space<vmem>>, vector<1x512xf32>
      %62 = arith.addf %60, %61 : vector<1x512xf32>
      %63 = math.absf %62 : vector<1x512xf32>
      %cst_32 = arith.constant 0.000000e+00 : f32
      %64 = vector.broadcast %cst_32 : f32 to vector<1x512xf32>
      %65 = arith.subf %64, %63 : vector<1x512xf32>
      %66 = math.exp %65 : vector<1x512xf32>
      %cst_33 = arith.constant 0.000000e+00 : f32
      %67 = vector.broadcast %cst_33 : f32 to vector<1x512xf32>
      %68 = arith.cmpf oge, %62, %67 : vector<1x512xf32>
      %cst_34 = arith.constant 2.000000e+00 : f32
      %69 = vector.broadcast %cst_34 : f32 to vector<1x512xf32>
      %70 = arith.mulf %69, %66 : vector<1x512xf32>
      %cst_35 = arith.constant 1.000000e+00 : f32
      %71 = vector.broadcast %cst_35 : f32 to vector<1x512xf32>
      %72 = arith.addf %71, %70 : vector<1x512xf32>
      %cst_36 = arith.constant 2.000000e+00 : f32
      %73 = vector.broadcast %cst_36 : f32 to vector<1x512xf32>
      %74 = arith.addf %66, %73 : vector<1x512xf32>
      %75 = arith.mulf %66, %74 : vector<1x512xf32>
      %76 = arith.select %68, %72, %75 : vector<1x512xi1>, vector<1x512xf32>
      %cst_37 = arith.constant 2.000000e+00 : f32
      %77 = vector.broadcast %cst_37 : f32 to vector<1x512xf32>
      %78 = arith.mulf %77, %66 : vector<1x512xf32>
      %79 = arith.mulf %78, %66 : vector<1x512xf32>
      %cst_38 = arith.constant 2.000000e+00 : f32
      %80 = vector.broadcast %cst_38 : f32 to vector<1x512xf32>
      %81 = arith.select %68, %79, %80 : vector<1x512xi1>, vector<1x512xf32>
      %82 = arith.addf %76, %81 : vector<1x512xf32>
      %83 = arith.mulf %62, %76 : vector<1x512xf32>
      %84 = tpu.reciprocal %82 {approx = true} : vector<1x512xf32> -> vector<1x512xf32>
      %85 = arith.mulf %83, %84 : vector<1x512xf32>
      %86 = arith.truncf %85 : vector<1x512xf32> to vector<1x512xbf16>
      %c0_39 = arith.constant 0 : index
      %c0_40 = arith.constant 0 : index
      %87 = vector.load %arg7[%c0_39, %c0_40] : memref<512x128xbf16, #tpu.memory_space<vmem>>, vector<512x128xbf16>
      %cst_41 = arith.constant dense<0.000000e+00> : vector<1x128xf32>
      %88 = tpu.matmul %86, %87, %cst_41 {dimension_numbers = #tpu.dot_dimension_numbers<[1], [0], [0], [1], [0, 0, 1, 1], [], []>} : vector<1x512xbf16>, vector<512x128xbf16>, vector<1x128xf32> -> vector<1x128xf32>
      %c0_42 = arith.constant 0 : index
      %c0_43 = arith.constant 0 : index
      %89 = vector.load %arg8[%c0_42, %c0_43] : memref<1x128xf32, #tpu.memory_space<vmem>>, vector<1x128xf32>
      %90 = arith.addf %88, %89 : vector<1x128xf32>
      %c0_44 = arith.constant 0 : index
      %c0_45 = arith.constant 0 : index
      %c0_46 = arith.constant 0 : index
      %91 = vector.load %arg9[%c0_44, %c0_45, %c0_46] : memref<1x1x128xf32, #tpu.memory_space<vmem>>, vector<1x1x128xf32>
      %92 = vector.shape_cast %91 : vector<1x1x128xf32> to vector<1x128xf32>
      %93 = vector.shape_cast %90 : vector<1x128xf32> to vector<1x1x128xf32>
      tpu.vector_store %arg9[%c0_44, %c0_45, %c0_46], %93 {strides = array<i32>} : memref<1x1x128xf32, #tpu.memory_space<vmem>>, vector<1x1x128xf32>,
    } else {
    }
    return
  }
  func.func @transform_0(%arg0: i32, %arg1: i32) -> (i32, i32, i32) {
    %c0_i32 = arith.constant 0 : i32
    %c0_i32_0 = arith.constant 0 : i32
    return %arg0, %c0_i32, %arg1 : i32, i32, i32
  }
  func.func @transform_1(%arg0: i32, %arg1: i32) -> (i32, i32) {
    %c0_i32 = arith.constant 0 : i32
    %c0_i32_0 = arith.constant 0 : i32
    %c0_i32_1 = arith.constant 0 : i32
    return %c0_i32, %c0_i32_0 : i32, i32
  }
  func.func @transform_2(%arg0: i32, %arg1: i32) -> (i32, i32) {
    %c0_i32 = arith.constant 0 : i32
    %c0_i32_0 = arith.constant 0 : i32
    %c0_i32_1 = arith.constant 0 : i32
    return %c0_i32, %c0_i32_0 : i32, i32
  }
  func.func @transform_3(%arg0: i32, %arg1: i32) -> (i32, i32) {
    %c0_i32 = arith.constant 0 : i32
    %c0_i32_0 = arith.constant 0 : i32
    %c0_i32_1 = arith.constant 0 : i32
    return %c0_i32, %c0_i32_0 : i32, i32
  }
  func.func @transform_4(%arg0: i32, %arg1: i32) -> (i32, i32) {
    %c0_i32 = arith.constant 0 : i32
    %c0_i32_0 = arith.constant 0 : i32
    %c0_i32_1 = arith.constant 0 : i32
    return %c0_i32, %c0_i32_0 : i32, i32
  }
  func.func @transform_5(%arg0: i32, %arg1: i32) -> (i32, i32) {
    %c0_i32 = arith.constant 0 : i32
    %c0_i32_0 = arith.constant 0 : i32
    %c0_i32_1 = arith.constant 0 : i32
    return %c0_i32, %c0_i32_0 : i32, i32
  }
  func.func @transform_6(%arg0: i32, %arg1: i32) -> (i32, i32) {
    %c0_i32 = arith.constant 0 : i32
    %c0_i32_0 = arith.constant 0 : i32
    %c0_i32_1 = arith.constant 0 : i32
    return %c0_i32, %c0_i32_0 : i32, i32
  }
  func.func @transform_7(%arg0: i32, %arg1: i32) -> (i32, i32, i32) {
    %c0_i32 = arith.constant 0 : i32
    %c0_i32_0 = arith.constant 0 : i32
    %c0_i32_1 = arith.constant 0 : i32
    return %arg0, %c0_i32, %c0_i32_0 : i32, i32, i32
  }
}

</mosaic_0001>

<bundles_post_ra>
// kernel: tpu_custom_call.1
= control target key start
LH: loop header
LB: loop body
LE: loop exit
PB: predicated region body
PF: predicated region fallthrough
CT: control target
= control target key end

     0   :  { %s7609_s0 = inlined_call_operand.hbm [shape: f32[2,4,256], index: 0, kind: input, shape index: {}]   ;;  %s7610_s1 = inlined_call_operand.hbm [shape: bf16[4,512], index: 1, kind: input, shape index: {}]   ;;  %s7611_s2 = inlined_call_operand.hbm [shape: f32[1,512], index: 2, kind: input, shape index: {}]   ;;  %s7612_s3 = inlined_call_operand.vmem [shape: f32[1,512], index: 3, kind: input, shape index: {}]   ;;  %s7613_s4 = inlined_call_operand.hbm [shape: f32[1,512], index: 4, kind: input, shape index: {}]   ;;  %s7614_s5 = inlined_call_operand.hbm [shape: bf16[512,128], index: 5, kind: input, shape index: {}]   ;;  %s7615_s6 = inlined_call_operand.vmem [shape: f32[1,128], index: 6, kind: input, shape index: {}]   ;;  %s7616_s7 = inlined_call_operand.hbm [shape: f32[2,1,128], index: 7, kind: output, shape index: {}]  }
   0x1   :  { %7654 = sst [smem:[#allocation29_spill]] %s7610_s1 }
   0x2   :  { %7655 = sst [smem:[#allocation30_spill]] %s7611_s2 }
   0x3   :  { %7656 = sst [smem:[#allocation31_spill]] %s7613_s4 }
   0x4   :  { %7657 = sst [smem:[#allocation32_spill]] %s7614_s5 }
   0x5   :  { %12 = vsyncpa [#allocation5], 0 }
   0x6   :  { %14 = vsyncpa [#allocation5 + $0x1], 0 }
   0x7   :  { %15 = vsyncpa [#allocation8], 0 }
   0x8   :  { %16 = vsyncpa [#allocation11], 0 }
   0x9   :  { %17 = vsyncpa [#allocation6], 0 }
   0xa   :  { %19 = vsyncpa [#allocation6 + $0x1], 0  ;;  %s4898_s24 = smov 0   ;;  %s4900_s25 = smov 0  }
   0xb   :  { %s4902_s26 = smov 0   ;;  %s4904_s27 = smov 0  }
   0xc   :  { %s4906_s28 = smov 0   ;;  %s4908_s29 = smov 0  }
   0xd LB: > { %s3832_s30 = sadd.s32 4294967295, %s4843_s29   ;;  %p3834_p0 = scmp.ge.s32.totalorder %s4843_s29, 1  ;;  %s4843_s29 = sphi %s4908_s29, %s25_s29   ;;  %s4839_s28 = sphi %s4906_s28, %s7744_s28   ;;  %s4835_s27 = sphi %s4904_s27, %s7743_s27   ;;  %s4831_s26 = sphi %s4902_s26, %s7742_s26   ;;  %s4827_s25 = sphi %s4900_s25, %s7741_s25   ;;  %s4823_s24 = sphi %s4898_s24, %s7740_s24  }
   0xe   : > { %p4932_p1 = scmp.eq.s32.totalorder %s3832_s30, 0  ;;  %p222_p2 = scmp.lt.s32.totalorder %s4843_s29, 3 }
   0xf   : > { %s4845_s10 = smov [#allocation7]   ;;  %s4846_s12 = smov [#allocation10]  }
  0x10   : > { %s7658_s8 = scalar_select %p4932_p1, 1, 0 }
  0x11   : > { %p4937_p3 = pnand %p3834_p0, %p222_p2  ;;  %s235_s11 = sshll.u32 %s4845_s10, 4  ;;  %s236_s11 = int_to_ptr.vmem [resolvable:$true] %s235_s11 }
  0x12   : > { %s260_s13 = sshll.u32 %s4846_s12, 4  ;;  %s4847_s15 = smov [#allocation9]   ;;  %s261_s13 = int_to_ptr.vmem [resolvable:$true] %s260_s13 }
  0x13   : > { %s7659_s9 = scalar_select %p4937_p3, 1, 0 }
  0x14   : > { %p3983_p5 = pneg %p4937_p3  ;;  %s246_s16 = sshll.u32 %s4847_s15, 4  ;;  %s4950_s16 = int_to_ptr.vmem [resolvable:$true] %s246_s16 }
  0x15   : > { %s4634_s17 = scalar_lea.vmem %s236_s11, 128  ;;  %p4642_p11 = scmp.lt.s32.totalorder %s236_s11, %s236_s11 }
  0x16   : > { %p4946_p6 = pnand %p3983_p5, %p4932_p1  ;;  %p4635_p8 = scmp.ne.s32.totalorder %s236_s11, %s4634_s17 }
  0x17   : > { %p4643_p12 = scmp.lt.s32.totalorder %s4634_s17, %s4634_s17 }
  0x18   : > { %p4625_p7 = pneg %p4946_p6 }
  0x19   : > { %p4644_p13 = por %p4643_p12, %p4642_p11 }
  0x1a   : > { %p4637_p9 = pnand %p4635_p8, %p4625_p7 }
  0x1c   : > { %p4638_p10 = pneg %p4637_p9 }
  0x1e   : > { %p4645_p0 = pnand %p4644_p13, %p4638_p10 }
  0x20   : > { %4648 = shalt.err (!%p4645_p0)
}
  0x21   : > { %s7661_s1 = sld [smem:[#allocation29_spill]]  ;;  %s4660_s20 = scalar_lea.vmem %s261_s13, 64 }
  0x22   : > { %p4661_p2 = scmp.ne.s32.totalorder %s261_s13, %s4660_s20  ;;  %p4668_p8 = scmp.lt.s32.totalorder %s261_s13, %s261_s13 }
  0x23   : > { %p4669_p9 = scmp.lt.s32.totalorder %s4660_s20, %s4660_s20 }
  0x24   : > { %p4663_p5 = pnand %p4661_p2, %p4625_p7 }
  0x25   : > { %p4670_p3 = por %p4669_p9, %p4668_p8 }
  0x26   : > { %p4664_p4 = pneg %p4663_p5 }
  0x27   : > { %3986 = dma.hbm_to_vmem [thread:$0]  (!%p4946_p6), %s7661_s1, 128, %s236_s11, [#allocation8]  }
  0x28   : > { %p4671_p1 = pnand %p4670_p3, %p4664_p4 }
  0x2a   : > { %4674 = shalt.err (!%p4671_p1)
}
  0x2b   : > { %s7662_s4 = sld [smem:[#allocation31_spill]]  ;;  %s4686_s23 = scalar_lea.vmem %s4950_s16, 64 }
  0x2c   : > { %p4687_p10 = scmp.ne.s32.totalorder %s4950_s16, %s4686_s23  ;;  %p4694_p13 = scmp.lt.s32.totalorder %s4950_s16, %s4950_s16 }
  0x2d   : > { %p4695_p3 = scmp.lt.s32.totalorder %s4686_s23, %s4686_s23 }
  0x2e   : > { %p4689_p11 = pnand %p4687_p10, %p4625_p7 }
  0x2f   : > { %p4696_p1 = por %p4695_p3, %p4694_p13 }
  0x30   : > { %p4690_p12 = pneg %p4689_p11 }
  0x31   : > { %3992 = dma.hbm_to_vmem [thread:$0]  (!%p4946_p6), %s7662_s4, 64, %s261_s13, [#allocation11]  }
  0x32   : > { %p4697_p4 = pnand %p4696_p1, %p4690_p12 }
  0x34   : > { %4700 = shalt.err (!%p4697_p4)
}
  0x35   : > { %s7663_s2 = sld [smem:[#allocation30_spill]]  ;;  %s4848_s12 = smov [#allocation12]  }
  0x36   : > { %s270_s13 = sshll.u32 %s4848_s12, 4  ;;  %s271_s13 = int_to_ptr.vmem [resolvable:$true] %s270_s13 }
  0x37   : > { %s4712_s15 = scalar_lea.vmem %s271_s13, 4096  ;;  %p4720_p8 = scmp.lt.s32.totalorder %s271_s13, %s271_s13 }
  0x38   : > { %p4713_p0 = scmp.ne.s32.totalorder %s271_s13, %s4712_s15  ;;  %p4721_p9 = scmp.lt.s32.totalorder %s4712_s15, %s4712_s15 }
  0x3a   : > { %p4715_p2 = pnand %p4713_p0, %p4625_p7  ;;  %p4722_p10 = por %p4721_p9, %p4720_p8 }
  0x3b   : > { %3989 = dma.hbm_to_vmem [thread:$0]  (!%p4946_p6), %s7663_s2, 64, %s4950_s16, [#allocation8]  }
  0x3c   : > { %p4716_p5 = pneg %p4715_p2 }
  0x3e   : > { %p4723_p11 = pnand %p4722_p10, %p4716_p5 }
  0x40   : > { %4726 = shalt.err (!%p4723_p11)
}
  0x41   : > { %s4849_s17 = smov 64   ;;  %s4850_s16 = smov 4  }
  0x42   : > { %s7664_s5 = sld [smem:[#allocation32_spill]]  ;;  %s3833_s20 = sadd.s32 4294967294, %s4843_s29  }
  0x43   : > { %s37_s21 = sadd.s32 1, %s4839_s28  ;;  %s46_s22 = sadd.s32 1, %s4831_s26 }
  0x44   : > { %p39_p7 = scmp.ge.s32.totalorder %s37_s21, 2  ;;  %p53_p12 = scmp.ne.s32.totalorder %s4831_s26, %s4827_s25 }
  0x45   : > { %p54_p13 = scmp.eq.s32.totalorder %s4843_s29, 0  ;;  %p59_p1 = scmp.ne.s32.totalorder %s4827_s25, %s4823_s24 }
  0x46   : > { %s7746_s21 = smov (%p39_p7, %s37_s21), 0  ;;  %p7666_p0 = scmp.ne.s32.totalorder %s7658_s8, 0 }
  0x47   : > { %p4999_p3 = por %p54_p13, %p53_p12  ;;  %s41_s14 = ssub.s32 %s4839_s28, %s7746_s21 }
  0x48   : > { %3995 = dma.hbm_to_vmem [thread:$0]  (!%p4946_p6), %s7664_s5, 4096, %s271_s13, [#allocation11], %s4849_s17, %s4849_s17, %s4850_s16  }
  0x49   : > { %p209_p6 = scmp.eq.s32.totalorder %s3832_s30, 1  ;;  %p44_p4 = scmp.eq.s32.totalorder %s41_s14, 0 }
  0x4a   : > { %p5011_p2 = por %p7666_p0, %p59_p1  ;;  %p215_p8 = scmp.eq.s32.totalorder %s3833_s20, 1 }
  0x4b   : > { %p5015_p5 = por %p209_p6, %p53_p12  ;;  %p4008_p10 = scmp.lt.s32.totalorder %s4843_s29, 2 }
  0x4c   : > { %s5020_s12 = scalar_select %p44_p4, %s4831_s26, %s46_s22  }
  0x4d   : > { %p5022_p9 = por %p215_p8, %p59_p1  ;;  %s287_s15 = sand.u32 1, %s4831_s26  }
  0x4e   : > { %s3918_s30 = sshll.u32 %s4839_s28, 7  ;;  %s3840_s17 = sshll.u32 %s287_s15, 3 }
  0x4f   : > { %s299_s19 = scalar_lea.hbm %s7609_s0, %s3918_s30  ;;  %s291_s14 = scalar_lea.vmem [#allocation4], %s3840_s17 }
  0x50   : > { %s301_s1 = sshll.u32 %s291_s14, 4  ;;  %p5034_p11 = pnand %p4008_p10, %p4999_p3  ;;  %s302_s1 = int_to_ptr.vmem [resolvable:$true] %s301_s1 }
  0x51   : > { %s288_s20 = scalar_lea.sflag [#allocation5], %s287_s15  ;;  %s4740_s22 = scalar_lea.vmem %s302_s1, 128 }
  0x52   : > { %p4729_p7 = pneg %p5034_p11  ;;  %p4741_p12 = scmp.ne.s32.totalorder %s302_s1, %s4740_s22 }
  0x53   : > { %s4851_s4 = smov [#allocation4]  }
  0x54   : > { %p4743_p13 = pnand %p4741_p12, %p4729_p7  ;;  %s4745_s5 = sshll.u32 %s4851_s4, 4  ;;  %s4746_s5 = int_to_ptr.vmem [resolvable:$false] %s4745_s5 }
  0x55   : > { %s4747_s30 = scalar_lea.vmem %s4746_s5, 256  ;;  %p4748_p6 = scmp.lt.s32.totalorder %s302_s1, %s4746_s5 }
  0x56   : > { %p4744_p1 = pneg %p4743_p13  ;;  %p4749_p4 = scmp.lt.s32.totalorder %s4747_s30, %s4740_s22 }
  0x58   : > { %p4750_p0 = por %p4749_p4, %p4748_p6 }
  0x5a   : > { %p4751_p3 = pnand %p4750_p0, %p4744_p1 }
  0x5c   : > { %4754 = shalt.err (!%p4751_p3)
}
  0x5d   : > { %3999 = dma.hbm_to_vmem [thread:$0]  (!%p5034_p11), %s299_s19, 128, %s302_s1, %s288_s20  }
  0x5e   : > { %p7671_p8 = scmp.ne.s32.totalorder %s7659_s9, 0 }
  0x60   : > { %310 = sbr.rel (%p7671_p8) target bundleno = 1328 (0x530), region = 48 }
  0x65   : > { %s5045_s23 = sand.u32 1, %s4827_s25  }
  0x66   : > { %s3844_s4 = sshll.u32 %s5045_s23, 3  ;;  %s313_s15 = scalar_lea.sflag [#allocation5], %s5045_s23 }
  0x67   : > { %s316_s17 = scalar_lea.vmem [#allocation4], %s3844_s4 }
  0x68   : > { %4806 = dma.done.wait (%p5011_p2), %s313_s15, 128  }
  0x69   : > { %4808 = vsyncadd (%p5011_p2), %s313_s15, 4294967168  ;;  %p7672_p10 = scmp.ne.s32.totalorder %s7658_s8, 0 }
  0x6b   : > { %4810 = dma.done.wait (%p7672_p10), [#allocation8], 192  }
  0x6c   : > { %4812 = vsyncadd (%p7672_p10), [#allocation8], 4294967104 }
  0x6d   : > { %4814 = dma.done.wait (%p7672_p10), [#allocation11], 4160  }
  0x6e   : > { %4816 = vsyncadd (%p7672_p10), [#allocation11], 4294963136  ;;  %v368_v0 = vlaneseq  ;;  %v4852_v1 = vmov 1983009808   ;;  %v7673_v3 = vmov 0  ;;  %v4853_v5 = vmov 0  }
  0x6f   : > { %v438_v2 = vunpack.c.l.s4 %v4852_v1  ;;  %547 = vmatprep.mubr.bf16.mxu0 %v4853_v5  ;;  %740 = vmatprep.mubr.bf16.mxu1 %v4853_v5  ;;  %v4854_v6 = vmov 0.0   ;;  %v4855_v7 = vmov -inf   ;;  %v376_v10 = vld [vmem:[%s316_s17] sm:$0xff]  ;;  %v374_v11 = vld [vmem:[#allocation7] sm:$0xff]  ;;  %vm502_vm1 = vcmask 1041408   ;;  %s3915_s9 = sshll.u32 %s4835_s27, 4 }
  0x70   : > { %vm5061_vm0 = vcmp.lt.s32.totalorder %v368_v0, 512  ;;  %v5065_v4 = vshrl.u32 %v368_v0, 7  ;;  %v380_v12 = vpack.c.bf16 %v376_v10, %v376_v10  ;;  %v436_v14 = vcombine.high %v374_v11, %v374_v11  ;;  %v375_v39 = vld [vmem:[#allocation9] sm:$0xf]  ;;  %s361_s10 = scalar_lea.vmem [#allocation13], %s5045_s23  ;;  %s3715_s14 = scalar_lea.hbm %s7616_s7, %s3915_s9 }
  0x71   : > { %v7674_v3 = vsel %vm5061_vm0, 4294967295, %v7673_v3  ;;  %372 = vst.msk [vmem:[#allocation2] sm:$0xf] %vm5061_vm0, %v4854_v6  ;;  %373 = vst.msk [vmem:[#allocation3] sm:$0xf] %vm5061_vm0, %v4855_v7  ;;  %v439_v8 = vunpack.c.0.s8 %v438_v2  ;;  %v378_v20 = vcombine.high %v376_v10, %v376_v10  ;;  %vm453_vm2 = vcmask 31744  }
  0x72   : > { %7675 = vst [vmem:[#allocation18_spill] sm:$0xff] %v7674_v3  ;;  %7676 = vst [vmem:[#allocation19_spill] sm:$0xff] %v5065_v4  ;;  %403 = vxpose.xlu0.c.b16.start.end [1/1] (short) %v380_v12, 128  ;;  %v7621_v38 = vsub.s32 0, %v5065_v4  ;;  %v7620_v40 = vsub.s32 2, %v5065_v4  ;;  %v7623_v43 = vsub.s32 1, %v5065_v4  ;;  %v7622_v46 = vsub.s32 3, %v5065_v4 }
  0x73   : > { %v442_v9 = vsub.s32 %v439_v8, %v5065_v4  ;;  %v381_v21 = vpack.c.bf16 %v378_v20, %v378_v20  ;;  %s3717_s16 = sshll.u32 %s361_s10, 4  ;;  %s3705_s20 = scalar_lea.sflag [#allocation6], %s5045_s23  ;;  %s3718_s16 = int_to_ptr.vmem [resolvable:$true] %s3717_s16 }
  0x74   : > { %v5140_v41 = vrot.slane %v375_v39, %v7621_v38  ;;  %v5145_v44 = vrot.slane %v375_v39, %v7620_v40  ;;  %v5153_v48 = vrot.slane %v375_v39, %v7623_v43  ;;  %v5160_v52 = vrot.slane %v375_v39, %v7622_v46  ;;  %s4755_s22 = scalar_lea.vmem %s3718_s16, 16  ;;  %s4857_s27 = smov [#allocation13]  }
  0x75   : > { %v443_v13 = vrot.slane %v374_v11, %v442_v9  ;;  %v450_v16 = vrot.slane %v436_v14, %v442_v9  ;;  %p4756_p2 = scmp.ne.s32.totalorder %s3718_s16, %s4755_s22  ;;  %s4759_s30 = sshll.u32 %s4857_s27, 4  ;;  %s4760_s30 = int_to_ptr.vmem [resolvable:$false] %s4759_s30 }
  0x76   : > { %s4761_s4 = scalar_lea.vmem %s4760_s30, 32  ;;  %p4762_p12 = scmp.lt.s32.totalorder %s3718_s16, %s4760_s30 }
  0x77   : > { %v451_v15 = vcombine.high %v443_v13, %v443_v13  ;;  %v504_v17 = vsel %vm502_vm1, %v443_v13, 0  ;;  %v452_v18 = vcombine.high %v450_v16, %v450_v16  ;;  %v510_v19 = vsel %vm502_vm1, %v450_v16, 0  ;;  %p4757_p11 = pnand %p4756_p2, %p5015_p5  ;;  %p4763_p13 = scmp.lt.s32.totalorder %s4761_s4, %s4755_s22 }
  0x79   : > { %3849 = vmatprep.subr.msk.bf16.mxu0 %vm502_vm1, %v451_v15  ;;  %3866 = vmatprep.subr.msk.bf16.mxu1 %vm502_vm1, %v452_v18  ;;  %p4758_p7 = pneg %p4757_p11  ;;  %p4764_p1 = por %p4763_p13, %p4762_p12 }
  0x7a   : > { %530 = vmatpush1.bf16.msra.mxu0 %v504_v17  ;;  %723 = vmatpush1.bf16.msra.mxu1 %v510_v19 }
  0x7b   : > { %p4765_p6 = pnand %p4764_p1, %p4758_p7 }
  0x8f   : > { %419 = vxpose.xlu0.c.b16.start.end [1/1] (short) %v381_v21, 128 }
  0xd4   : > { %v411_v22 = vpop.trf.xlu0 }
  0xd5   : > { %3850 = vmatmul.mubr.msk.bf16.vlgmr.msra.gmra.mxu0 %vm453_vm2, %v411_v22  ;;  %3867 = vmatmul.mubr.msk.bf16.vlgmr.msra.gmra.mxu1 %vm453_vm2, %v411_v22 }
  0xd6   : > { %557 = vmatprep.mubr.bf16.mxu0 %v4853_v5  ;;  %750 = vmatprep.mubr.bf16.mxu1 %v4853_v5 }
  0xd8   : > { %v412_v23 = vpop.trf.xlu0 }
  0xdc   : > { %v413_v24 = vpop.trf.xlu0 }
  0xdd   : > { %3851 = vmatmul.mubr.msk.bf16.gmra.mxu0 %vm453_vm2, %v412_v23  ;;  %3868 = vmatmul.mubr.msk.bf16.gmra.mxu1 %vm453_vm2, %v412_v23 }
  0xde   : > { %567 = vmatprep.mubr.bf16.mxu0 %v4853_v5  ;;  %760 = vmatprep.mubr.bf16.mxu1 %v4853_v5 }
  0xe0   : > { %v414_v25 = vpop.trf.xlu0 }
  0xe4   : > { %v415_v26 = vpop.trf.xlu0 }
  0xe5   : > { %3852 = vmatmul.mubr.msk.bf16.gmra.mxu0 %vm453_vm2, %v413_v24  ;;  %3869 = vmatmul.mubr.msk.bf16.gmra.mxu1 %vm453_vm2, %v413_v24 }
  0xe6   : > { %577 = vmatprep.mubr.bf16.mxu0 %v4853_v5  ;;  %770 = vmatprep.mubr.bf16.mxu1 %v4853_v5 }
  0xe8   : > { %v416_v27 = vpop.trf.xlu0 }
  0xec   : > { %v417_v28 = vpop.trf.xlu0 }
  0xed   : > { %3853 = vmatmul.mubr.msk.bf16.gmra.mxu0 %vm453_vm2, %v414_v25  ;;  %3870 = vmatmul.mubr.msk.bf16.gmra.mxu1 %vm453_vm2, %v414_v25 }
  0xee   : > { %587 = vmatprep.mubr.bf16.mxu0 %v4853_v5  ;;  %780 = vmatprep.mubr.bf16.mxu1 %v4853_v5 }
  0xf0   : > { %v418_v29 = vpop.trf.xlu0 }
  0xf4   : > { %v427_v30 = vpop.trf.xlu0 }
  0xf5   : > { %3854 = vmatmul.mubr.msk.bf16.gmra.mxu0 %vm453_vm2, %v415_v26  ;;  %3871 = vmatmul.mubr.msk.bf16.gmra.mxu1 %vm453_vm2, %v415_v26 }
  0xf6   : > { %597 = vmatprep.mubr.bf16.mxu0 %v4853_v5  ;;  %790 = vmatprep.mubr.bf16.mxu1 %v4853_v5 }
  0xf8   : > { %v428_v31 = vpop.trf.xlu0 }
  0xfc   : > { %v429_v32 = vpop.trf.xlu0 }
  0xfd   : > { %3855 = vmatmul.mubr.msk.bf16.gmra.mxu0 %vm453_vm2, %v416_v27  ;;  %3872 = vmatmul.mubr.msk.bf16.gmra.mxu1 %vm453_vm2, %v416_v27 }
  0xfe   : > { %607 = vmatprep.mubr.bf16.mxu0 %v4853_v5  ;;  %800 = vmatprep.mubr.bf16.mxu1 %v4853_v5 }
 0x100   : > { %v430_v33 = vpop.trf.xlu0 }
 0x104   : > { %v431_v34 = vpop.trf.xlu0 }
 0x105   : > { %3856 = vmatmul.mubr.msk.bf16.gmra.mxu0 %vm453_vm2, %v417_v28  ;;  %3873 = vmatmul.mubr.msk.bf16.gmra.mxu1 %vm453_vm2, %v417_v28 }
 0x106   : > { %617 = vmatprep.mubr.bf16.mxu0 %v4853_v5  ;;  %810 = vmatprep.mubr.bf16.mxu1 %v4853_v5 }
 0x108   : > { %v432_v35 = vpop.trf.xlu0 }
 0x10c   : > { %v433_v36 = vpop.trf.xlu0 }
 0x10d   : > { %3857 = vmatmul.mubr.msk.bf16.gmra.mxu0 %vm453_vm2, %v418_v29  ;;  %3874 = vmatmul.mubr.msk.bf16.gmra.mxu1 %vm453_vm2, %v418_v29 }
 0x10e   : > { %627 = vmatprep.mubr.bf16.mxu0 %v4853_v5  ;;  %820 = vmatprep.mubr.bf16.mxu1 %v4853_v5 }
 0x110   : > { %v434_v37 = vpop.trf.xlu0 }
 0x115   : > { %3858 = vmatmul.mubr.msk.bf16.gmra.mxu0 %vm453_vm2, %v427_v30  ;;  %3875 = vmatmul.mubr.msk.bf16.gmra.mxu1 %vm453_vm2, %v427_v30 }
 0x116   : > { %637 = vmatprep.mubr.bf16.mxu0 %v4853_v5  ;;  %830 = vmatprep.mubr.bf16.mxu1 %v4853_v5 }
 0x11d   : > { %3859 = vmatmul.mubr.msk.bf16.gmra.mxu0 %vm453_vm2, %v428_v31  ;;  %3876 = vmatmul.mubr.msk.bf16.gmra.mxu1 %vm453_vm2, %v428_v31 }
 0x11e   : > { %647 = vmatprep.mubr.bf16.mxu0 %v4853_v5  ;;  %840 = vmatprep.mubr.bf16.mxu1 %v4853_v5 }
 0x125   : > { %3860 = vmatmul.mubr.msk.bf16.gmra.mxu0 %vm453_vm2, %v429_v32  ;;  %3877 = vmatmul.mubr.msk.bf16.gmra.mxu1 %vm453_vm2, %v429_v32 }
 0x126   : > { %657 = vmatprep.mubr.bf16.mxu0 %v4853_v5  ;;  %850 = vmatprep.mubr.bf16.mxu1 %v4853_v5 }
 0x12d   : > { %3861 = vmatmul.mubr.msk.bf16.gmra.mxu0 %vm453_vm2, %v430_v33  ;;  %3878 = vmatmul.mubr.msk.bf16.gmra.mxu1 %vm453_vm2, %v430_v33 }
 0x12e   : > { %667 = vmatprep.mubr.bf16.mxu0 %v4853_v5  ;;  %860 = vmatprep.mubr.bf16.mxu1 %v4853_v5 }
 0x135   : > { %3862 = vmatmul.mubr.msk.bf16.gmra.mxu0 %vm453_vm2, %v431_v34  ;;  %3879 = vmatmul.mubr.msk.bf16.gmra.mxu1 %vm453_vm2, %v431_v34 }
 0x136   : > { %677 = vmatprep.mubr.bf16.mxu0 %v4853_v5  ;;  %870 = vmatprep.mubr.bf16.mxu1 %v4853_v5 }
 0x13d   : > { %3863 = vmatmul.mubr.msk.bf16.gmra.mxu0 %vm453_vm2, %v432_v35  ;;  %3880 = vmatmul.mubr.msk.bf16.gmra.mxu1 %vm453_vm2, %v432_v35 }
 0x13e   : > { %687 = vmatprep.mubr.bf16.mxu0 %v4853_v5  ;;  %880 = vmatprep.mubr.bf16.mxu1 %v4853_v5 }
 0x145   : > { %3864 = vmatmul.mubr.msk.bf16.gmra.mxu0 %vm453_vm2, %v433_v36  ;;  %3881 = vmatmul.mubr.msk.bf16.gmra.mxu1 %vm453_vm2, %v433_v36 }
 0x146   : > { %697 = vmatprep.mubr.bf16.mxu0 %v4853_v5  ;;  %890 = vmatprep.mubr.bf16.mxu1 %v4853_v5 }
 0x14d   : > { %3865 = vmatmul.mubr.msk.bf16.gmra.mxu0 %vm453_vm2, %v434_v37  ;;  %3882 = vmatmul.mubr.msk.bf16.gmra.mxu1 %vm453_vm2, %v434_v37 }
 0x195   : > { %v549_v42 = vpop.f32.mrf.mxu0  ;;  %v742_v45 = vpop.f32.mrf.mxu1 }
 0x196   : > { %v5149_v47 = vadd.f32 %v549_v42, %v5140_v41  ;;  %v5156_v50 = vadd.f32 %v742_v45, %v5145_v44 }
 0x197   : > { %v551_v49 = vpop.f32.mrf.mxu0  ;;  %v744_v51 = vpop.f32.mrf.mxu1 }
 0x198   : > { %v901_v53 = vand.u32 2147483647, %v5149_v47  ;;  %v5164_v54 = vadd.f32 %v551_v49, %v5153_v48  ;;  %v903_v56 = vand.u32 2147483647, %v5156_v50  ;;  %v5168_v59 = vadd.f32 %v744_v51, %v5160_v52 }
 0x199   : > { %v553_v55 = vpop.f32.mrf.mxu0  ;;  %v746_v57 = vpop.f32.mrf.mxu1  ;;  %vm1413_vm3 = vcmp.ge.f32.partialorder %v5149_v47, 0.0  ;;  %vm1415_vm4 = vcmp.ge.f32.partialorder %v5156_v50, 0.0 }
 0x19a   : > { %v1029_v58 = vsub.f32 0.0, %v901_v53  ;;  %v902_v60 = vand.u32 2147483647, %v5164_v54  ;;  %v5172_v61 = vadd.f32 %v553_v55, %v5140_v41  ;;  %v5175_v62 = vadd.f32 %v746_v57, %v5145_v44 }
 0x19b   : > { %v555_v63 = vpop.f32.mrf.mxu0  ;;  %v1031_v0 = vsub.f32 0.0, %v903_v56  ;;  %v904_v2 = vand.u32 2147483647, %v5168_v59  ;;  %v748_v7 = vpop.f32.mrf.mxu1  ;;  %vm1414_vm5 = vcmp.ge.f32.partialorder %v5164_v54, 0.0  ;;  %vm1416_vm6 = vcmp.ge.f32.partialorder %v5168_v59, 0.0 }
 0x19c   : > { %v1157_v1 = vmul.f32 1.442695, %v1029_v58  ;;  %v1030_v5 = vsub.f32 0.0, %v902_v60  ;;  %v905_v6 = vand.u32 2147483647, %v5172_v61  ;;  %v5181_v11 = vadd.f32 %v555_v63, %v5153_v48 }
 0x19d   : > { %v907_v8 = vand.u32 2147483647, %v5175_v62  ;;  %v559_v9 = vpop.f32.mrf.mxu0  ;;  %v1161_v10 = vmul.f32 1.442695, %v1031_v0  ;;  %v1032_v12 = vsub.f32 0.0, %v904_v2  ;;  %v5184_v13 = vadd.f32 %v748_v7, %v5160_v52  ;;  %v752_v18 = vpop.f32.mrf.mxu1 }
 0x19e   : > { %4107 = vpow2.f32 %v1157_v1  ;;  %v1159_v14 = vmul.f32 1.442695, %v1030_v5  ;;  %v1033_v15 = vsub.f32 0.0, %v905_v6  ;;  %v5187_v16 = vadd.f32 %v559_v9, %v5140_v41 }
 0x19f   : > { %v1035_v17 = vsub.f32 0.0, %v907_v8  ;;  %4109 = vpow2.f32 %v1161_v10  ;;  %v906_v19 = vand.u32 2147483647, %v5181_v11  ;;  %v561_v20 = vpop.f32.mrf.mxu0  ;;  %v1163_v21 = vmul.f32 1.442695, %v1032_v12  ;;  %v754_v29 = vpop.f32.mrf.mxu1 }
 0x1a0   : > { %v908_v22 = vand.u32 2147483647, %v5184_v13  ;;  %4111 = vpow2.f32 %v1159_v14  ;;  %v1165_v23 = vmul.f32 1.442695, %v1033_v15  ;;  %v909_v24 = vand.u32 2147483647, %v5187_v16 }
 0x1a1   : > { %v5193_v25 = vadd.f32 %v752_v18, %v5145_v44  ;;  %v1169_v26 = vmul.f32 1.442695, %v1035_v17  ;;  %v5196_v27 = vadd.f32 %v561_v20, %v5153_v48  ;;  %v1034_v28 = vsub.f32 0.0, %v906_v19  ;;  %v563_v37 = vpop.f32.mrf.mxu0  ;;  %v756_v58 = vpop.f32.mrf.mxu1 }
 0x1a2   : > { %4113 = vpow2.f32 %v1163_v21  ;;  %v1036_v30 = vsub.f32 0.0, %v908_v22  ;;  %v1037_v31 = vsub.f32 0.0, %v909_v24  ;;  %v5201_v34 = vadd.f32 %v754_v29, %v5160_v52 }
 0x1a3   : > { %4115 = vpow2.f32 %v1165_v23  ;;  %v911_v32 = vand.u32 2147483647, %v5193_v25  ;;  %v910_v33 = vand.u32 2147483647, %v5196_v27  ;;  %v1167_v35 = vmul.f32 1.442695, %v1034_v28 }
 0x1a4   : > { %4117 = vpow2.f32 %v1169_v26  ;;  %v1171_v36 = vmul.f32 1.442695, %v1036_v30  ;;  %v1173_v42 = vmul.f32 1.442695, %v1037_v31  ;;  %v912_v51 = vand.u32 2147483647, %v5201_v34  ;;  %v565_v30 = vpop.f32.mrf.mxu0 }
 0x1a5   : > { %v1039_v45 = vsub.f32 0.0, %v911_v32  ;;  %v1038_v49 = vsub.f32 0.0, %v910_v33  ;;  %4119 = vpow2.f32 %v1167_v35  ;;  %v5205_v53 = vadd.f32 %v563_v37, %v5140_v41 }
 0x1a6   : > { %4121 = vpow2.f32 %v1171_v36  ;;  %v1040_v1 = vsub.f32 0.0, %v912_v51  ;;  %v5209_v7 = vadd.f32 %v756_v58, %v5145_v44  ;;  %vm1417_vm7 = vcmp.ge.f32.partialorder %v5172_v61, 0.0 }
 0x1a7   : > { %4123 = vpow2.f32 %v1173_v42  ;;  %v1177_v60 = vmul.f32 1.442695, %v1039_v45  ;;  %v1175_v0 = vmul.f32 1.442695, %v1038_v49  ;;  %v913_v6 = vand.u32 2147483647, %v5205_v53 }
 0x1a8   : > { %v1179_v18 = vmul.f32 1.442695, %v1040_v1  ;;  %v915_v23 = vand.u32 2147483647, %v5209_v7  ;;  %vm1419_vm8 = vcmp.ge.f32.partialorder %v5175_v62, 0.0  ;;  %v5223_v51 = vadd.f32 %v565_v30, %v5153_v48 }
 0x1a9   : > { %4125 = vpow2.f32 %v1177_v60  ;;  %v1041_v22 = vsub.f32 0.0, %v913_v6  ;;  %vm1418_vm9 = vcmp.ge.f32.partialorder %v5181_v11, 0.0  ;;  %vm1420_vm10 = vcmp.ge.f32.partialorder %v5184_v13, 0.0 }
 0x1aa   : > { %4127 = vpow2.f32 %v1175_v0  ;;  %v5220_v49 = vsub.f32 0.0, %v915_v23  ;;  %vm1421_vm11 = vcmp.ge.f32.partialorder %v5187_v16, 0.0  ;;  %vm1423_vm12 = vcmp.ge.f32.partialorder %v5193_v25, 0.0 }
 0x1ab   : > { %v4108_v39 = vpop.eup %4107  ;;  %4129 = vpow2.f32 %v1179_v18  ;;  %v1181_v45 = vmul.f32 1.442695, %v1041_v22  ;;  %vm1422_vm13 = vcmp.ge.f32.partialorder %v5196_v27, 0.0  ;;  %vm1424_vm14 = vcmp.ge.f32.partialorder %v5201_v34, 0.0 }
 0x1ac   : > { %v4110_v55 = vpop.eup %4109  ;;  %v1541_v56 = vmul.f32 2.0, %v4108_v39  ;;  %v1797_v57 = vadd.f32 2.0, %v4108_v39  ;;  %vm1425_vm15 = vcmp.ge.f32.partialorder %v5205_v53, 0.0  ;;  %vm1427_vm1 = vcmp.ge.f32.partialorder %v5209_v7, 0.0 }
 0x1ad   : > { %v4112_v63 = vpop.eup %4111  ;;  %v1543_v2 = vmul.f32 2.0, %v4110_v55  ;;  %v1799_v5 = vadd.f32 2.0, %v4110_v55  ;;  %4131 = vpow2.f32 %v1181_v45  ;;  %vm1426_vm2 = vcmp.ge.f32.partialorder %v5223_v51, 0.0 }
 0x1ae   : > { %v1669_v8 = vadd.f32 1.0, %v1541_v56  ;;  %v1925_v9 = vmul.f32 %v4108_v39, %v1797_v57  ;;  %v2181_v10 = vmul.f32 %v4108_v39, %v1541_v56  ;;  %v1542_v14 = vmul.f32 2.0, %v4112_v63 }
 0x1af   : > { %v4114_v12 = vpop.eup %4113  ;;  %v1798_v15 = vadd.f32 2.0, %v4112_v63  ;;  %v1671_v20 = vadd.f32 1.0, %v1543_v2  ;;  %v1927_v21 = vmul.f32 %v4110_v55, %v1799_v5  ;;  %v2183_v28 = vmul.f32 %v4110_v55, %v1543_v2 }
 0x1b0   : > { %v4116_v17 = vpop.eup %4115  ;;  %v5215_v24 = vsel %vm1413_vm3, %v1669_v8, %v1925_v9  ;;  %v2309_v26 = vsel %vm1413_vm3, %v2181_v10, 2.0  ;;  %v1544_v29 = vmul.f32 2.0, %v4114_v12  ;;  %v1670_v31 = vadd.f32 1.0, %v1542_v14 }
 0x1b1   : > { %v4118_v19 = vpop.eup %4117  ;;  %v1926_v32 = vmul.f32 %v4112_v63, %v1798_v15  ;;  %v2182_v33 = vmul.f32 %v4112_v63, %v1542_v14  ;;  %v1800_v35 = vadd.f32 2.0, %v4114_v12  ;;  %v1545_v36 = vmul.f32 2.0, %v4116_v17 }
 0x1b2   : > { %v1801_v37 = vadd.f32 2.0, %v4116_v17  ;;  %v1547_v39 = vmul.f32 2.0, %v4118_v19  ;;  %v1803_v42 = vadd.f32 2.0, %v4118_v19  ;;  %v4120_v55 = vpop.eup %4119  ;;  %v2437_v56 = vadd.f32 %v2309_v26, %v5215_v24 }
 0x1b3   : > { %v5228_v57 = vsel %vm1415_vm4, %v1671_v20, %v1927_v21  ;;  %v2311_v58 = vsel %vm1415_vm4, %v2183_v28, 2.0  ;;  %v1672_v60 = vadd.f32 1.0, %v1544_v29  ;;  %v4122_v63 = vpop.eup %4121  ;;  %v5234_v0 = vsel %vm1414_vm5, %v1670_v31, %v1926_v32 }
 0x1b4   : > { %v2310_v1 = vsel %vm1414_vm5, %v2182_v33, 2.0  ;;  %v1928_v2 = vmul.f32 %v4114_v12, %v1800_v35  ;;  %v2184_v5 = vmul.f32 %v4114_v12, %v1544_v29  ;;  %v4124_v6 = vpop.eup %4123  ;;  %v1673_v8 = vadd.f32 1.0, %v1545_v36 }
 0x1b5   : > { %v1929_v9 = vmul.f32 %v4116_v17, %v1801_v37  ;;  %v2185_v10 = vmul.f32 %v4116_v17, %v1545_v36  ;;  %v1675_v14 = vadd.f32 1.0, %v1547_v39  ;;  %v1931_v15 = vmul.f32 %v4118_v19, %v1803_v42 }
 0x1b6   : > { %v2187_v18 = vmul.f32 %v4118_v19, %v1547_v39  ;;  %v1546_v20 = vmul.f32 2.0, %v4120_v55  ;;  %v1802_v21 = vadd.f32 2.0, %v4120_v55  ;;  %v2439_v22 = vadd.f32 %v2311_v58, %v5228_v57  ;;  %v4126_v29 = vpop.eup %4125 }
 0x1b7   : > { %v1548_v23 = vmul.f32 2.0, %v4122_v63  ;;  %v1804_v26 = vadd.f32 2.0, %v4122_v63  ;;  %4133 = vrcp.f32 %v2437_v56  ;;  %v2438_v12 = vadd.f32 %v2310_v1, %v5234_v0  ;;  %v4128_v33 = vpop.eup %4127 }
 0x1b8   : > { %v1549_v17 = vmul.f32 2.0, %v4124_v6  ;;  %v1805_v28 = vadd.f32 2.0, %v4124_v6  ;;  %v5245_v19 = vsel %vm1416_vm6, %v1672_v60, %v1928_v2  ;;  %v2312_v30 = vsel %vm1416_vm6, %v2184_v5, 2.0 }
 0x1b9   : > { %v5251_v31 = vsel %vm1417_vm7, %v1673_v8, %v1929_v9  ;;  %v2313_v32 = vsel %vm1417_vm7, %v2185_v10, 2.0  ;;  %v5257_v35 = vsel %vm1419_vm8, %v1675_v14, %v1931_v15  ;;  %v2315_v36 = vsel %vm1419_vm8, %v2187_v18, 2.0  ;;  %v4130_v14 = vpop.eup %4129 }
 0x1ba   : > { %v1674_v37 = vadd.f32 1.0, %v1546_v20  ;;  %v1930_v39 = vmul.f32 %v4120_v55, %v1802_v21  ;;  %v2186_v42 = vmul.f32 %v4120_v55, %v1546_v20  ;;  %v1676_v45 = vadd.f32 1.0, %v1548_v23 }
 0x1bb   : > { %v1932_v56 = vmul.f32 %v4122_v63, %v1804_v26  ;;  %v2188_v58 = vmul.f32 %v4122_v63, %v1548_v23  ;;  %v1677_v60 = vadd.f32 1.0, %v1549_v17  ;;  %v1933_v1 = vmul.f32 %v4124_v6, %v1805_v28 }
 0x1bc   : > { %v2189_v2 = vmul.f32 %v4124_v6, %v1549_v17  ;;  %v1551_v5 = vmul.f32 2.0, %v4126_v29  ;;  %4135 = vrcp.f32 %v2439_v22  ;;  %v1807_v8 = vadd.f32 2.0, %v4126_v29  ;;  %v758_v22 = vpop.f32.mrf.mxu1 }
 0x1bd   : > { %v1550_v9 = vmul.f32 2.0, %v4128_v33  ;;  %v1806_v10 = vadd.f32 2.0, %v4128_v33  ;;  %4137 = vrcp.f32 %v2438_v12  ;;  %v2440_v15 = vadd.f32 %v2312_v30, %v5245_v19 }
 0x1be   : > { %v2441_v55 = vadd.f32 %v2313_v32, %v5251_v31  ;;  %v2443_v63 = vadd.f32 %v2315_v36, %v5257_v35  ;;  %v5268_v6 = vsel %vm1418_vm9, %v1674_v37, %v1930_v39  ;;  %v2314_v18 = vsel %vm1418_vm9, %v2186_v42, 2.0  ;;  %v569_v37 = vpop.f32.mrf.mxu0 }
 0x1bf   : > { %v5274_v20 = vsel %vm1420_vm10, %v1676_v45, %v1932_v56  ;;  %v2316_v21 = vsel %vm1420_vm10, %v2188_v58, 2.0  ;;  %v5280_v23 = vsel %vm1421_vm11, %v1677_v60, %v1933_v1  ;;  %v2317_v26 = vsel %vm1421_vm11, %v2189_v2, 2.0  ;;  %v4132_v1 = vpop.eup %4131 }
 0x1c0   : > { %v1679_v12 = vadd.f32 1.0, %v1551_v5  ;;  %v2191_v17 = vmul.f32 %v4126_v29, %v1551_v5  ;;  %v1935_v28 = vmul.f32 %v4126_v29, %v1807_v8  ;;  %v1678_v30 = vadd.f32 1.0, %v1550_v9 }
 0x1c1   : > { %v1934_v32 = vmul.f32 %v4128_v33, %v1806_v10  ;;  %v1552_v36 = vmul.f32 2.0, %v4130_v14  ;;  %4139 = vrcp.f32 %v2440_v15  ;;  %v2190_v39 = vmul.f32 %v4128_v33, %v1550_v9 }
 0x1c2   : > { %v1808_v42 = vadd.f32 2.0, %v4130_v14  ;;  %v5285_v45 = vadd.f32 %v758_v22, %v5160_v52  ;;  %4141 = vrcp.f32 %v2441_v55  ;;  %v2442_v56 = vadd.f32 %v2314_v18, %v5268_v6 }
 0x1c3   : > { %v1185_v58 = vmul.f32 1.442695, %v5220_v49  ;;  %v914_v60 = vand.u32 2147483647, %v5223_v51  ;;  %4143 = vrcp.f32 %v2443_v63  ;;  %v2444_v29 = vadd.f32 %v2316_v21, %v5274_v20 }
 0x1c4   : > { %v2445_v2 = vadd.f32 %v2317_v26, %v5280_v23  ;;  %v5293_v5 = vadd.f32 %v569_v37, %v5140_v41  ;;  %v4134_v33 = vpop.eup %4133  ;;  %v5297_v8 = vsel %vm1423_vm12, %v1679_v12, %v1935_v28  ;;  %v2319_v9 = vsel %vm1423_vm12, %v2191_v17, 2.0  ;;  %v762_v12 = vpop.f32.mrf.mxu1 }
 0x1c5   : > { %v5303_v49 = vsel %vm1422_vm13, %v1678_v30, %v1934_v32  ;;  %v1680_v10 = vadd.f32 1.0, %v1552_v36  ;;  %v2318_v15 = vsel %vm1422_vm13, %v2190_v39, 2.0  ;;  %v1936_v55 = vmul.f32 %v4130_v14, %v1808_v42 }
 0x1c6   : > { %v2192_v63 = vmul.f32 %v4130_v14, %v1552_v36  ;;  %v916_v18 = vand.u32 2147483647, %v5285_v45  ;;  %4145 = vrcp.f32 %v2442_v56  ;;  %v1042_v21 = vsub.f32 0.0, %v914_v60  ;;  %v571_v60 = vpop.f32.mrf.mxu0 }
 0x1c7   : > { %4147 = vrcp.f32 %v2444_v29  ;;  %v2447_v22 = vadd.f32 %v2319_v9, %v5297_v8  ;;  %v917_v26 = vand.u32 2147483647, %v5293_v5  ;;  %v2446_v17 = vadd.f32 %v2318_v15, %v5303_v49 }
 0x1c8   : > { %4149 = vrcp.f32 %v2445_v2  ;;  %v1553_v28 = vmul.f32 2.0, %v4132_v1  ;;  %v1809_v30 = vadd.f32 2.0, %v4132_v1  ;;  %v5312_v37 = vsel %vm1424_vm14, %v1680_v10, %v1936_v55 }
 0x1c9   : > { %v4136_v32 = vpop.eup %4135  ;;  %v2320_v14 = vsel %vm1424_vm14, %v2192_v63, 2.0  ;;  %4151 = vpow2.f32 %v1185_v58  ;;  %v1044_v36 = vsub.f32 0.0, %v916_v18  ;;  %v1183_v42 = vmul.f32 1.442695, %v1042_v21  ;;  %v764_v63 = vpop.f32.mrf.mxu1 }
 0x1ca   : > { %v4138_v39 = vpop.eup %4137  ;;  %v5315_v56 = vadd.f32 %v762_v12, %v5145_v44  ;;  %4153 = vrcp.f32 %v2447_v22  ;;  %v1045_v29 = vsub.f32 0.0, %v917_v26  ;;  %v2448_v2 = vadd.f32 %v2320_v14, %v5312_v37 }
 0x1cb   : > { %4155 = vrcp.f32 %v2446_v17  ;;  %v1681_v9 = vadd.f32 1.0, %v1553_v28  ;;  %v1937_v15 = vmul.f32 %v4132_v1, %v1809_v30  ;;  %v2193_v40 = vmul.f32 %v4132_v1, %v1553_v28 }
 0x1cc   : > { %v1187_v38 = vmul.f32 1.442695, %v1044_v36  ;;  %v5319_v10 = vadd.f32 %v571_v60, %v5153_v48  ;;  %4157 = vpow2.f32 %v1183_v42  ;;  %v919_v55 = vand.u32 2147483647, %v5315_v56 }
 0x1cd   : > { %v2565_v21 = vmul.f32 %v5215_v24, %v5149_v47  ;;  %v2567_v22 = vmul.f32 %v5228_v57, %v5156_v50  ;;  %v1189_v26 = vmul.f32 1.442695, %v1045_v29  ;;  %v2566_v12 = vmul.f32 %v5234_v0, %v5164_v54 }
 0x1ce   : > { %v4140_v58 = vpop.eup %4139  ;;  %v2569_v17 = vmul.f32 %v5251_v31, %v5172_v61  ;;  %4159 = vrcp.f32 %v2448_v2  ;;  %v2065_v28 = vsel %vm1425_vm15, %v1681_v9, %v1937_v15  ;;  %v2321_v30 = vsel %vm1425_vm15, %v2193_v40, 2.0  ;;  %v573_v40 = vpop.f32.mrf.mxu0 }
 0x1cf   : > { %v4142_v18 = vpop.eup %4141  ;;  %4161 = vpow2.f32 %v1187_v38  ;;  %v918_v14 = vand.u32 2147483647, %v5319_v10  ;;  %v5333_v47 = vadd.f32 %v764_v63, %v5160_v52  ;;  %v2568_v50 = vmul.f32 %v5245_v19, %v5168_v59 }
 0x1d0   : > { %v4144_v1 = vpop.eup %4143  ;;  %v2571_v24 = vmul.f32 %v5257_v35, %v5175_v62  ;;  %v2570_v54 = vmul.f32 %v5268_v6, %v5181_v11  ;;  %v1047_v57 = vsub.f32 0.0, %v919_v55  ;;  %v2821_v0 = vmul.f32 %v4134_v33, %v2565_v21 }
 0x1d1   : > { %v5341_v31 = vmul.f32 %v4136_v32, %v2567_v22  ;;  %v2825_v38 = vmul.f32 %v4142_v18, %v2569_v17  ;;  %4163 = vpow2.f32 %v1189_v26  ;;  %v2572_v60 = vmul.f32 %v5274_v20, %v5184_v13  ;;  %v766_v32 = vpop.f32.mrf.mxu1 }
 0x1d2   : > { %v2827_v42 = vmul.f32 %v4144_v1, %v2571_v24  ;;  %v2573_v59 = vmul.f32 %v5280_v23, %v5187_v16  ;;  %v2449_v62 = vadd.f32 %v2321_v30, %v2065_v28  ;;  %v2822_v35 = vmul.f32 %v4138_v39, %v2566_v12 }
 0x1d3   : > { %v4146_v61 = vpop.eup %4145  ;;  %v5347_v11 = vmul.f32 %v4140_v58, %v2568_v50  ;;  %v1046_v6 = vsub.f32 0.0, %v918_v14  ;;  %v920_v33 = vand.u32 2147483647, %v5333_v47  ;;  %v2575_v2 = vmul.f32 %v5297_v8, %v5193_v25 }
 0x1d4   : > { %v4148_v36 = vpop.eup %4147  ;;  %v2574_v9 = vmul.f32 %v5303_v49, %v5196_v27  ;;  %v1193_v13 = vmul.f32 1.442695, %v1047_v57  ;;  %v5355_v20 = vadd.f32 %v573_v40, %v5140_v41  ;;  %v3134_v16 = vmax.f32 %v2821_v0, %v2825_v38 }
 0x1d5   : > { %v4150_v19 = vpop.eup %4149  ;;  %v2950_v23 = vadd.f32 %v2825_v38, %v2821_v0  ;;  %v2826_v39 = vmul.f32 %v4146_v61, %v2570_v54  ;;  %v2576_v15 = vmul.f32 %v5312_v37, %v5201_v34  ;;  %v3208_v55 = vmax.f32 %v5341_v31, %v2827_v42  ;;  %v575_v38 = vpop.f32.mrf.mxu0 }
 0x1d6   : > { %v4152_v29 = vpop.eup %4151  ;;  %v2828_v63 = vmul.f32 %v4148_v36, %v2572_v60  ;;  %4165 = vrcp.f32 %v2449_v62  ;;  %v5361_v25 = vadd.f32 %v766_v32, %v5145_v44  ;;  %v2829_v27 = vmul.f32 %v4150_v19, %v2573_v59  ;;  %v768_v60 = vpop.f32.mrf.mxu1 }
 0x1d7   : > { %v4154_v58 = vpop.eup %4153  ;;  %v1555_v49 = vmul.f32 2.0, %v4152_v29  ;;  %v1191_v18 = vmul.f32 1.442695, %v1046_v6  ;;  %v1048_v21 = vsub.f32 0.0, %v920_v33  ;;  %v3024_v22 = vadd.f32 %v2827_v42, %v5341_v31 }
 0x1d8   : > { %v4156_v8 = vpop.eup %4155  ;;  %v1811_v26 = vadd.f32 2.0, %v4152_v29  ;;  %4167 = vpow2.f32 %v1193_v13  ;;  %v921_v34 = vand.u32 2147483647, %v5355_v20  ;;  %v3171_v1 = vmax.f32 %v2822_v35, %v2826_v39 }
 0x1d9   : > { %v4158_v37 = vpop.eup %4157  ;;  %v2987_v12 = vadd.f32 %v2826_v39, %v2822_v35  ;;  %v2831_v17 = vmul.f32 %v4154_v58, %v2575_v2  ;;  %v2577_v30 = vmul.f32 %v2065_v28, %v5205_v53  ;;  %v3245_v14 = vmax.f32 %v5347_v11, %v2828_v63 }
 0x1da   : > { %v3061_v50 = vadd.f32 %v2828_v63, %v5347_v11  ;;  %v2830_v24 = vmul.f32 %v4156_v8, %v2574_v9  ;;  %v923_v54 = vand.u32 2147483647, %v5361_v25  ;;  %v5370_v61 = vmax.f32 %v3134_v16, %v2829_v27 }
 0x1db   : > { %v4160_v57 = vpop.eup %4159  ;;  %v1683_v0 = vadd.f32 1.0, %v1555_v49  ;;  %4169 = vpow2.f32 %v1191_v18  ;;  %v1195_v31 = vmul.f32 1.442695, %v1048_v21  ;;  %v1939_v36 = vmul.f32 %v4152_v29, %v1811_v26 }
 0x1dc   : > { %v4162_v40 = vpop.eup %4161  ;;  %v2195_v42 = vmul.f32 %v4152_v29, %v1555_v49  ;;  %v1554_v53 = vmul.f32 2.0, %v4158_v37  ;;  %v1049_v28 = vsub.f32 0.0, %v921_v34  ;;  %v5373_v59 = vadd.f32 %v2950_v23, %v2829_v27  ;;  %v579_v27 = vpop.f32.mrf.mxu0 }
 0x1dd   : > { %v5375_v62 = vmax.f32 %v3208_v55, %v2831_v17  ;;  %v5377_v19 = vadd.f32 %v3024_v22, %v2831_v17  ;;  %v1810_v35 = vadd.f32 2.0, %v4158_v37  ;;  %v5379_v6 = vmax.f32 %v3171_v1, %v2830_v24 }
 0x1de   : > { %v4164_v11 = vpop.eup %4163  ;;  %v2832_v33 = vmul.f32 %v4160_v57, %v2576_v15  ;;  %vm1428_vm3 = vcmp.ge.f32.partialorder %v5285_v45, 0.0  ;;  %v1051_v32 = vsub.f32 0.0, %v923_v54  ;;  %v5383_v2 = vadd.f32 %v575_v38, %v5153_v48 }
 0x1df   : > { %v1556_v29 = vmul.f32 2.0, %v4162_v40  ;;  %v1812_v9 = vadd.f32 2.0, %v4162_v40  ;;  %4171 = vpow2.f32 %v1195_v31  ;;  %v5386_v13 = vadd.f32 %v768_v60, %v5160_v52 }
 0x1e0   : > { %v2067_v16 = vsel %vm1427_vm1, %v1683_v0, %v1939_v36  ;;  %v2323_v23 = vsel %vm1427_vm1, %v2195_v42, 2.0  ;;  %v2194_v39 = vmul.f32 %v4158_v37, %v1554_v53  ;;  %vm1429_vm4 = vcmp.ge.f32.partialorder %v5293_v5, 0.0 }
 0x1e1   : > { %v1197_v15 = vmul.f32 1.442695, %v1049_v28  ;;  %v1682_v58 = vadd.f32 1.0, %v1554_v53  ;;  %v1938_v55 = vmul.f32 %v4158_v37, %v1810_v35  ;;  %v1557_v63 = vmul.f32 2.0, %v4164_v11  ;;  %v772_v28 = vpop.f32.mrf.mxu1 }
 0x1e2   : > { %v1813_v8 = vadd.f32 2.0, %v4164_v11  ;;  %v5393_v49 = vadd.f32 %v2987_v12, %v2830_v24  ;;  %v5395_v18 = vmax.f32 %v3245_v14, %v2832_v33  ;;  %v1201_v21 = vmul.f32 1.442695, %v1051_v32  ;;  %v581_v32 = vpop.f32.mrf.mxu0 }
 0x1e3   : > { %v922_v22 = vand.u32 2147483647, %v5383_v2  ;;  %v4166_v26 = vpop.eup %4165  ;;  %v2451_v34 = vadd.f32 %v2323_v23, %v2067_v16  ;;  %v1684_v1 = vadd.f32 1.0, %v1556_v29  ;;  %v1940_v17 = vmul.f32 %v4162_v40, %v1812_v9 }
 0x1e4   : > { %v924_v54 = vand.u32 2147483647, %v5386_v13  ;;  %v2322_v57 = vsel %vm1426_vm2, %v2194_v39, 2.0  ;;  %v2196_v37 = vmul.f32 %v4162_v40, %v1556_v29  ;;  %4173 = vpow2.f32 %v1197_v15 }
 0x1e5   : > { %v5402_v0 = vadd.f32 %v579_v27, %v5140_v41  ;;  %v4168_v12 = vpop.eup %4167  ;;  %v2066_v14 = vsel %vm1426_vm2, %v1682_v58, %v1938_v55  ;;  %v1685_v24 = vadd.f32 1.0, %v1557_v63  ;;  %v1941_v31 = vmul.f32 %v4164_v11, %v1813_v8 }
 0x1e6   : > { %v2197_v38 = vmul.f32 %v4164_v11, %v1557_v63  ;;  %v5406_v36 = vadd.f32 %v3061_v50, %v2832_v33  ;;  %v5408_v42 = vmul.f32 %v4166_v26, %v2577_v30  ;;  %4175 = vpow2.f32 %v1201_v21  ;;  %v774_v63 = vpop.f32.mrf.mxu1  ;;  %v583_v26 = vpop.f32.mrf.mxu0 }
 0x1e7   : > { %v1050_v53 = vsub.f32 0.0, %v922_v22  ;;  %v5411_v40 = vmul.f32 %v2067_v16, %v5209_v7  ;;  %4177 = vrcp.f32 %v2451_v34  ;;  %v2068_v60 = vsel %vm1428_vm3, %v1684_v1, %v1940_v17 }
 0x1e8   : > { %v1052_v35 = vsub.f32 0.0, %v924_v54  ;;  %v4170_v29 = vpop.eup %4169  ;;  %v2450_v9 = vadd.f32 %v2322_v57, %v2066_v14  ;;  %v2324_v50 = vsel %vm1428_vm3, %v2196_v37, 2.0  ;;  %v1559_v11 = vmul.f32 2.0, %v4168_v12 }
 0x1e9   : > { %v925_v30 = vand.u32 2147483647, %v5402_v0  ;;  %v2069_v33 = vsel %vm1429_vm4, %v1685_v24, %v1941_v31  ;;  %v2325_v7 = vsel %vm1429_vm4, %v2197_v38, 2.0  ;;  %vm1431_vm5 = vcmp.ge.f32.partialorder %v5315_v56, 0.0 }
 0x1ea   : > { %v1815_v16 = vadd.f32 2.0, %v4168_v12  ;;  %v5424_v23 = vadd.f32 %v772_v28, %v5145_v44  ;;  %v3136_v39 = vmax.f32 %v5370_v61, %v5408_v42  ;;  %v5430_v15 = vadd.f32 %v5373_v59, %v5408_v42 }
 0x1eb   : > { %vm1430_vm6 = vcmp.ge.f32.partialorder %v5319_v10, 0.0  ;;  %v1199_v58 = vmul.f32 1.442695, %v1050_v53  ;;  %v5434_v55 = vadd.f32 %v581_v32, %v5153_v48  ;;  %v5437_v8 = vmul.f32 %v2066_v14, %v5223_v51 }
 0x1ec   : > { %v1558_v27 = vmul.f32 2.0, %v4170_v29  ;;  %v1814_v21 = vadd.f32 2.0, %v4170_v29  ;;  %v1203_v22 = vmul.f32 1.442695, %v1052_v35  ;;  %v4172_v34 = vpop.eup %4171  ;;  %4179 = vrcp.f32 %v2450_v9 }
 0x1ed   : > { %v2452_v1 = vadd.f32 %v2324_v50, %v2068_v60  ;;  %v2453_v17 = vadd.f32 %v2325_v7, %v2069_v33  ;;  %v1053_v59 = vsub.f32 0.0, %v925_v30  ;;  %v1687_v54 = vadd.f32 1.0, %v1559_v11  ;;  %v776_v50 = vpop.f32.mrf.mxu1 }
 0x1ee   : > { %v1943_v57 = vmul.f32 %v4168_v12, %v1815_v16  ;;  %v927_v37 = vand.u32 2147483647, %v5424_v23  ;;  %v5441_v24 = vadd.f32 %v774_v63, %v5160_v52  ;;  %v2199_v31 = vmul.f32 %v4168_v12, %v1559_v11 }
 0x1ef   : > { %4181 = vpow2.f32 %v1199_v58  ;;  %v926_v51 = vand.u32 2147483647, %v5434_v55  ;;  %v5445_v14 = vadd.f32 %v583_v26, %v5140_v41  ;;  %v1686_v38 = vadd.f32 1.0, %v1558_v27 }
 0x1f0   : > { %v1942_v53 = vmul.f32 %v4170_v29, %v1814_v21  ;;  %vm1432_vm7 = vcmp.ge.f32.partialorder %v5333_v47, 0.0  ;;  %v1560_v28 = vmul.f32 2.0, %v4172_v34  ;;  %4183 = vpow2.f32 %v1203_v22 }
 0x1f1   : > { %v5449_v35 = vmul.f32 %v2068_v60, %v5285_v45  ;;  %4185 = vrcp.f32 %v2452_v1  ;;  %v1816_v32 = vadd.f32 2.0, %v4172_v34  ;;  %v1205_v9 = vmul.f32 1.442695, %v1053_v59  ;;  %v4174_v12 = vpop.eup %4173 }
 0x1f2   : > { %v5452_v11 = vmul.f32 %v2069_v33, %v5293_v5  ;;  %v2198_v30 = vmul.f32 %v4170_v29, %v1558_v27  ;;  %v1055_v7 = vsub.f32 0.0, %v927_v37  ;;  %v928_v16 = vand.u32 2147483647, %v5441_v24 }
 0x1f3   : > { %4187 = vrcp.f32 %v2453_v17  ;;  %v2071_v58 = vsel %vm1431_vm5, %v1687_v54, %v1943_v57  ;;  %v1054_v63 = vsub.f32 0.0, %v926_v51  ;;  %v929_v45 = vand.u32 2147483647, %v5445_v14  ;;  %v4176_v60 = vpop.eup %4175 }
 0x1f4   : > { %v2327_v21 = vsel %vm1431_vm5, %v2199_v31, 2.0  ;;  %v2070_v22 = vsel %vm1430_vm6, %v1686_v38, %v1942_v53  ;;  %v1688_v5 = vadd.f32 1.0, %v1560_v28  ;;  %v5463_v29 = vadd.f32 %v776_v50, %v5145_v44  ;;  %v4178_v33 = vpop.eup %4177 }
 0x1f5   : > { %v1944_v27 = vmul.f32 %v4172_v34, %v1816_v32  ;;  %v2200_v26 = vmul.f32 %v4172_v34, %v1560_v28  ;;  %vm1433_vm8 = vcmp.ge.f32.partialorder %v5355_v20, 0.0  ;;  %v1561_v1 = vmul.f32 2.0, %v4174_v12 }
 0x1f6   : > { %4189 = vpow2.f32 %v1205_v9  ;;  %v2326_v17 = vsel %vm1430_vm6, %v2198_v30, 2.0  ;;  %v1817_v59 = vadd.f32 2.0, %v4174_v12  ;;  %vm1435_vm9 = vcmp.ge.f32.partialorder %v5361_v25, 0.0 }
 0x1f7   : > { %v1209_v54 = vmul.f32 1.442695, %v1055_v7  ;;  %v1056_v57 = vsub.f32 0.0, %v928_v16  ;;  %v1563_v37 = vmul.f32 2.0, %v4176_v60  ;;  %v1819_v31 = vadd.f32 2.0, %v4176_v60 }
 0x1f8   : > { %v1207_v51 = vmul.f32 1.442695, %v1054_v63  ;;  %v1057_v38 = vsub.f32 0.0, %v929_v45  ;;  %v5470_v53 = vmul.f32 %v4178_v33, %v5411_v40  ;;  %v2455_v34 = vadd.f32 %v2327_v21, %v2071_v58  ;;  %v585_v33 = vpop.f32.mrf.mxu0 }
 0x1f9   : > { %v5473_v28 = vmul.f32 %v2071_v58, %v5315_v56  ;;  %v931_v32 = vand.u32 2147483647, %v5463_v29  ;;  %v2454_v9 = vadd.f32 %v2326_v17, %v2070_v22  ;;  %v2072_v50 = vsel %vm1432_vm7, %v1688_v5, %v1944_v27  ;;  %v4180_v16 = vpop.eup %4179 }
 0x1fa   : > { %v2328_v30 = vsel %vm1432_vm7, %v2200_v26, 2.0  ;;  %v1689_v7 = vadd.f32 1.0, %v1561_v1  ;;  %v1945_v63 = vmul.f32 %v4174_v12, %v1817_v59  ;;  %v2201_v45 = vmul.f32 %v4174_v12, %v1561_v1 }
 0x1fb   : > { %4191 = vpow2.f32 %v1209_v54  ;;  %v1211_v40 = vmul.f32 1.442695, %v1056_v57  ;;  %v1691_v21 = vadd.f32 1.0, %v1563_v37  ;;  %v1947_v46 = vmul.f32 %v4176_v60, %v1819_v31 }
 0x1fc   : > { %4193 = vpow2.f32 %v1207_v51  ;;  %v1213_v56 = vmul.f32 1.442695, %v1057_v38  ;;  %v4182_v58 = vpop.eup %4181  ;;  %v2203_v5 = vmul.f32 %v4176_v60, %v1563_v37  ;;  %v1059_v27 = vsub.f32 0.0, %v931_v32 }
 0x1fd   : > { %4195 = vrcp.f32 %v2455_v34  ;;  %v4184_v43 = vpop.eup %4183  ;;  %v5484_v26 = vadd.f32 %v5377_v19, %v5470_v53  ;;  %v2456_v12 = vadd.f32 %v2328_v30, %v2072_v50  ;;  %v5487_v1 = vadd.f32 %v585_v33, %v5153_v48 }
 0x1fe   : > { %4197 = vrcp.f32 %v2454_v9  ;;  %v4186_v59 = vpop.eup %4185  ;;  %v5490_v54 = vmul.f32 %v4180_v16, %v5437_v8  ;;  %v2073_v57 = vsel %vm1433_vm8, %v1689_v7, %v1945_v63  ;;  %v2329_v60 = vsel %vm1433_vm8, %v2201_v45, 2.0 }
 0x1ff   : > { %7677 = vst [vmem:[#allocation20_spill] sm:$0xff] %v5487_v1  ;;  %4199 = vpow2.f32 %v1211_v40  ;;  %v2075_v19 = vsel %vm1435_vm9, %v1691_v21, %v1947_v46  ;;  %vm1434_vm10 = vcmp.ge.f32.partialorder %v5383_v2, 0.0  ;;  %v1562_v37 = vmul.f32 2.0, %v4182_v58 }
 0x200   : > { %v1818_v31 = vadd.f32 2.0, %v4182_v58  ;;  %vm1436_vm11 = vcmp.ge.f32.partialorder %v5386_v13, 0.0  ;;  %4201 = vpow2.f32 %v1213_v56  ;;  %v4188_v51 = vpop.eup %4187  ;;  %v2331_v8 = vsel %vm1435_vm9, %v2203_v5, 2.0  ;;  %v778_v5 = vpop.f32.mrf.mxu1 }
 0x201   : > { %v1564_v38 = vmul.f32 2.0, %v4184_v43  ;;  %v1820_v34 = vadd.f32 2.0, %v4184_v43  ;;  %v1217_v32 = vmul.f32 1.442695, %v1059_v27  ;;  %v5503_v9 = vmul.f32 %v2070_v22, %v5319_v10 }
 0x202   : > { %v5506_v30 = vmul.f32 %v2072_v50, %v5333_v47  ;;  %4203 = vrcp.f32 %v2456_v12  ;;  %v930_v46 = vand.u32 2147483647, %v5487_v1  ;;  %v5512_v63 = vmul.f32 %v4186_v59, %v5449_v35 }
 0x203   : > { %v4190_v7 = vpop.eup %4189  ;;  %v2457_v45 = vadd.f32 %v2329_v60, %v2073_v57  ;;  %v5515_v40 = vmul.f32 %v2073_v57, %v5355_v20  ;;  %v2459_v33 = vadd.f32 %v2331_v8, %v2075_v19  ;;  %v1690_v10 = vadd.f32 1.0, %v1562_v37 }
 0x204   : > { %v1946_v22 = vmul.f32 %v4182_v58, %v1818_v31  ;;  %v2202_v21 = vmul.f32 %v4182_v58, %v1562_v37  ;;  %v1692_v47 = vadd.f32 1.0, %v1564_v38  ;;  %v1948_v50 = vmul.f32 %v4184_v43, %v1820_v34 }
 0x205   : > { %v2204_v56 = vmul.f32 %v4184_v43, %v1564_v38  ;;  %4205 = vpow2.f32 %v1217_v32  ;;  %v5519_v27 = vadd.f32 %v5393_v49, %v5490_v54  ;;  %v1565_v12 = vmul.f32 2.0, %v4190_v7 }
 0x206   : > { %v1821_v35 = vadd.f32 2.0, %v4190_v7  ;;  %v1058_v59 = vsub.f32 0.0, %v930_v46  ;;  %v2837_v57 = vmul.f32 %v4188_v51, %v5452_v11  ;;  %4207 = vrcp.f32 %v2457_v45 }
 0x207   : > { %v5525_v58 = vmul.f32 %v2075_v19, %v5361_v25  ;;  %v5529_v43 = vadd.f32 %v5406_v36, %v5512_v63  ;;  %4209 = vrcp.f32 %v2459_v33  ;;  %vm1437_vm12 = vcmp.ge.f32.partialorder %v5402_v0, 0.0 }
 0x208   : > { %v4192_v60 = vpop.eup %4191  ;;  %v5533_v49 = vadd.f32 %v778_v5, %v5160_v52  ;;  %v5537_v31 = vsel %vm1434_vm10, %v1690_v10, %v1946_v22  ;;  %v2330_v25 = vsel %vm1434_vm10, %v2202_v21, 2.0  ;;  %v5543_v11 = vsel %vm1436_vm11, %v1692_v47, %v1948_v50  ;;  %v589_v22 = vpop.f32.mrf.mxu0 }
 0x209   : > { %v4194_v37 = vpop.eup %4193  ;;  %v2332_v36 = vsel %vm1436_vm11, %v2204_v56, 2.0  ;;  %v1693_v51 = vadd.f32 1.0, %v1565_v12  ;;  %v1949_v8 = vmul.f32 %v4190_v7, %v1821_v35  ;;  %v2205_v38 = vmul.f32 %v4190_v7, %v1565_v12 }
 0x20a   : > { %7678 = vst [vmem:[#allocation21_spill] sm:$0xff] %v5533_v49  ;;  %v4196_v19 = vpop.eup %4195  ;;  %v1215_v34 = vmul.f32 1.442695, %v1058_v59  ;;  %v5552_v46 = vmax.f32 %v3136_v39, %v2837_v57  ;;  %v5555_v45 = vadd.f32 %v5430_v15, %v2837_v57  ;;  %v1567_v33 = vmul.f32 2.0, %v4192_v60 }
 0x20b   : > { %v5547_v32 = vpop.eup %4197  ;;  %v1823_v10 = vadd.f32 2.0, %v4192_v60  ;;  %vm1439_vm13 = vcmp.ge.f32.partialorder %v5424_v23, 0.0  ;;  %vm1438_vm14 = vcmp.ge.f32.partialorder %v5434_v55, 0.0  ;;  %v1566_v7 = vmul.f32 2.0, %v4194_v37 }
 0x20c   : > { %v4200_v21 = vpop.eup %4199  ;;  %v1822_v47 = vadd.f32 2.0, %v4194_v37  ;;  %v5560_v56 = vmul.f32 %v4196_v19, %v5473_v28  ;;  %v2458_v61 = vadd.f32 %v2330_v25, %v5537_v31  ;;  %v2460_v42 = vadd.f32 %v2332_v36, %v5543_v11  ;;  %v782_v36 = vpop.f32.mrf.mxu1 }
 0x20d   : > { %v4202_v50 = vpop.eup %4201  ;;  %v932_v39 = vand.u32 2147483647, %v5533_v49  ;;  %v5567_v15 = vsel %vm1437_vm12, %v1693_v51, %v1949_v8  ;;  %v2333_v5 = vsel %vm1437_vm12, %v2205_v38, 2.0  ;;  %vm1440_vm15 = vcmp.ge.f32.partialorder %v5441_v24, 0.0 }
 0x20e   : > { %7679 = vst [vmem:[#allocation22_spill] sm:$0xff] %v5567_v15  ;;  %4211 = vpow2.f32 %v1215_v34  ;;  %v5573_v12 = vadd.f32 %v589_v22, %v5140_v41  ;;  %v1695_v35 = vadd.f32 1.0, %v1567_v33  ;;  %v1951_v59 = vmul.f32 %v4192_v60, %v1823_v10  ;;  %v784_v49 = vpop.f32.mrf.mxu1 }
 0x20f   : > { %v5575_v28 = vpop.eup %4203  ;;  %v1568_v57 = vmul.f32 2.0, %v4200_v21  ;;  %v1824_v25 = vadd.f32 2.0, %v4200_v21  ;;  %v2207_v19 = vmul.f32 %v4192_v60, %v1567_v33  ;;  %v1694_v20 = vadd.f32 1.0, %v1566_v7 }
 0x210   : > { %7680 = vst [vmem:[#allocation23_spill] sm:$0xff] %v5573_v12  ;;  %v1950_v51 = vmul.f32 %v4194_v37, %v1822_v47  ;;  %v1569_v8 = vmul.f32 2.0, %v4202_v50  ;;  %4213 = vrcp.f32 %v2458_v61  ;;  %v2206_v16 = vmul.f32 %v4194_v37, %v1566_v7  ;;  %v591_v37 = vpop.f32.mrf.mxu0 }
 0x211   : > { %vm1441_vm1 = vcmp.ge.f32.partialorder %v5445_v14, 0.0  ;;  %v1825_v38 = vadd.f32 2.0, %v4202_v50  ;;  %4215 = vrcp.f32 %v2460_v42  ;;  %v2461_v22 = vadd.f32 %v2333_v5, %v5567_v15 }
 0x212   : > { %v4206_v34 = vpop.eup %4205  ;;  %v1060_v17 = vsub.f32 0.0, %v932_v39  ;;  %v5580_v3 = vadd.f32 %v782_v36, %v5145_v44  ;;  %v5584_v10 = vsel %vm1439_vm13, %v1695_v35, %v1951_v59  ;;  %v1696_v60 = vadd.f32 1.0, %v1568_v57 }
 0x213   : > { %v1952_v33 = vmul.f32 %v4200_v21, %v1824_v25  ;;  %v933_v47 = vand.u32 2147483647, %v5573_v12  ;;  %v4208_v7 = vpop.eup %4207  ;;  %v2335_v61 = vsel %vm1439_vm13, %v2207_v19, 2.0  ;;  %v5591_v42 = vsel %vm1438_vm14, %v1694_v20, %v1950_v51 }
 0x214   : > { %v2208_v39 = vmul.f32 %v4200_v21, %v1568_v57  ;;  %v1697_v5 = vadd.f32 1.0, %v1569_v8  ;;  %v4210_v36 = vpop.eup %4209  ;;  %v2334_v35 = vsel %vm1438_vm14, %v2206_v16, 2.0  ;;  %v1953_v59 = vmul.f32 %v4202_v50, %v1825_v38 }
 0x215   : > { %v1571_v4 = vmul.f32 2.0, %v4206_v34  ;;  %v1827_v25 = vadd.f32 2.0, %v4206_v34  ;;  %v2209_v12 = vmul.f32 %v4202_v50, %v1569_v8  ;;  %v1219_v1 = vmul.f32 1.442695, %v1060_v17 }
 0x216   : > { %v935_v15 = vand.u32 2147483647, %v5580_v3  ;;  %v5597_v19 = vadd.f32 %v591_v37, %v5153_v48  ;;  %v7681_v20 = vmax.f32 %v5375_v62, %v5470_v53  ;;  %4217 = vrcp.f32 %v2461_v22  ;;  %v593_v37 = vpop.f32.mrf.mxu0 }
 0x217   : > { %v2463_v16 = vadd.f32 %v2335_v61, %v5584_v10  ;;  %v5608_v57 = vsel %vm1440_vm15, %v1696_v60, %v1952_v33  ;;  %v2462_v17 = vadd.f32 %v2334_v35, %v5591_v42  ;;  %v2336_v50 = vsel %vm1440_vm15, %v2208_v39, 2.0 }
 0x218   : > { %v5603_v21 = vmax.f32 %v7681_v20, %v5560_v56  ;;  %v1061_v51 = vsub.f32 0.0, %v933_v47  ;;  %v5614_v8 = vadd.f32 %v784_v49, %v5160_v52  ;;  %v5618_v62 = vsel %vm1441_vm1, %v1697_v5, %v1953_v59 }
 0x219   : > { %v1699_v53 = vadd.f32 1.0, %v1571_v4  ;;  %v1955_v38 = vmul.f32 %v4206_v34, %v1827_v25  ;;  %v2211_v22 = vmul.f32 %v4206_v34, %v1571_v4  ;;  %v2337_v60 = vsel %vm1441_vm1, %v2209_v12, 2.0 }
 0x21a   : > { %4219 = vpow2.f32 %v1219_v1  ;;  %v1063_v33 = vsub.f32 0.0, %v935_v15  ;;  %v934_v61 = vand.u32 2147483647, %v5597_v19  ;;  %v3027_v49 = vadd.f32 %v5484_v26, %v5560_v56 }
 0x21b   : > { %v4212_v39 = vpop.eup %4211  ;;  %v2838_v47 = vmul.f32 %v5547_v32, %v5503_v9  ;;  %v2464_v5 = vadd.f32 %v2336_v50, %v5608_v57  ;;  %vm1443_vm2 = vcmp.ge.f32.partialorder %v5463_v29, 0.0  ;;  %4221 = vrcp.f32 %v2463_v16 }
 0x21c   : > { %v1221_v4 = vmul.f32 1.442695, %v1061_v51  ;;  %v936_v34 = vand.u32 2147483647, %v5614_v8  ;;  %v5631_v1 = vadd.f32 %v593_v37, %v5140_v41  ;;  %v2840_v15 = vmul.f32 %v5575_v28, %v5506_v30 }
 0x21d   : > { %v2465_v12 = vadd.f32 %v2337_v60, %v5618_v62  ;;  %v5636_v26 = vsel %vm1443_vm2, %v1699_v53, %v1955_v38  ;;  %v2339_v56 = vsel %vm1443_vm2, %v2211_v22, 2.0  ;;  %v4214_v9 = vpop.eup %4213  ;;  %v5639_v32 = vmul.f32 %v4208_v7, %v5515_v40  ;;  %v786_v40 = vpop.f32.mrf.mxu1 }
 0x21e   : > { %4223 = vrcp.f32 %v2462_v17  ;;  %v1225_v35 = vmul.f32 1.442695, %v1063_v33  ;;  %v1062_v59 = vsub.f32 0.0, %v934_v61  ;;  %v4216_v25 = vpop.eup %4215  ;;  %v7682_v20 = vmax.f32 %v5379_v6, %v5490_v54  ;;  %v595_v54 = vpop.f32.mrf.mxu0 }
 0x21f   : > { %4225 = vrcp.f32 %v2464_v5  ;;  %v1570_v30 = vmul.f32 2.0, %v4212_v39  ;;  %v1826_v28 = vadd.f32 2.0, %v4212_v39  ;;  %v2467_v50 = vadd.f32 %v2339_v56, %v5636_v26 }
 0x220   : > { %v5644_v16 = vmax.f32 %v7682_v20, %v2838_v47  ;;  %4227 = vpow2.f32 %v1221_v4  ;;  %v1064_v51 = vsub.f32 0.0, %v936_v34  ;;  %v937_v53 = vand.u32 2147483647, %v5631_v1  ;;  %v7684_v34 = vld [vmem:[#allocation22_spill] sm:$0xff] }
 0x221   : > { %v2990_v7 = vadd.f32 %v5519_v27, %v2838_v47  ;;  %v7683_v17 = vmax.f32 %v5395_v18, %v5512_v63  ;;  %v5655_v6 = vmul.f32 %v4210_v36, %v5525_v58  ;;  %4229 = vrcp.f32 %v2465_v12  ;;  %v7685_v12 = vld [vmem:[#allocation20_spill] sm:$0xff] }
 0x222   : > { %v3064_v22 = vadd.f32 %v5529_v43, %v2840_v15  ;;  %v3138_v37 = vmax.f32 %v5552_v46, %v5639_v32  ;;  %4231 = vpow2.f32 %v1225_v35  ;;  %v1223_v60 = vmul.f32 1.442695, %v1062_v59 }
 0x223   : > { %v5652_v38 = vmax.f32 %v7683_v17, %v2840_v15  ;;  %v1698_v33 = vadd.f32 1.0, %v1570_v30  ;;  %v1954_v61 = vmul.f32 %v4212_v39, %v1826_v28  ;;  %v2210_v27 = vmul.f32 %v4212_v39, %v1570_v30  ;;  %v4218_v18 = vpop.eup %4217 }
 0x224   : > { %v5661_v47 = vadd.f32 %v786_v40, %v5145_v44  ;;  %4233 = vrcp.f32 %v2467_v50  ;;  %v1227_v63 = vmul.f32 1.442695, %v1064_v51  ;;  %v1065_v58 = vsub.f32 0.0, %v937_v53  ;;  %v788_v50 = vpop.f32.mrf.mxu1 }
 0x225   : > { %v5664_v36 = vadd.f32 %v595_v54, %v5153_v48  ;;  %v2954_v43 = vadd.f32 %v5555_v45, %v5639_v32  ;;  %v3212_v46 = vmax.f32 %v5603_v21, %v5655_v6  ;;  %v3028_v5 = vadd.f32 %v3027_v49, %v5655_v6 }
 0x226   : > { %v2586_v39 = vmul.f32 %v5537_v31, %v5383_v2  ;;  %v2588_v4 = vmul.f32 %v5543_v11, %v5386_v13  ;;  %v2589_v15 = vmul.f32 %v7684_v34, %v5402_v0  ;;  %vm1442_vm3 = vcmp.ge.f32.partialorder %v7685_v12, 0.0  ;;  %v7686_v11 = vld [vmem:[#allocation21_spill] sm:$0xff] }
 0x227   : > { %4235 = vpow2.f32 %v1223_v60  ;;  %v4220_v56 = vpop.eup %4219  ;;  %v2082_v45 = vsel %vm1442_vm3, %v1698_v33, %v1954_v61  ;;  %v2338_v32 = vsel %vm1442_vm3, %v2210_v27, 2.0  ;;  %v939_v21 = vand.u32 2147483647, %v5661_v47  ;;  %v599_v61 = vpop.f32.mrf.mxu0 }
 0x228   : > { %v2842_v35 = vmul.f32 %v4214_v9, %v2586_v39  ;;  %v2844_v59 = vmul.f32 %v4216_v25, %v2588_v4  ;;  %4237 = vpow2.f32 %v1227_v63  ;;  %v1229_v49 = vmul.f32 1.442695, %v1065_v58  ;;  %v4222_v31 = vpop.eup %4221 }
 0x229   : > { %v938_v2 = vand.u32 2147483647, %v5664_v36  ;;  %v2845_v20 = vmul.f32 %v4218_v18, %v2589_v15  ;;  %v2591_v13 = vmul.f32 %v5584_v10, %v5424_v23  ;;  %v2590_v0 = vmul.f32 %v5591_v42, %v5434_v55 }
 0x22a   : > { %vm1444_vm4 = vcmp.ge.f32.partialorder %v7686_v11, 0.0  ;;  %v2592_v9 = vmul.f32 %v5608_v57, %v5441_v24  ;;  %v2466_v30 = vadd.f32 %v2338_v32, %v2082_v45  ;;  %v1572_v28 = vmul.f32 2.0, %v4220_v56 }
 0x22b   : > { %v1828_v25 = vadd.f32 2.0, %v4220_v56  ;;  %v4224_v51 = vpop.eup %4223  ;;  %v3175_v53 = vmax.f32 %v5644_v16, %v2842_v35  ;;  %v2991_v40 = vadd.f32 %v2990_v7, %v2842_v35  ;;  %v2593_v17 = vmul.f32 %v5618_v62, %v5445_v14 }
 0x22c   : > { %v1067_v23 = vsub.f32 0.0, %v939_v21  ;;  %v4226_v10 = vpop.eup %4225  ;;  %v3249_v55 = vmax.f32 %v5652_v38, %v2844_v59  ;;  %v2847_v42 = vmul.f32 %v4222_v31, %v2591_v13  ;;  %4239 = vpow2.f32 %v1229_v49 }
 0x22d   : > { %v1066_v6 = vsub.f32 0.0, %v938_v2  ;;  %v4228_v54 = vpop.eup %4227  ;;  %v3065_v24 = vadd.f32 %v3064_v22, %v2844_v59  ;;  %v5691_v57 = vmax.f32 %v3138_v37, %v2845_v20  ;;  %v2595_v60 = vmul.f32 %v5636_v26, %v5463_v29  ;;  %v7687_v29 = vld [vmem:[#allocation23_spill] sm:$0xff] }
 0x22e   : > { %v5696_v16 = vadd.f32 %v788_v50, %v5160_v52  ;;  %v4230_v7 = vpop.eup %4229  ;;  %4241 = vrcp.f32 %v2466_v30  ;;  %v1700_v14 = vadd.f32 1.0, %v1572_v28  ;;  %v1956_v62 = vmul.f32 %v4220_v56, %v1828_v25 }
 0x22f   : > { %v2212_v33 = vmul.f32 %v4220_v56, %v1572_v28  ;;  %v4232_v38 = vpop.eup %4231  ;;  %v2955_v27 = vadd.f32 %v2954_v43, %v2845_v20  ;;  %v2846_v18 = vmul.f32 %v4224_v51, %v2590_v0  ;;  %v5699_v63 = vmul.f32 %v2082_v45, %v7685_v12  ;;  %v792_v20 = vpop.f32.mrf.mxu1 }
 0x230   : > { %v1233_v22 = vmul.f32 1.442695, %v1067_v23  ;;  %v5701_v37 = vmax.f32 %v3212_v46, %v2847_v42  ;;  %v2848_v58 = vmul.f32 %v4226_v10, %v2592_v9  ;;  %vm1445_vm5 = vcmp.ge.f32.partialorder %v7687_v29, 0.0 }
 0x231   : > { %v1573_v26 = vmul.f32 2.0, %v4228_v54  ;;  %v1231_v39 = vmul.f32 1.442695, %v1066_v6  ;;  %v4234_v4 = vpop.eup %4233  ;;  %v5704_v34 = vadd.f32 %v3028_v5, %v2847_v42  ;;  %v1829_v15 = vadd.f32 2.0, %v4228_v54 }
 0x232   : > { %vm1447_vm6 = vcmp.ge.f32.partialorder %v5580_v3, 0.0  ;;  %v940_v43 = vand.u32 2147483647, %v5696_v16  ;;  %v5709_v56 = vadd.f32 %v599_v61, %v5140_v41  ;;  %v5713_v46 = vsel %vm1444_vm4, %v1700_v14, %v1956_v62 }
 0x233   : > { %v2340_v12 = vsel %vm1444_vm4, %v2212_v33, 2.0  ;;  %v1575_v35 = vmul.f32 2.0, %v4232_v38  ;;  %v1831_v45 = vadd.f32 2.0, %v4232_v38  ;;  %v5717_v5 = vmax.f32 %v3175_v53, %v2846_v18  ;;  %v794_v33 = vpop.f32.mrf.mxu1 }
 0x234   : > { %v4236_v32 = vpop.eup %4235  ;;  %v5719_v21 = vadd.f32 %v2991_v40, %v2846_v18  ;;  %v5721_v59 = vmul.f32 %v4230_v7, %v2593_v17  ;;  %4243 = vpow2.f32 %v1233_v22  ;;  %v5723_v49 = vmax.f32 %v3249_v55, %v2848_v58 }
 0x235   : > { %v5725_v2 = vmul.f32 %v4234_v4, %v2595_v60  ;;  %v1701_v31 = vadd.f32 1.0, %v1573_v26  ;;  %4245 = vpow2.f32 %v1231_v39  ;;  %v4238_v13 = vpop.eup %4237  ;;  %v2468_v0 = vadd.f32 %v2340_v12, %v5713_v46  ;;  %v601_v60 = vpop.f32.mrf.mxu0 }
 0x236   : > { %v1957_v9 = vmul.f32 %v4228_v54, %v1829_v15  ;;  %v2213_v30 = vmul.f32 %v4228_v54, %v1573_v26  ;;  %v1068_v28 = vsub.f32 0.0, %v940_v43  ;;  %v1703_v25 = vadd.f32 1.0, %v1575_v35 }
 0x237   : > { %v1959_v50 = vmul.f32 %v4232_v38, %v1831_v45  ;;  %vm1446_vm7 = vcmp.ge.f32.partialorder %v5597_v19, 0.0  ;;  %v1574_v51 = vmul.f32 2.0, %v4236_v32  ;;  %v941_v53 = vand.u32 2147483647, %v5709_v56 }
 0x238   : > { %v5730_v40 = vadd.f32 %v3065_v24, %v2848_v58  ;;  %v1830_v23 = vadd.f32 2.0, %v4236_v32  ;;  %vm1448_vm8 = vcmp.ge.f32.partialorder %v5614_v8, 0.0  ;;  %v5736_v10 = vadd.f32 %v792_v20, %v5145_v44 }
 0x239   : > { %v5739_v55 = vadd.f32 %v2955_v27, %v5721_v59  ;;  %v1576_v6 = vmul.f32 2.0, %v4238_v13  ;;  %v1832_v54 = vadd.f32 2.0, %v4238_v13  ;;  %v4240_v24 = vpop.eup %4239  ;;  %4247 = vrcp.f32 %v2468_v0 }
 0x23a   : > { %v2341_v7 = vsel %vm1445_vm5, %v2213_v30, 2.0  ;;  %v2215_v14 = vmul.f32 %v4232_v38, %v1575_v35  ;;  %v1235_v62 = vmul.f32 1.442695, %v1068_v28  ;;  %v5747_v61 = vsel %vm1445_vm5, %v1701_v31, %v1957_v9  ;;  %v603_v28 = vpop.f32.mrf.mxu0 }
 0x23b   : > { %v5751_v27 = vsel %vm1447_vm6, %v1703_v25, %v1959_v50  ;;  %v1702_v18 = vadd.f32 1.0, %v1574_v51  ;;  %v1069_v22 = vsub.f32 0.0, %v941_v53  ;;  %v4242_v58 = vpop.eup %4241  ;;  %v1958_v26 = vmul.f32 %v4236_v32, %v1830_v23 }
 0x23c   : > { %v2214_v39 = vmul.f32 %v4236_v32, %v1574_v51  ;;  %v943_v4 = vand.u32 2147483647, %v5736_v10  ;;  %v5755_v15 = vadd.f32 %v601_v60, %v5153_v48  ;;  %v1704_v38 = vadd.f32 1.0, %v1576_v6 }
 0x23d   : > { %v1960_v43 = vmul.f32 %v4238_v13, %v1832_v54  ;;  %vm1449_vm9 = vcmp.ge.f32.partialorder %v5631_v1, 0.0  ;;  %v1577_v12 = vmul.f32 2.0, %v4240_v24  ;;  %v5759_v35 = vadd.f32 %v794_v33, %v5160_v52  ;;  %v796_v54 = vpop.f32.mrf.mxu1 }
 0x23e   : > { %v2343_v45 = vsel %vm1447_vm6, %v2215_v14, 2.0  ;;  %v2216_v31 = vmul.f32 %v4238_v13, %v1576_v6  ;;  %v1833_v20 = vadd.f32 2.0, %v4240_v24  ;;  %4249 = vpow2.f32 %v1235_v62 }
 0x23f   : > { %v5765_v32 = vadd.f32 %v5704_v34, %v5725_v2  ;;  %v5768_v0 = vmul.f32 %v4242_v58, %v5699_v63  ;;  %v2469_v9 = vadd.f32 %v2341_v7, %v5747_v61  ;;  %v1237_v30 = vmul.f32 1.442695, %v1069_v22 }
 0x240   : > { %v5773_v25 = vsel %vm1446_vm7, %v1702_v18, %v1958_v26  ;;  %v2342_v13 = vsel %vm1446_vm7, %v2214_v39, 2.0  ;;  %v1071_v50 = vsub.f32 0.0, %v943_v4  ;;  %v942_v51 = vand.u32 2147483647, %v5755_v15 }
 0x241   : > { %v4244_v53 = vpop.eup %4243  ;;  %v2471_v34 = vadd.f32 %v2343_v45, %v5751_v27  ;;  %v5781_v63 = vsel %vm1448_vm8, %v1704_v38, %v1960_v43  ;;  %v1705_v23 = vadd.f32 1.0, %v1577_v12  ;;  %v944_v6 = vand.u32 2147483647, %v5759_v35  ;;  %v605_v38 = vpop.f32.mrf.mxu0 }
 0x242   : > { %v4246_v60 = vpop.eup %4245  ;;  %v2344_v7 = vsel %vm1448_vm8, %v2216_v31, 2.0  ;;  %v1961_v14 = vmul.f32 %v4240_v24, %v1833_v20  ;;  %v2217_v62 = vmul.f32 %v4240_v24, %v1577_v12  ;;  %v5787_v33 = vadd.f32 %v603_v28, %v5140_v41  ;;  %v798_v20 = vpop.f32.mrf.mxu1 }
 0x243   : > { %v2596_v22 = vmul.f32 %v5713_v46, %v7686_v11  ;;  %v2470_v58 = vadd.f32 %v2342_v13, %v5773_v25  ;;  %4251 = vpow2.f32 %v1237_v30  ;;  %v1241_v26 = vmul.f32 1.442695, %v1071_v50 }
 0x244   : > { %4253 = vrcp.f32 %v2469_v9  ;;  %v1070_v39 = vsub.f32 0.0, %v942_v51  ;;  %v5795_v4 = vadd.f32 %v796_v54, %v5145_v44  ;;  %v2472_v24 = vadd.f32 %v2344_v7, %v5781_v63 }
 0x245   : > { %4255 = vrcp.f32 %v2471_v34  ;;  %vm1451_vm10 = vcmp.ge.f32.partialorder %v5661_v47, 0.0  ;;  %v1579_v43 = vmul.f32 2.0, %v4244_v53  ;;  %v1072_v12 = vsub.f32 0.0, %v944_v6 }
 0x246   : > { %v2089_v11 = vsel %vm1449_vm9, %v1705_v23, %v1961_v14  ;;  %v2345_v46 = vsel %vm1449_vm9, %v2217_v62, 2.0  ;;  %v1835_v45 = vadd.f32 2.0, %v4244_v53  ;;  %vm1450_vm11 = vcmp.ge.f32.partialorder %v5664_v36, 0.0  ;;  %v4248_v9 = vpop.eup %4247 }
 0x247   : > { %v945_v31 = vand.u32 2147483647, %v5787_v33  ;;  %4257 = vrcp.f32 %v2470_v58  ;;  %v1578_v30 = vmul.f32 2.0, %v4246_v60  ;;  %v1834_v28 = vadd.f32 2.0, %v4246_v60 }
 0x248   : > { %v5806_v13 = vadd.f32 %v605_v38, %v5153_v48  ;;  %v5810_v50 = vadd.f32 %v5719_v21, %v5768_v0  ;;  %4259 = vpow2.f32 %v1241_v26  ;;  %v1239_v51 = vmul.f32 1.442695, %v1070_v39  ;;  %v609_v38 = vpop.f32.mrf.mxu0 }
 0x249   : > { %v947_v34 = vand.u32 2147483647, %v5795_v4  ;;  %4261 = vrcp.f32 %v2472_v24  ;;  %v2473_v23 = vadd.f32 %v2345_v46, %v2089_v11  ;;  %v1243_v6 = vmul.f32 1.442695, %v1072_v12 }
 0x24a   : > { %v5814_v54 = vadd.f32 %v798_v20, %v5160_v52  ;;  %v1707_v7 = vadd.f32 1.0, %v1579_v43  ;;  %v1963_v14 = vmul.f32 %v4244_v53, %v1835_v45  ;;  %v2219_v62 = vmul.f32 %v4244_v53, %v1579_v43 }
 0x24b   : > { %v1073_v58 = vsub.f32 0.0, %v945_v31  ;;  %v4250_v18 = vpop.eup %4249  ;;  %v1706_v42 = vadd.f32 1.0, %v1578_v30  ;;  %v1962_v17 = vmul.f32 %v4246_v60, %v1834_v28  ;;  %v2218_v21 = vmul.f32 %v4246_v60, %v1578_v30 }
 0x24c   : > { %v946_v26 = vand.u32 2147483647, %v5806_v13  ;;  %v2597_v39 = vmul.f32 %v5747_v61, %v7687_v29  ;;  %v2599_v24 = vmul.f32 %v5751_v27, %v5580_v3  ;;  %4263 = vpow2.f32 %v1239_v51 }
 0x24d   : > { %v1075_v12 = vsub.f32 0.0, %v947_v34  ;;  %v5821_v46 = vmul.f32 %v4248_v9, %v2596_v22  ;;  %vm1452_vm12 = vcmp.ge.f32.partialorder %v5696_v16, 0.0  ;;  %4265 = vpow2.f32 %v1243_v6 }
 0x24e   : > { %v948_v53 = vand.u32 2147483647, %v5814_v54  ;;  %v5826_v43 = vadd.f32 %v609_v38, %v5140_v41  ;;  %v2091_v60 = vsel %vm1451_vm10, %v1707_v7, %v1963_v14  ;;  %v2347_v29 = vsel %vm1451_vm10, %v2219_v62, 2.0 }
 0x24f   : > { %v1580_v61 = vmul.f32 2.0, %v4250_v18  ;;  %v1245_v3 = vmul.f32 1.442695, %v1073_v58  ;;  %4267 = vrcp.f32 %v2473_v23  ;;  %v2090_v27 = vsel %vm1450_vm11, %v1706_v42, %v1962_v17 }
 0x250   : > { %v2346_v22 = vsel %vm1450_vm11, %v2218_v21, 2.0  ;;  %v1074_v45 = vsub.f32 0.0, %v946_v26  ;;  %v4252_v31 = vpop.eup %4251  ;;  %v2598_v20 = vmul.f32 %v5773_v25, %v5597_v19  ;;  %v2600_v9 = vmul.f32 %v5781_v63, %v5614_v8 }
 0x251   : > { %v1836_v30 = vadd.f32 2.0, %v4250_v18  ;;  %v1249_v28 = vmul.f32 1.442695, %v1075_v12  ;;  %v4254_v51 = vpop.eup %4253  ;;  %v5841_v34 = vmul.f32 %v2089_v11, %v5631_v1  ;;  %v2475_v23 = vadd.f32 %v2347_v29, %v2091_v60  ;;  %v802_v29 = vpop.f32.mrf.mxu1 }
 0x252   : > { %v1076_v6 = vsub.f32 0.0, %v948_v53  ;;  %v949_v17 = vand.u32 2147483647, %v5826_v43  ;;  %v4256_v42 = vpop.eup %4255  ;;  %v3251_v7 = vmax.f32 %v5723_v49, %v5821_v46  ;;  %v2474_v14 = vadd.f32 %v2346_v22, %v2090_v27 }
 0x253   : > { %v2220_v62 = vmul.f32 %v4250_v18, %v1580_v61  ;;  %vm1453_vm13 = vcmp.ge.f32.partialorder %v5709_v56, 0.0  ;;  %4269 = vpow2.f32 %v1245_v3  ;;  %v5849_v19 = vadd.f32 %v5730_v40, %v5821_v46 }
 0x254   : > { %v1581_v8 = vmul.f32 2.0, %v4252_v31  ;;  %v1837_v1 = vadd.f32 2.0, %v4252_v31  ;;  %v1247_v25 = vmul.f32 1.442695, %v1074_v45  ;;  %v4258_v63 = vpop.eup %4257  ;;  %v5852_v11 = vmul.f32 %v2091_v60, %v5661_v47 }
 0x255   : > { %v1708_v58 = vadd.f32 1.0, %v1580_v61  ;;  %v1964_v38 = vmul.f32 %v4250_v18, %v1836_v30  ;;  %4271 = vpow2.f32 %v1249_v28  ;;  %v4260_v21 = vpop.eup %4259  ;;  %v2853_v26 = vmul.f32 %v4254_v51, %v2597_v39 }
 0x256   : > { %4273 = vrcp.f32 %v2475_v23  ;;  %v1251_v12 = vmul.f32 1.442695, %v1076_v6  ;;  %v1077_v53 = vsub.f32 0.0, %v949_v17  ;;  %v4262_v3 = vpop.eup %4261  ;;  %v2855_v22 = vmul.f32 %v4256_v42, %v2599_v24 }
 0x257   : > { %v5855_v40 = vmul.f32 %v2090_v27, %v5664_v36  ;;  %4275 = vrcp.f32 %v2474_v14  ;;  %v2348_v45 = vsel %vm1452_vm12, %v2220_v62, 2.0  ;;  %v1709_v47 = vadd.f32 1.0, %v1581_v8 }
 0x258   : > { %v1965_v60 = vmul.f32 %v4252_v31, %v1837_v1  ;;  %v2221_v61 = vmul.f32 %v4252_v31, %v1581_v8  ;;  %4277 = vpow2.f32 %v1247_v25  ;;  %v2092_v18 = vsel %vm1452_vm12, %v1708_v58, %v1964_v38 }
 0x259   : > { %v1583_v39 = vmul.f32 2.0, %v4260_v21  ;;  %v1839_v30 = vadd.f32 2.0, %v4260_v21  ;;  %v5862_v28 = vadd.f32 %v802_v29, %v5145_v44  ;;  %v4264_v24 = vpop.eup %4263  ;;  %v7688_v36 = vmax.f32 %v5691_v57, %v5721_v59 }
 0x25a   : > { %v5870_v51 = vadd.f32 %v5739_v55, %v2853_v26  ;;  %4279 = vpow2.f32 %v1251_v12  ;;  %v1253_v31 = vmul.f32 1.442695, %v1077_v53  ;;  %v4266_v23 = vpop.eup %4265  ;;  %v7689_v6 = vmax.f32 %v5701_v37, %v5725_v2 }
 0x25b   : > { %v5867_v27 = vmax.f32 %v7688_v36, %v2853_v26  ;;  %v5878_v42 = vadd.f32 %v5765_v32, %v2855_v22  ;;  %v2854_v14 = vmul.f32 %v4258_v63, %v2598_v20  ;;  %vm1455_vm14 = vcmp.ge.f32.partialorder %v5736_v10, 0.0 }
 0x25c   : > { %v5875_v17 = vmax.f32 %v7689_v6, %v2855_v22  ;;  %v2856_v57 = vmul.f32 %v4262_v3, %v2600_v9  ;;  %v2476_v59 = vadd.f32 %v2348_v45, %v2092_v18  ;;  %v5883_v55 = vsel %vm1453_vm13, %v1709_v47, %v1965_v60  ;;  %v4268_v8 = vpop.eup %4267 }
 0x25d   : > { %v2349_v62 = vsel %vm1453_vm13, %v2221_v61, 2.0  ;;  %v1711_v1 = vadd.f32 1.0, %v1583_v39  ;;  %v1967_v37 = vmul.f32 %v4260_v21, %v1839_v30  ;;  %vm1454_vm15 = vcmp.ge.f32.partialorder %v5755_v15, 0.0 }
 0x25e   : > { %v1582_v2 = vmul.f32 2.0, %v4264_v24  ;;  %v951_v32 = vand.u32 2147483647, %v5862_v28  ;;  %v1838_v20 = vadd.f32 2.0, %v4264_v24  ;;  %v1584_v25 = vmul.f32 2.0, %v4266_v23 }
 0x25f   : > { %v1840_v63 = vadd.f32 2.0, %v4266_v23  ;;  %4281 = vpow2.f32 %v1253_v31  ;;  %v7690_v9 = vmax.f32 %v5717_v5, %v5768_v0  ;;  %v5895_v38 = vmul.f32 %v2092_v18, %v5696_v16 }
 0x260   : > { %v2223_v26 = vmul.f32 %v4260_v21, %v1583_v39  ;;  %vm1456_vm1 = vcmp.ge.f32.partialorder %v5759_v35, 0.0  ;;  %v4270_v12 = vpop.eup %4269  ;;  %v5899_v53 = vadd.f32 %v5810_v50, %v2854_v14  ;;  %v5904_v29 = vmax.f32 %v3251_v7, %v2856_v57 }
 0x261   : > { %v5892_v58 = vmax.f32 %v7690_v9, %v2854_v14  ;;  %v5907_v3 = vmul.f32 %v4268_v8, %v5841_v34  ;;  %4283 = vrcp.f32 %v2476_v59  ;;  %v2477_v5 = vadd.f32 %v2349_v62, %v5883_v55  ;;  %v804_v14 = vpop.f32.mrf.mxu1 }
 0x262   : > { %v5912_v16 = vsel %vm1455_vm14, %v1711_v1, %v1967_v37  ;;  %v1710_v0 = vadd.f32 1.0, %v1582_v2  ;;  %v1079_v21 = vsub.f32 0.0, %v951_v32  ;;  %v4272_v22 = vpop.eup %4271  ;;  %v1966_v50 = vmul.f32 %v4264_v24, %v1838_v20 }
 0x263   : > { %v2222_v45 = vmul.f32 %v4264_v24, %v1582_v2  ;;  %v1712_v47 = vadd.f32 1.0, %v1584_v25  ;;  %v1968_v60 = vmul.f32 %v4266_v23, %v1840_v63  ;;  %v4274_v49 = vpop.eup %4273  ;;  %v2351_v46 = vsel %vm1455_vm14, %v2223_v26, 2.0  ;;  %v611_v24 = vpop.f32.mrf.mxu0 }
 0x264   : > { %v2224_v34 = vmul.f32 %v4266_v23, %v1584_v25  ;;  %v1585_v7 = vmul.f32 2.0, %v4270_v12  ;;  %v1841_v61 = vadd.f32 2.0, %v4270_v12  ;;  %v5916_v18 = vpop.eup %4275  ;;  %v5919_v39 = vadd.f32 %v5849_v19, %v2856_v57 }
 0x265   : > { %vm1457_vm2 = vcmp.ge.f32.partialorder %v5787_v33, 0.0  ;;  %vm1459_vm3 = vcmp.ge.f32.partialorder %v5795_v4, 0.0  ;;  %v4278_v36 = vpop.eup %4277  ;;  %4285 = vrcp.f32 %v2477_v5  ;;  %v1587_v31 = vmul.f32 2.0, %v4272_v22 }
 0x266   : > { %v1843_v6 = vadd.f32 2.0, %v4272_v22  ;;  %v1257_v23 = vmul.f32 1.442695, %v1079_v21  ;;  %v2479_v59 = vadd.f32 %v2351_v46, %v5912_v16  ;;  %v5928_v19 = vsel %vm1454_vm15, %v1710_v0, %v1966_v50  ;;  %v613_v21 = vpop.f32.mrf.mxu0 }
 0x267   : > { %v2350_v57 = vsel %vm1454_vm15, %v2222_v45, 2.0  ;;  %v5934_v62 = vsel %vm1456_vm1, %v1712_v47, %v1968_v60  ;;  %v4280_v8 = vpop.eup %4279  ;;  %v2352_v1 = vsel %vm1456_vm1, %v2224_v34, 2.0  ;;  %v1713_v37 = vadd.f32 1.0, %v1585_v7 }
 0x268   : > { %v1969_v2 = vmul.f32 %v4270_v12, %v1841_v61  ;;  %v5939_v32 = vadd.f32 %v611_v24, %v5153_v48  ;;  %v2225_v20 = vmul.f32 %v4270_v12, %v1585_v7  ;;  %v1586_v25 = vmul.f32 2.0, %v4278_v36 }
 0x269   : > { %v1842_v63 = vadd.f32 2.0, %v4278_v36  ;;  %v5942_v9 = vadd.f32 %v804_v14, %v5160_v52  ;;  %v1715_v26 = vadd.f32 1.0, %v1587_v31  ;;  %v1971_v5 = vmul.f32 %v4272_v22, %v1843_v6 }
 0x26a   : > { %7691 = vst [vmem:[#allocation22_spill] sm:$0xff] %v5939_v32  ;;  %v2227_v0 = vmul.f32 %v4272_v22, %v1587_v31  ;;  %4287 = vpow2.f32 %v1257_v23  ;;  %vm1458_vm4 = vcmp.ge.f32.partialorder %v5806_v13, 0.0  ;;  %v1588_v50 = vmul.f32 2.0, %v4280_v8 }
 0x26b   : > { %7692 = vst [vmem:[#allocation20_spill] sm:$0xff] %v5942_v9  ;;  %4289 = vrcp.f32 %v2479_v59  ;;  %v1844_v45 = vadd.f32 2.0, %v4280_v8  ;;  %v2478_v60 = vadd.f32 %v2350_v57, %v5928_v19  ;;  %v2480_v12 = vadd.f32 %v2352_v1, %v5934_v62  ;;  %v806_v57 = vpop.f32.mrf.mxu1 }
 0x26c   : > { %v4282_v47 = vpop.eup %4281  ;;  %v5949_v46 = vsel %vm1457_vm2, %v1713_v37, %v1969_v2  ;;  %v950_v34 = vand.u32 2147483647, %v5939_v32  ;;  %v2353_v22 = vsel %vm1457_vm2, %v2225_v20, 2.0  ;;  %v1714_v7 = vadd.f32 1.0, %v1586_v25 }
 0x26d   : > { %v952_v61 = vand.u32 2147483647, %v5942_v9  ;;  %v5956_v24 = vadd.f32 %v613_v21, %v5140_v41  ;;  %v5960_v6 = vsel %vm1459_vm3, %v1715_v26, %v1971_v5  ;;  %v2355_v23 = vsel %vm1459_vm3, %v2227_v0, 2.0 }
 0x26e   : > { %v4284_v31 = vpop.eup %4283  ;;  %v1970_v14 = vmul.f32 %v4278_v36, %v1842_v63  ;;  %v2226_v59 = vmul.f32 %v4278_v36, %v1586_v25  ;;  %v1716_v1 = vadd.f32 1.0, %v1588_v50  ;;  %v1972_v37 = vmul.f32 %v4280_v8, %v1844_v45  ;;  %v615_v36 = vpop.f32.mrf.mxu0 }
 0x26f   : > { %v2228_v2 = vmul.f32 %v4280_v8, %v1588_v50  ;;  %v1589_v20 = vmul.f32 2.0, %v4282_v47  ;;  %v5965_v30 = vmul.f32 %v4274_v49, %v5852_v11  ;;  %4291 = vrcp.f32 %v2478_v60 }
 0x270   : > { %v1845_v21 = vadd.f32 2.0, %v4282_v47  ;;  %v1078_v9 = vsub.f32 0.0, %v950_v34  ;;  %v2481_v32 = vadd.f32 %v2353_v22, %v5949_v46  ;;  %v1080_v26 = vsub.f32 0.0, %v952_v61 }
 0x271   : > { %v953_v5 = vand.u32 2147483647, %v5956_v24  ;;  %v5970_v0 = vadd.f32 %v806_v57, %v5145_v44  ;;  %4293 = vrcp.f32 %v2480_v12  ;;  %v2483_v25 = vadd.f32 %v2355_v23, %v5960_v6 }
 0x272   : > { %v5975_v8 = vsel %vm1458_vm4, %v1714_v7, %v1970_v14  ;;  %vm1460_vm5 = vcmp.ge.f32.partialorder %v5814_v54, 0.0  ;;  %v4286_v11 = vpop.eup %4285  ;;  %v2354_v49 = vsel %vm1458_vm4, %v2226_v59, 2.0  ;;  %v1717_v45 = vadd.f32 1.0, %v1589_v20 }
 0x273   : > { %v5980_v63 = vsel %vm1460_vm5, %v1716_v1, %v1972_v37  ;;  %v2356_v50 = vsel %vm1460_vm5, %v2228_v2, 2.0  ;;  %v1973_v60 = vmul.f32 %v4282_v47, %v1845_v21  ;;  %v2229_v34 = vmul.f32 %v4282_v47, %v1589_v20  ;;  %v808_v37 = vpop.f32.mrf.mxu1 }
 0x274   : > { %v1255_v22 = vmul.f32 1.442695, %v1078_v9  ;;  %v5983_v12 = vadd.f32 %v615_v36, %v5153_v48  ;;  %4295 = vrcp.f32 %v2481_v32  ;;  %v1259_v61 = vmul.f32 1.442695, %v1080_v26 }
 0x275   : > { %v1081_v7 = vsub.f32 0.0, %v953_v5  ;;  %v955_v23 = vand.u32 2147483647, %v5970_v0  ;;  %v2958_v14 = vadd.f32 %v5870_v51, %v5907_v3  ;;  %v3216_v59 = vmax.f32 %v5875_v17, %v5965_v30 }
 0x276   : > { %v5992_v57 = vmul.f32 %v5916_v18, %v5855_v40  ;;  %v2482_v9 = vadd.f32 %v2354_v49, %v5975_v8  ;;  %v5996_v1 = vmul.f32 %v4284_v31, %v5895_v38  ;;  %4297 = vrcp.f32 %v2483_v25  ;;  %v619_v18 = vpop.f32.mrf.mxu0 }
 0x277   : > { %v4288_v47 = vpop.eup %4287  ;;  %v2484_v32 = vadd.f32 %v2356_v50, %v5980_v63  ;;  %vm1461_vm6 = vcmp.ge.f32.partialorder %v5826_v43, 0.0  ;;  %4299 = vpow2.f32 %v1255_v22  ;;  %v954_v40 = vand.u32 2147483647, %v5983_v12 }
 0x278   : > { %v4290_v51 = vpop.eup %4289  ;;  %v6000_v2 = vsel %vm1461_vm6, %v1717_v45, %v1973_v60  ;;  %v2357_v20 = vsel %vm1461_vm6, %v2229_v34, 2.0  ;;  %v3032_v21 = vadd.f32 %v5878_v42, %v5965_v30  ;;  %4301 = vpow2.f32 %v1259_v61 }
 0x279   : > { %v1261_v38 = vmul.f32 1.442695, %v1081_v7  ;;  %v1083_v31 = vsub.f32 0.0, %v955_v23  ;;  %4303 = vrcp.f32 %v2482_v9  ;;  %v1591_v26 = vmul.f32 2.0, %v4288_v47  ;;  %v812_v7 = vpop.f32.mrf.mxu1 }
 0x27a   : > { %v1847_v5 = vadd.f32 2.0, %v4288_v47  ;;  %v6006_v36 = vadd.f32 %v808_v37, %v5160_v52  ;;  %v3179_v25 = vmax.f32 %v5892_v58, %v5992_v57  ;;  %v2995_v49 = vadd.f32 %v5899_v53, %v5992_v57 }
 0x27b   : > { %v2485_v50 = vadd.f32 %v2357_v20, %v6000_v2  ;;  %v6014_v45 = vadd.f32 %v619_v18, %v5140_v41  ;;  %v3253_v42 = vmax.f32 %v5904_v29, %v5996_v1  ;;  %v2605_v60 = vmul.f32 %v5883_v55, %v5709_v56 }
 0x27c   : > { %4305 = vrcp.f32 %v2484_v32  ;;  %v1082_v34 = vsub.f32 0.0, %v954_v40  ;;  %v4292_v22 = vpop.eup %4291  ;;  %v3069_v58 = vadd.f32 %v5919_v39, %v5996_v1  ;;  %v2607_v53 = vmul.f32 %v5912_v16, %v5736_v10 }
 0x27d   : > { %4307 = vpow2.f32 %v1261_v38  ;;  %v1265_v61 = vmul.f32 1.442695, %v1083_v31  ;;  %v1719_v23 = vadd.f32 1.0, %v1591_v26  ;;  %v1975_v57 = vmul.f32 %v4288_v47, %v1847_v5 }
 0x27e   : > { %v2231_v9 = vmul.f32 %v4288_v47, %v1591_v26  ;;  %v956_v29 = vand.u32 2147483647, %v6006_v36  ;;  %v4294_v37 = vpop.eup %4293  ;;  %v2861_v20 = vmul.f32 %v4286_v11, %v2605_v60  ;;  %4309 = vrcp.f32 %v2485_v50  ;;  %v621_v26 = vpop.f32.mrf.mxu0 }
 0x27f   : > { %vm1463_vm7 = vcmp.ge.f32.partialorder %v5862_v28, 0.0  ;;  %v957_v56 = vand.u32 2147483647, %v6014_v45  ;;  %v2863_v55 = vmul.f32 %v4290_v51, %v2607_v53  ;;  %v2606_v39 = vmul.f32 %v5928_v19, %v5755_v15  ;;  %v7694_v53 = vld [vmem:[#allocation22_spill] sm:$0xff] }
 0x280   : > { %v1263_v10 = vmul.f32 1.442695, %v1082_v34  ;;  %v6030_v16 = vadd.f32 %v812_v7, %v5145_v44  ;;  %v2608_v47 = vmul.f32 %v5934_v62, %v5759_v35  ;;  %v2609_v1 = vmul.f32 %v5949_v46, %v5787_v33  ;;  %v7695_v7 = vld [vmem:[#allocation20_spill] sm:$0xff] }
 0x281   : > { %v2611_v11 = vmul.f32 %v5960_v6, %v5795_v4  ;;  %4311 = vpow2.f32 %v1265_v61  ;;  %v4296_v32 = vpop.eup %4295  ;;  %v2862_v40 = vmul.f32 %v4292_v22, %v2606_v39  ;;  %v6038_v51 = vsel %vm1463_vm7, %v1719_v23, %v1975_v57  ;;  %v814_v23 = vpop.f32.mrf.mxu1 }
 0x282   : > { %v2359_v18 = vsel %vm1463_vm7, %v2231_v9, 2.0  ;;  %v1084_v15 = vsub.f32 0.0, %v956_v29  ;;  %v7693_v19 = vmax.f32 %v5867_v27, %v5907_v3  ;;  %v2959_v31 = vadd.f32 %v2958_v14, %v2861_v20 }
 0x283   : > { %v2864_v35 = vmul.f32 %v4294_v37, %v2608_v47  ;;  %v1085_v62 = vsub.f32 0.0, %v957_v56  ;;  %v4298_v33 = vpop.eup %4297  ;;  %v6048_v4 = vmax.f32 %v3216_v59, %v2863_v55  ;;  %v2610_v46 = vmul.f32 %v5975_v8, %v5806_v13 }
 0x284   : > { %v6043_v38 = vmax.f32 %v7693_v19, %v2861_v20  ;;  %4313 = vpow2.f32 %v1263_v10  ;;  %v959_v6 = vand.u32 2147483647, %v6030_v16  ;;  %v4300_v5 = vpop.eup %4299  ;;  %v3033_v27 = vadd.f32 %v3032_v21, %v2863_v55  ;;  %v623_v19 = vpop.f32.mrf.mxu0 }
 0x285   : > { %v6053_v3 = vmul.f32 %v4296_v32, %v2609_v1  ;;  %v2612_v14 = vmul.f32 %v5980_v63, %v5814_v54  ;;  %v2487_v50 = vadd.f32 %v2359_v18, %v6038_v51  ;;  %v4302_v60 = vpop.eup %4301  ;;  %v6058_v34 = vmax.f32 %v3179_v25, %v2862_v40 }
 0x286   : > { %v2996_v17 = vadd.f32 %v2995_v49, %v2862_v40  ;;  %v1267_v30 = vmul.f32 1.442695, %v1084_v15  ;;  %v6061_v59 = vadd.f32 %v621_v26, %v5153_v48  ;;  %v4304_v13 = vpop.eup %4303  ;;  %v6063_v8 = vmax.f32 %v3253_v42, %v2864_v35 }
 0x287   : > { %v6065_v22 = vmul.f32 %v4298_v33, %v2611_v11  ;;  %v2613_v21 = vmul.f32 %v6000_v2, %v5826_v43  ;;  %vm1462_vm8 = vcmp.ge.f32.partialorder %v7694_v53, 0.0  ;;  %v1269_v54 = vmul.f32 1.442695, %v1085_v62 }
 0x288   : > { %v3070_v63 = vadd.f32 %v3069_v58, %v2864_v35  ;;  %v1590_v61 = vmul.f32 2.0, %v4300_v5  ;;  %v1846_v25 = vadd.f32 2.0, %v4300_v5  ;;  %vm1464_vm9 = vcmp.ge.f32.partialorder %v7695_v7, 0.0 }
 0x289   : > { %v1087_v49 = vsub.f32 0.0, %v959_v6  ;;  %v4306_v57 = vpop.eup %4305  ;;  %v3144_v42 = vmax.f32 %v6043_v38, %v6053_v3  ;;  %4315 = vrcp.f32 %v2487_v50  ;;  %v1592_v9 = vmul.f32 2.0, %v4302_v60 }
 0x28a   : > { %v1848_v29 = vadd.f32 2.0, %v4302_v60  ;;  %v4308_v37 = vpop.eup %4307  ;;  %v2960_v43 = vadd.f32 %v2959_v31, %v6053_v3  ;;  %v6074_v2 = vmul.f32 %v4304_v13, %v2610_v46  ;;  %4317 = vpow2.f32 %v1267_v30 }
 0x28b   : > { %v958_v58 = vand.u32 2147483647, %v6061_v59  ;;  %v3218_v20 = vmax.f32 %v6048_v4, %v6065_v22  ;;  %v6080_v56 = vadd.f32 %v3033_v27, %v6065_v22  ;;  %4319 = vpow2.f32 %v1269_v54  ;;  %v4310_v39 = vpop.eup %4309 }
 0x28c   : > { %v6083_v55 = vadd.f32 %v814_v23, %v5160_v52  ;;  %v1718_v10 = vadd.f32 1.0, %v1590_v61  ;;  %v1974_v47 = vmul.f32 %v4300_v5, %v1846_v25  ;;  %v2230_v1 = vmul.f32 %v4300_v5, %v1590_v61 }
 0x28d   : > { %vm1465_vm10 = vcmp.ge.f32.partialorder %v5956_v24, 0.0  ;;  %v1273_v11 = vmul.f32 1.442695, %v1087_v49  ;;  %v1720_v32 = vadd.f32 1.0, %v1592_v9  ;;  %v1976_v40 = vmul.f32 %v4302_v60, %v1848_v29 }
 0x28e   : > { %v2232_v18 = vmul.f32 %v4302_v60, %v1592_v9  ;;  %v1593_v15 = vmul.f32 2.0, %v4308_v37  ;;  %v4312_v38 = vpop.eup %4311  ;;  %v3181_v31 = vmax.f32 %v6058_v34, %v6074_v2  ;;  %v6089_v35 = vadd.f32 %v2996_v17, %v6074_v2 }
 0x28f   : > { %v1849_v62 = vadd.f32 2.0, %v4308_v37  ;;  %v1086_v26 = vsub.f32 0.0, %v958_v58  ;;  %v6091_v33 = vmul.f32 %v4306_v57, %v2612_v14  ;;  %v2869_v46 = vmul.f32 %v4310_v39, %v2613_v21  ;;  %v816_v57 = vpop.f32.mrf.mxu1 }
 0x290   : > { %v2615_v6 = vmul.f32 %v6038_v51, %v5862_v28  ;;  %v960_v5 = vand.u32 2147483647, %v6083_v55  ;;  %v2102_v27 = vsel %vm1462_vm8, %v1718_v10, %v1974_v47  ;;  %v2358_v3 = vsel %vm1462_vm8, %v2230_v1, 2.0  ;;  %v625_v1 = vpop.f32.mrf.mxu0 }
 0x291   : > { %4321 = vpow2.f32 %v1273_v11  ;;  %v6101_v50 = vadd.f32 %v623_v19, %v5140_v41  ;;  %v4314_v60 = vpop.eup %4313  ;;  %v6105_v14 = vsel %vm1464_vm9, %v1720_v32, %v1976_v40  ;;  %v2360_v28 = vsel %vm1464_vm9, %v2232_v18, 2.0 }
 0x292   : > { %v2233_v51 = vmul.f32 %v4308_v37, %v1593_v15  ;;  %vm1467_vm11 = vcmp.ge.f32.partialorder %v5970_v0, 0.0  ;;  %v1595_v17 = vmul.f32 2.0, %v4312_v38  ;;  %v1721_v30 = vadd.f32 1.0, %v1593_v15 }
 0x293   : > { %v1977_v13 = vmul.f32 %v4308_v37, %v1849_v62  ;;  %v1851_v21 = vadd.f32 2.0, %v4312_v38  ;;  %v1271_v54 = vmul.f32 1.442695, %v1086_v26  ;;  %v6113_v25 = vadd.f32 %v3070_v63, %v6091_v33  ;;  %v818_v62 = vpop.f32.mrf.mxu1 }
 0x294   : > { %v2486_v49 = vadd.f32 %v2358_v3, %v2102_v27  ;;  %vm1466_vm12 = vcmp.ge.f32.partialorder %v5983_v12, 0.0  ;;  %v1088_v23 = vsub.f32 0.0, %v960_v5  ;;  %v6116_v9 = vmax.f32 %v3144_v42, %v2869_v46 }
 0x295   : > { %v1594_v29 = vmul.f32 2.0, %v4314_v60  ;;  %v1850_v58 = vadd.f32 2.0, %v4314_v60  ;;  %v961_v39 = vand.u32 2147483647, %v6101_v50  ;;  %v6119_v37 = vadd.f32 %v2960_v43, %v2869_v46 }
 0x296   : > { %v2488_v10 = vadd.f32 %v2360_v28, %v6105_v14  ;;  %v2361_v47 = vsel %vm1465_vm10, %v2233_v51, 2.0  ;;  %v1723_v63 = vadd.f32 1.0, %v1595_v17  ;;  %v4316_v11 = vpop.eup %4315  ;;  %v2105_v32 = vsel %vm1465_vm10, %v1721_v30, %v1977_v13 }
 0x297   : > { %v1979_v40 = vmul.f32 %v4312_v38, %v1851_v21  ;;  %v2235_v42 = vmul.f32 %v4312_v38, %v1595_v17  ;;  %4323 = vpow2.f32 %v1271_v54  ;;  %v4318_v18 = vpop.eup %4317  ;;  %v6127_v15 = vmul.f32 %v2102_v27, %v7694_v53  ;;  %v629_v21 = vpop.f32.mrf.mxu0 }
 0x298   : > { %4325 = vrcp.f32 %v2486_v49  ;;  %v1275_v43 = vmul.f32 1.442695, %v1088_v23  ;;  %v6130_v19 = vadd.f32 %v816_v57, %v5145_v44  ;;  %v4320_v26 = vpop.eup %4319  ;;  %v1722_v46 = vadd.f32 1.0, %v1594_v29 }
 0x299   : > { %v1978_v5 = vmul.f32 %v4314_v60, %v1850_v58  ;;  %v1089_v3 = vsub.f32 0.0, %v961_v39  ;;  %v6133_v28 = vadd.f32 %v625_v1, %v5153_v48  ;;  %v6135_v51 = vmul.f32 %v4316_v11, %v2615_v6  ;;  %v631_v61 = vpop.f32.mrf.mxu0 }
 0x29a   : > { %7696 = vst [vmem:[#allocation21_spill] sm:$0xff] %v6130_v19  ;;  %4327 = vrcp.f32 %v2488_v10  ;;  %v2489_v38 = vadd.f32 %v2361_v47, %v2105_v32  ;;  %v2234_v17 = vmul.f32 %v4314_v60, %v1594_v29  ;;  %vm1468_vm13 = vcmp.ge.f32.partialorder %v6006_v36, 0.0  ;;  %v822_v60 = vpop.f32.mrf.mxu1 }
 0x29b   : > { %v6140_v53 = vsel %vm1467_vm11, %v1723_v63, %v1979_v40  ;;  %v2363_v27 = vsel %vm1467_vm11, %v2235_v42, 2.0  ;;  %v1596_v30 = vmul.f32 2.0, %v4318_v18  ;;  %v1852_v13 = vadd.f32 2.0, %v4318_v18 }
 0x29c   : > { %vm1469_vm14 = vcmp.ge.f32.partialorder %v6014_v45, 0.0  ;;  %v1597_v54 = vmul.f32 2.0, %v4320_v26  ;;  %v1853_v6 = vadd.f32 2.0, %v4320_v26  ;;  %4329 = vpow2.f32 %v1275_v43 }
 0x29d   : > { %v963_v49 = vand.u32 2147483647, %v6130_v19  ;;  %v2106_v23 = vsel %vm1466_vm12, %v1722_v46, %v1978_v5  ;;  %v1277_v57 = vmul.f32 1.442695, %v1089_v3  ;;  %v962_v29 = vand.u32 2147483647, %v6133_v28 }
 0x29e   : > { %v6150_v58 = vadd.f32 %v818_v62, %v5160_v52  ;;  %v4322_v39 = vpop.eup %4321  ;;  %4331 = vrcp.f32 %v2489_v38  ;;  %v2491_v10 = vadd.f32 %v2363_v27, %v6140_v53  ;;  %v2362_v47 = vsel %vm1466_vm12, %v2234_v17, 2.0 }
 0x29f   : > { %v6156_v63 = vadd.f32 %v629_v21, %v5140_v41  ;;  %v1724_v1 = vadd.f32 1.0, %v1596_v30  ;;  %v1980_v11 = vmul.f32 %v4318_v18, %v1852_v13  ;;  %v2236_v40 = vmul.f32 %v4318_v18, %v1596_v30 }
 0x2a0   : > { %v6159_v42 = vadd.f32 %v822_v60, %v5145_v44  ;;  %v1725_v43 = vadd.f32 1.0, %v1597_v54  ;;  %v1981_v46 = vmul.f32 %v4320_v26, %v1853_v6  ;;  %v2237_v62 = vmul.f32 %v4320_v26, %v1597_v54 }
 0x2a1   : > { %v1091_v5 = vsub.f32 0.0, %v963_v49  ;;  %v2490_v3 = vadd.f32 %v2362_v47, %v2106_v23  ;;  %vm1471_vm15 = vcmp.ge.f32.partialorder %v6030_v16, 0.0  ;;  %4333 = vpow2.f32 %v1277_v57 }
 0x2a2   : > { %v1090_v38 = vsub.f32 0.0, %v962_v29  ;;  %v964_v17 = vand.u32 2147483647, %v6150_v58  ;;  %v2616_v27 = vmul.f32 %v6105_v14, %v7695_v7  ;;  %4335 = vrcp.f32 %v2491_v10 }
 0x2a3   : > { %v1599_v13 = vmul.f32 2.0, %v4322_v39  ;;  %v965_v18 = vand.u32 2147483647, %v6156_v63  ;;  %v2108_v30 = vsel %vm1468_vm13, %v1724_v1, %v1980_v11  ;;  %v2364_v26 = vsel %vm1468_vm13, %v2236_v40, 2.0 }
 0x2a4   : > { %v1855_v21 = vadd.f32 2.0, %v4322_v39  ;;  %v967_v54 = vand.u32 2147483647, %v6159_v42  ;;  %v4324_v6 = vpop.eup %4323  ;;  %v2617_v49 = vmul.f32 %v2105_v32, %v5956_v24  ;;  %v2109_v60 = vsel %vm1469_vm14, %v1725_v43, %v1981_v46 }
 0x2a5   : > { %v2365_v7 = vsel %vm1469_vm14, %v2237_v62, 2.0  ;;  %v1281_v14 = vmul.f32 1.442695, %v1091_v5  ;;  %v4326_v57 = vpop.eup %4325  ;;  %v6180_v29 = vmax.f32 %v3218_v20, %v6135_v51  ;;  %4337 = vrcp.f32 %v2490_v3 }
 0x2a6   : > { %v1279_v10 = vmul.f32 1.442695, %v1090_v38  ;;  %v1092_v47 = vsub.f32 0.0, %v964_v17  ;;  %v2492_v1 = vadd.f32 %v2364_v26, %v2108_v30  ;;  %v1727_v11 = vadd.f32 1.0, %v1599_v13 }
 0x2a7   : > { %v2239_v24 = vmul.f32 %v4322_v39, %v1599_v13  ;;  %vm1470_vm1 = vcmp.ge.f32.partialorder %v6061_v59, 0.0  ;;  %v1093_v32 = vsub.f32 0.0, %v965_v18  ;;  %v4328_v40 = vpop.eup %4327  ;;  %v2493_v43 = vadd.f32 %v2365_v7, %v2109_v60 }
 0x2a8   : > { %v1983_v46 = vmul.f32 %v4322_v39, %v1855_v21  ;;  %v1598_v62 = vmul.f32 2.0, %v4324_v6  ;;  %v1095_v5 = vsub.f32 0.0, %v967_v54  ;;  %v6185_v4 = vadd.f32 %v6080_v56, %v6135_v51  ;;  %v824_v54 = vpop.f32.mrf.mxu1 }
 0x2a9   : > { %v2619_v22 = vmul.f32 %v6140_v53, %v5970_v0  ;;  %v1854_v20 = vadd.f32 2.0, %v4324_v6  ;;  %4339 = vpow2.f32 %v1281_v14  ;;  %v4330_v3 = vpop.eup %4329  ;;  %v2870_v38 = vmul.f32 %v4326_v57, %v6127_v15 }
 0x2aa   : > { %v2618_v17 = vmul.f32 %v2106_v23, %v5983_v12  ;;  %4341 = vpow2.f32 %v1279_v10  ;;  %v1283_v13 = vmul.f32 1.442695, %v1092_v47  ;;  %v2367_v39 = vsel %vm1471_vm15, %v2239_v24, 2.0 }
 0x2ab   : > { %4343 = vrcp.f32 %v2492_v1  ;;  %v1285_v18 = vmul.f32 1.442695, %v1093_v32  ;;  %v6194_v56 = vadd.f32 %v631_v61, %v5153_v48  ;;  %v4332_v51 = vpop.eup %4331  ;;  %v2111_v0 = vsel %vm1471_vm15, %v1727_v11, %v1983_v46 }
 0x2ac   : > { %4345 = vrcp.f32 %v2493_v43  ;;  %v2238_v53 = vmul.f32 %v4324_v6, %v1598_v62  ;;  %vm1472_vm2 = vcmp.ge.f32.partialorder %v6083_v55, 0.0  ;;  %v1289_v15 = vmul.f32 1.442695, %v1095_v5 }
 0x2ad   : > { %v1726_v12 = vadd.f32 1.0, %v1598_v62  ;;  %v1982_v23 = vmul.f32 %v4324_v6, %v1854_v20  ;;  %v1600_v26 = vmul.f32 2.0, %v4330_v3  ;;  %v1856_v21 = vadd.f32 2.0, %v4330_v3 }
 0x2ae   : > { %v6202_v7 = vmax.f32 %v3181_v31, %v2870_v38  ;;  %v2872_v61 = vmul.f32 %v4328_v40, %v2616_v27  ;;  %v2620_v14 = vmul.f32 %v2108_v30, %v6006_v36  ;;  %4347 = vpow2.f32 %v1283_v13  ;;  %v4334_v57 = vpop.eup %4333 }
 0x2af   : > { %v2998_v10 = vadd.f32 %v6089_v35, %v2870_v38  ;;  %v2495_v47 = vadd.f32 %v2367_v39, %v2111_v0  ;;  %4349 = vpow2.f32 %v1285_v18  ;;  %v966_v1 = vand.u32 2147483647, %v6194_v56  ;;  %v4336_v6 = vpop.eup %4335 }
 0x2b0   : > { %v6207_v11 = vmul.f32 %v4332_v51, %v2617_v49  ;;  %v2366_v24 = vsel %vm1470_vm1, %v2238_v53, 2.0  ;;  %4351 = vpow2.f32 %v1289_v15  ;;  %v6212_v34 = vadd.f32 %v824_v54, %v5160_v52  ;;  %v826_v51 = vpop.f32.mrf.mxu1 }
 0x2b1   : > { %v2110_v36 = vsel %vm1470_vm1, %v1726_v12, %v1982_v23  ;;  %v1728_v2 = vadd.f32 1.0, %v1600_v26  ;;  %v1984_v31 = vmul.f32 %v4330_v3, %v1856_v21  ;;  %v2240_v35 = vmul.f32 %v4330_v3, %v1600_v26 }
 0x2b2   : > { %7697 = vst [vmem:[#allocation23_spill] sm:$0xff] %v6212_v34  ;;  %v7698_v27 = vmax.f32 %v6063_v8, %v6091_v33  ;;  %v2621_v49 = vmul.f32 %v2109_v60, %v6014_v45  ;;  %v1601_v32 = vmul.f32 2.0, %v4334_v57  ;;  %v1857_v40 = vadd.f32 2.0, %v4334_v57  ;;  %v4338_v43 = vpop.eup %4337  ;;  %v633_v60 = vpop.f32.mrf.mxu0 }
 0x2b3   : > { %v6223_v46 = vadd.f32 %v6113_v25, %v2872_v61  ;;  %v6225_v62 = vmul.f32 %v4336_v6, %v2619_v22  ;;  %v6228_v5 = vmul.f32 %v2111_v0, %v6030_v16  ;;  %v1094_v20 = vsub.f32 0.0, %v966_v1 }
 0x2b4   : > { %v6219_v30 = vmax.f32 %v7698_v27, %v2872_v61  ;;  %4353 = vrcp.f32 %v2495_v47  ;;  %v2494_v3 = vadd.f32 %v2366_v24, %v2110_v36  ;;  %vm1473_vm3 = vcmp.ge.f32.partialorder %v6101_v50, 0.0 }
 0x2b5   : > { %v968_v8 = vand.u32 2147483647, %v6212_v34  ;;  %v6236_v33 = vadd.f32 %v6119_v37, %v6207_v11  ;;  %v6240_v25 = vsel %vm1472_vm2, %v1728_v2, %v1984_v31  ;;  %v2368_v16 = vsel %vm1472_vm2, %v2240_v35, 2.0 }
 0x2b6   : > { %v4340_v22 = vpop.eup %4339  ;;  %v6244_v38 = vmul.f32 %v4338_v43, %v2618_v17  ;;  %v1729_v13 = vadd.f32 1.0, %v1601_v32  ;;  %v1985_v39 = vmul.f32 %v4334_v57, %v1857_v40  ;;  %v2241_v18 = vmul.f32 %v4334_v57, %v1601_v32 }
 0x2b7   : > { %v4342_v0 = vpop.eup %4341  ;;  %v6250_v53 = vadd.f32 %v6185_v4, %v6225_v62  ;;  %v6253_v15 = vmul.f32 %v2110_v36, %v6061_v59  ;;  %v1287_v12 = vmul.f32 1.442695, %v1094_v20  ;;  %4355 = vrcp.f32 %v2494_v3 }
 0x2b8   : > { %v4344_v23 = vpop.eup %4343  ;;  %v2496_v17 = vadd.f32 %v2368_v16, %v6240_v25  ;;  %vm1475_vm4 = vcmp.ge.f32.partialorder %v6130_v19, 0.0  ;;  %v1096_v26 = vsub.f32 0.0, %v968_v8  ;;  %v6258_v21 = vadd.f32 %v633_v60, %v5140_v41 }
 0x2b9   : > { %v4346_v54 = vpop.eup %4345  ;;  %v1603_v61 = vmul.f32 2.0, %v4340_v22  ;;  %v1859_v57 = vadd.f32 2.0, %v4340_v22  ;;  %vm1474_vm5 = vcmp.ge.f32.partialorder %v6133_v28, 0.0  ;;  %v6262_v4 = vadd.f32 %v826_v51, %v5145_v44 }
 0x2ba   : > { %7699 = vst [vmem:[#allocation22_spill] sm:$0xff] %v6258_v21  ;;  %v6268_v47 = vsel %vm1473_vm3, %v1729_v13, %v1985_v39  ;;  %v2369_v1 = vsel %vm1473_vm3, %v2241_v18, 2.0  ;;  %v1602_v6 = vmul.f32 2.0, %v4342_v0  ;;  %v6273_v36 = vadd.f32 %v2998_v10, %v6244_v38  ;;  %v635_v10 = vpop.f32.mrf.mxu0 }
 0x2bb   : > { %7700 = vst [vmem:[#allocation20_spill] sm:$0xff] %v6262_v4  ;;  %v4348_v24 = vpop.eup %4347  ;;  %v6275_v2 = vmul.f32 %v4344_v23, %v2620_v14  ;;  %v1858_v31 = vadd.f32 2.0, %v4342_v0  ;;  %4357 = vpow2.f32 %v1287_v12  ;;  %v6277_v27 = vmul.f32 %v4346_v54, %v2621_v49  ;;  %v828_v54 = vpop.f32.mrf.mxu1 }
 0x2bc   : > { %v4350_v35 = vpop.eup %4349  ;;  %4359 = vrcp.f32 %v2496_v17  ;;  %v1291_v32 = vmul.f32 1.442695, %v1096_v26  ;;  %v969_v40 = vand.u32 2147483647, %v6258_v21  ;;  %v2497_v20 = vadd.f32 %v2369_v1, %v6268_v47 }
 0x2bd   : > { %v4352_v43 = vpop.eup %4351  ;;  %v1731_v3 = vadd.f32 1.0, %v1603_v61  ;;  %v1987_v8 = vmul.f32 %v4340_v22, %v1859_v57  ;;  %v971_v16 = vand.u32 2147483647, %v6262_v4  ;;  %v2243_v60 = vmul.f32 %v4340_v22, %v1603_v61  ;;  %v832_v4 = vpop.f32.mrf.mxu1 }
 0x2be   : > { %v2242_v14 = vmul.f32 %v4342_v0, %v1602_v6  ;;  %vm1476_vm6 = vcmp.ge.f32.partialorder %v6150_v58, 0.0  ;;  %v1604_v13 = vmul.f32 2.0, %v4348_v24  ;;  %v1860_v39 = vadd.f32 2.0, %v4348_v24 }
 0x2bf   : > { %vm1477_vm7 = vcmp.ge.f32.partialorder %v6156_v63, 0.0  ;;  %v1730_v49 = vadd.f32 1.0, %v1602_v6  ;;  %v1986_v18 = vmul.f32 %v4342_v0, %v1858_v31  ;;  %v1605_v51 = vmul.f32 2.0, %v4350_v35  ;;  %v639_v0 = vpop.f32.mrf.mxu0 }
 0x2c0   : > { %v1861_v12 = vadd.f32 2.0, %v4350_v35  ;;  %vm1479_vm8 = vcmp.ge.f32.partialorder %v6159_v42, 0.0  ;;  %v1607_v23 = vmul.f32 2.0, %v4352_v43  ;;  %v1863_v17 = vadd.f32 2.0, %v4352_v43 }
 0x2c1   : > { %4361 = vpow2.f32 %v1291_v32  ;;  %v1097_v26 = vsub.f32 0.0, %v969_v40  ;;  %v4354_v57 = vpop.eup %4353  ;;  %v6287_v22 = vsel %vm1475_vm4, %v1731_v3, %v1987_v8  ;;  %v1099_v61 = vsub.f32 0.0, %v971_v16 }
 0x2c2   : > { %4363 = vrcp.f32 %v2497_v20  ;;  %v6290_v1 = vadd.f32 %v635_v10, %v5153_v48  ;;  %v2371_v6 = vsel %vm1475_vm4, %v2243_v60, 2.0  ;;  %v2370_v31 = vsel %vm1474_vm5, %v2242_v14, 2.0 }
 0x2c3   : > { %v1732_v32 = vadd.f32 1.0, %v1604_v13  ;;  %v1988_v40 = vmul.f32 %v4348_v24, %v1860_v39  ;;  %v6298_v20 = vsel %vm1474_vm5, %v1730_v49, %v1986_v18  ;;  %v2244_v59 = vmul.f32 %v4348_v24, %v1604_v13  ;;  %v641_v39 = vpop.f32.mrf.mxu0 }
 0x2c4   : > { %v1733_v3 = vadd.f32 1.0, %v1605_v51  ;;  %v1989_v8 = vmul.f32 %v4350_v35, %v1861_v12  ;;  %v2245_v16 = vmul.f32 %v4350_v35, %v1605_v51  ;;  %v1735_v37 = vadd.f32 1.0, %v1607_v23  ;;  %v4356_v21 = vpop.eup %4355 }
 0x2c5   : > { %v1991_v10 = vmul.f32 %v4352_v43, %v1863_v17  ;;  %v1293_v45 = vmul.f32 1.442695, %v1097_v26  ;;  %v2247_v19 = vmul.f32 %v4352_v43, %v1607_v23  ;;  %v1297_v60 = vmul.f32 1.442695, %v1099_v61 }
 0x2c6   : > { %v970_v34 = vand.u32 2147483647, %v6290_v1  ;;  %v6302_v14 = vadd.f32 %v828_v54, %v5160_v52  ;;  %v2879_v49 = vmul.f32 %v4354_v57, %v6228_v5  ;;  %v2499_v24 = vadd.f32 %v2371_v6, %v6287_v22 }
 0x2c7   : > { %v2498_v13 = vadd.f32 %v2370_v31, %v6298_v20  ;;  %v6308_v35 = vadd.f32 %v639_v0, %v5140_v41  ;;  %v2116_v18 = vsel %vm1476_vm6, %v1732_v32, %v1988_v40  ;;  %v2372_v43 = vsel %vm1476_vm6, %v2244_v59, 2.0 }
 0x2c8   : > { %v6316_v51 = vsel %vm1477_vm7, %v1733_v3, %v1989_v8  ;;  %v6319_v12 = vadd.f32 %v832_v4, %v5145_v44  ;;  %v4358_v5 = vpop.eup %4357  ;;  %v2373_v23 = vsel %vm1477_vm7, %v2245_v16, 2.0  ;;  %v6325_v17 = vsel %vm1479_vm8, %v1735_v37, %v1991_v10 }
 0x2c9   : > { %4365 = vpow2.f32 %v1293_v45  ;;  %v6328_v26 = vadd.f32 %v641_v39, %v5153_v48  ;;  %v4360_v59 = vpop.eup %4359  ;;  %v2375_v54 = vsel %vm1479_vm8, %v2247_v19, 2.0  ;;  %v1098_v57 = vsub.f32 0.0, %v970_v34 }
 0x2ca   : > { %4367 = vpow2.f32 %v1297_v60  ;;  %v972_v4 = vand.u32 2147483647, %v6302_v14  ;;  %v3257_v61 = vmax.f32 %v6219_v30, %v6275_v2  ;;  %v6337_v0 = vadd.f32 %v6223_v46, %v6275_v2 }
 0x2cb   : > { %v2500_v37 = vadd.f32 %v2372_v43, %v2116_v18  ;;  %v973_v45 = vand.u32 2147483647, %v6308_v35  ;;  %v7701_v6 = vmax.f32 %v6116_v9, %v6207_v11  ;;  %4369 = vrcp.f32 %v2499_v24 }
 0x2cc   : > { %v2501_v19 = vadd.f32 %v2373_v23, %v6316_v51  ;;  %v975_v34 = vand.u32 2147483647, %v6319_v12  ;;  %v6350_v32 = vadd.f32 %v6236_v33, %v6277_v27  ;;  %v2878_v46 = vmul.f32 %v4356_v21, %v6253_v15  ;;  %v834_v21 = vpop.f32.mrf.mxu1 }
 0x2cd   : > { %v6344_v31 = vmax.f32 %v7701_v6, %v6277_v27  ;;  %v2503_v40 = vadd.f32 %v2375_v54, %v6325_v17  ;;  %v974_v3 = vand.u32 2147483647, %v6328_v26  ;;  %v7702_v9 = vmax.f32 %v6180_v29, %v6225_v62 }
 0x2ce   : > { %v4362_v8 = vpop.eup %4361  ;;  %4371 = vrcp.f32 %v2498_v13  ;;  %vm1478_vm9 = vcmp.ge.f32.partialorder %v6194_v56, 0.0  ;;  %v1295_v16 = vmul.f32 1.442695, %v1098_v57  ;;  %v1100_v10 = vsub.f32 0.0, %v972_v4  ;;  %v7704_v4 = vld [vmem:[#allocation23_spill] sm:$0xff] }
 0x2cf   : > { %v6358_v11 = vmax.f32 %v7702_v9, %v2879_v49  ;;  %v4364_v60 = vpop.eup %4363  ;;  %4373 = vrcp.f32 %v2500_v37  ;;  %v1606_v33 = vmul.f32 2.0, %v4358_v5  ;;  %v1862_v27 = vadd.f32 2.0, %v4358_v5 }
 0x2d0   : > { %v1101_v15 = vsub.f32 0.0, %v973_v45  ;;  %v6362_v39 = vadd.f32 %v6250_v53, %v2879_v49  ;;  %v2624_v24 = vmul.f32 %v6240_v25, %v6083_v55  ;;  %4375 = vrcp.f32 %v2501_v19  ;;  %v643_v19 = vpop.f32.mrf.mxu0 }
 0x2d1   : > { %v1103_v29 = vsub.f32 0.0, %v975_v34  ;;  %v7703_v62 = vmax.f32 %v6202_v7, %v6244_v38  ;;  %v6372_v43 = vadd.f32 %v6273_v36, %v2878_v46  ;;  %4377 = vrcp.f32 %v2503_v40  ;;  %v7705_v38 = vld [vmem:[#allocation21_spill] sm:$0xff] }
 0x2d2   : > { %v1102_v23 = vsub.f32 0.0, %v974_v3  ;;  %v2625_v54 = vmul.f32 %v6268_v47, %v6101_v50  ;;  %4379 = vpow2.f32 %v1295_v16  ;;  %v1299_v53 = vmul.f32 1.442695, %v1100_v10  ;;  %v7706_v10 = vld [vmem:[#allocation22_spill] sm:$0xff] }
 0x2d3   : > { %v6369_v13 = vmax.f32 %v7703_v62, %v2878_v46  ;;  %v6377_v49 = vadd.f32 %v834_v21, %v5160_v52  ;;  %v1734_v55 = vadd.f32 1.0, %v1606_v33  ;;  %v1990_v25 = vmul.f32 %v4358_v5, %v1862_v27  ;;  %v7707_v27 = vld [vmem:[#allocation20_spill] sm:$0xff] }
 0x2d4   : > { %v2246_v57 = vmul.f32 %v4358_v5, %v1606_v33  ;;  %vm1480_vm10 = vcmp.ge.f32.partialorder %v7704_v4, 0.0  ;;  %v1301_v7 = vmul.f32 1.442695, %v1101_v15  ;;  %v2627_v36 = vmul.f32 %v6287_v22, %v7705_v38 }
 0x2d5   : > { %v1608_v37 = vmul.f32 2.0, %v4362_v8  ;;  %v1864_v45 = vadd.f32 2.0, %v4362_v8  ;;  %v1305_v6 = vmul.f32 1.442695, %v1103_v29  ;;  %v2880_v34 = vmul.f32 %v4360_v59, %v2624_v24 }
 0x2d6   : > { %v2626_v50 = vmul.f32 %v6298_v20, %v6133_v28  ;;  %v2628_v47 = vmul.f32 %v2116_v18, %v6150_v58  ;;  %v1303_v46 = vmul.f32 1.442695, %v1102_v23  ;;  %v4366_v40 = vpop.eup %4365  ;;  %v6385_v3 = vmul.f32 %v4364_v60, %v2625_v54 }
 0x2d7   : > { %v2629_v5 = vmul.f32 %v6316_v51, %v6156_v63  ;;  %4381 = vpow2.f32 %v1299_v53  ;;  %v976_v22 = vand.u32 2147483647, %v6377_v49  ;;  %v4368_v9 = vpop.eup %4367  ;;  %v2118_v16 = vsel %vm1478_vm9, %v1734_v55, %v1990_v25 }
 0x2d8   : > { %v2374_v59 = vsel %vm1478_vm9, %v2246_v57, 2.0  ;;  %4383 = vpow2.f32 %v1301_v7  ;;  %v6395_v28 = vadd.f32 %v643_v19, %v5140_v41  ;;  %v1736_v58 = vadd.f32 1.0, %v1608_v37  ;;  %v4370_v63 = vpop.eup %4369 }
 0x2d9   : > { %v1992_v20 = vmul.f32 %v4362_v8, %v1864_v45  ;;  %v2248_v18 = vmul.f32 %v4362_v8, %v1608_v37  ;;  %vm1481_vm11 = vcmp.ge.f32.partialorder %v7706_v10, 0.0  ;;  %4385 = vpow2.f32 %v1305_v6 }
 0x2da   : > { %v6401_v51 = vmax.f32 %v3257_v61, %v2880_v34  ;;  %v1609_v60 = vmul.f32 2.0, %v4366_v40  ;;  %v1865_v33 = vadd.f32 2.0, %v4366_v40  ;;  %vm1483_vm12 = vcmp.ge.f32.partialorder %v7707_v27, 0.0 }
 0x2db   : > { %4387 = vpow2.f32 %v1303_v46  ;;  %v3074_v15 = vadd.f32 %v6337_v0, %v2880_v34  ;;  %v1611_v21 = vmul.f32 2.0, %v4368_v9  ;;  %v1867_v24 = vadd.f32 2.0, %v4368_v9  ;;  %v4372_v8 = vpop.eup %4371 }
 0x2dc   : > { %v1104_v29 = vsub.f32 0.0, %v976_v22  ;;  %v3148_v62 = vmax.f32 %v6344_v31, %v6385_v3  ;;  %v2631_v23 = vmul.f32 %v6325_v17, %v6159_v42  ;;  %v2502_v30 = vadd.f32 %v2374_v59, %v2118_v16  ;;  %v4374_v61 = vpop.eup %4373  ;;  %v836_v22 = vpop.f32.mrf.mxu1 }
 0x2dd   : > { %v977_v2 = vand.u32 2147483647, %v6395_v28  ;;  %v2964_v54 = vadd.f32 %v6350_v32, %v6385_v3  ;;  %v2883_v53 = vmul.f32 %v4370_v63, %v2627_v36  ;;  %v2120_v0 = vsel %vm1480_vm10, %v1736_v58, %v1992_v20  ;;  %v4376_v25 = vpop.eup %4375 }
 0x2de   : > { %v2376_v55 = vsel %vm1480_vm10, %v2248_v18, 2.0  ;;  %v6417_v31 = vmul.f32 %v2118_v16, %v6194_v56  ;;  %v1737_v57 = vadd.f32 1.0, %v1609_v60  ;;  %v1993_v42 = vmul.f32 %v4366_v40, %v1865_v33  ;;  %v4378_v7 = vpop.eup %4377 }
 0x2df   : > { %v2249_v17 = vmul.f32 %v4366_v40, %v1609_v60  ;;  %v1739_v38 = vadd.f32 1.0, %v1611_v21  ;;  %v1995_v37 = vmul.f32 %v4368_v9, %v1867_v24  ;;  %v2251_v45 = vmul.f32 %v4368_v9, %v1611_v21  ;;  %v4380_v32 = vpop.eup %4379 }
 0x2e0   : > { %v1307_v6 = vmul.f32 1.442695, %v1104_v29  ;;  %4389 = vrcp.f32 %v2502_v30  ;;  %v2504_v36 = vadd.f32 %v2376_v55, %v2120_v0  ;;  %v6420_v19 = vmul.f32 %v2120_v0, %v7704_v4 }
 0x2e1   : > { %v1105_v34 = vsub.f32 0.0, %v977_v2  ;;  %v3222_v46 = vmax.f32 %v6358_v11, %v2883_v53  ;;  %v6424_v56 = vadd.f32 %v6362_v39, %v2883_v53  ;;  %v6426_v3 = vmul.f32 %v4372_v8, %v2626_v50 }
 0x2e2   : > { %v6428_v40 = vmul.f32 %v4374_v61, %v2628_v47  ;;  %v2885_v16 = vmul.f32 %v4376_v25, %v2629_v5  ;;  %v6430_v9 = vmul.f32 %v4378_v7, %v2631_v23  ;;  %v6434_v59 = vsel %vm1481_vm11, %v1737_v57, %v1993_v42 }
 0x2e3   : > { %v2377_v4 = vsel %vm1481_vm11, %v2249_v17, 2.0  ;;  %v6440_v11 = vsel %vm1483_vm12, %v1739_v38, %v1995_v37  ;;  %v2379_v39 = vsel %vm1483_vm12, %v2251_v45, 2.0  ;;  %vm1482_vm13 = vcmp.ge.f32.partialorder %v6290_v1, 0.0  ;;  %v838_v17 = vpop.f32.mrf.mxu1 }
 0x2e4   : > { %v1610_v50 = vmul.f32 2.0, %v4380_v32  ;;  %4391 = vpow2.f32 %v1307_v6  ;;  %v4382_v47 = vpop.eup %4381  ;;  %v1866_v5 = vadd.f32 2.0, %v4380_v32  ;;  %v1309_v58 = vmul.f32 1.442695, %v1105_v34 }
 0x2e5   : > { %4393 = vrcp.f32 %v2504_v36  ;;  %v6446_v20 = vadd.f32 %v836_v22, %v5145_v44  ;;  %v4384_v18 = vpop.eup %4383  ;;  %v3185_v63 = vmax.f32 %v6369_v13, %v6426_v3  ;;  %v6452_v60 = vadd.f32 %v6372_v43, %v6426_v3 }
 0x2e6   : > { %v3259_v33 = vmax.f32 %v6401_v51, %v6428_v40  ;;  %v2505_v21 = vadd.f32 %v2377_v4, %v6434_v59  ;;  %v4386_v24 = vpop.eup %4385  ;;  %v6458_v29 = vadd.f32 %v3074_v15, %v6428_v40  ;;  %v6460_v8 = vmax.f32 %v3148_v62, %v2885_v16  ;;  %v645_v62 = vpop.f32.mrf.mxu0 }
 0x2e7   : > { %v6462_v23 = vadd.f32 %v2964_v54, %v2885_v16  ;;  %v2507_v30 = vadd.f32 %v2379_v39, %v6440_v11  ;;  %vm1484_vm14 = vcmp.ge.f32.partialorder %v6302_v14, 0.0  ;;  %v6467_v43 = vmax.f32 %v3222_v46, %v6430_v9 }
 0x2e8   : > { %v4388_v2 = vpop.eup %4387  ;;  %v1738_v61 = vadd.f32 1.0, %v1610_v50  ;;  %v1612_v53 = vmul.f32 2.0, %v4382_v47  ;;  %v1868_v0 = vadd.f32 2.0, %v4382_v47  ;;  %v1994_v55 = vmul.f32 %v4380_v32, %v1866_v5 }
 0x2e9   : > { %v2250_v25 = vmul.f32 %v4380_v32, %v1610_v50  ;;  %vm1485_vm15 = vcmp.ge.f32.partialorder %v6308_v35, 0.0  ;;  %4395 = vpow2.f32 %v1309_v58  ;;  %v979_v15 = vand.u32 2147483647, %v6446_v20 }
 0x2ea   : > { %4397 = vrcp.f32 %v2505_v21  ;;  %v1613_v54 = vmul.f32 2.0, %v4384_v18  ;;  %v1869_v57 = vadd.f32 2.0, %v4384_v18  ;;  %vm1487_vm1 = vcmp.ge.f32.partialorder %v6319_v12, 0.0 }
 0x2eb   : > { %v1615_v42 = vmul.f32 2.0, %v4386_v24  ;;  %vm1486_vm2 = vcmp.ge.f32.partialorder %v6328_v26, 0.0  ;;  %4399 = vrcp.f32 %v2507_v30  ;;  %v1871_v7 = vadd.f32 2.0, %v4386_v24 }
 0x2ec   : > { %v1614_v38 = vmul.f32 2.0, %v4388_v2  ;;  %v1870_v37 = vadd.f32 2.0, %v4388_v2  ;;  %v1740_v45 = vadd.f32 1.0, %v1612_v53  ;;  %v1996_v6 = vmul.f32 %v4382_v47, %v1868_v0 }
 0x2ed   : > { %v2252_v32 = vmul.f32 %v4382_v47, %v1612_v53  ;;  %v6474_v36 = vadd.f32 %v645_v62, %v5153_v48  ;;  %v6478_v34 = vsel %vm1482_vm13, %v1738_v61, %v1994_v55  ;;  %v2378_v46 = vsel %vm1482_vm13, %v2250_v25, 2.0  ;;  %v4390_v4 = vpop.eup %4389  ;;  %v649_v47 = vpop.f32.mrf.mxu0 }
 0x2ee   : > { %v1107_v22 = vsub.f32 0.0, %v979_v15  ;;  %v6483_v16 = vadd.f32 %v838_v17, %v5160_v52  ;;  %v1741_v39 = vadd.f32 1.0, %v1613_v54  ;;  %v1997_v50 = vmul.f32 %v4384_v18, %v1869_v57 }
 0x2ef   : > { %v2253_v5 = vmul.f32 %v4384_v18, %v1613_v54  ;;  %v1743_v58 = vadd.f32 1.0, %v1615_v42  ;;  %v1999_v21 = vmul.f32 %v4386_v24, %v1871_v7  ;;  %v2255_v30 = vmul.f32 %v4386_v24, %v1615_v42 }
 0x2f0   : > { %v1742_v53 = vadd.f32 1.0, %v1614_v38  ;;  %v1998_v0 = vmul.f32 %v4388_v2, %v1870_v37  ;;  %v6487_v61 = vsel %vm1484_vm14, %v1740_v45, %v1996_v6  ;;  %v2380_v55 = vsel %vm1484_vm14, %v2252_v32, 2.0  ;;  %v842_v45 = vpop.f32.mrf.mxu1 }
 0x2f1   : > { %v2254_v25 = vmul.f32 %v4388_v2, %v1614_v38  ;;  %v978_v15 = vand.u32 2147483647, %v6474_v36  ;;  %v4392_v62 = vpop.eup %4391  ;;  %v6494_v18 = vadd.f32 %v6424_v56, %v6430_v9  ;;  %v2886_v54 = vmul.f32 %v4390_v4, %v6417_v31  ;;  %v651_v4 = vpop.f32.mrf.mxu0 }
 0x2f2   : > { %v2506_v24 = vadd.f32 %v2378_v46, %v6478_v34  ;;  %v6499_v57 = vadd.f32 %v649_v47, %v5140_v41  ;;  %v4394_v42 = vpop.eup %4393  ;;  %v6503_v17 = vsel %vm1485_vm15, %v1741_v39, %v1997_v50  ;;  %v2381_v2 = vsel %vm1485_vm15, %v2253_v5, 2.0 }
 0x2f3   : > { %v1313_v7 = vmul.f32 1.442695, %v1107_v22  ;;  %v980_v38 = vand.u32 2147483647, %v6483_v16  ;;  %v2508_v56 = vadd.f32 %v2380_v55, %v6487_v61  ;;  %v6511_v31 = vsel %vm1487_vm1, %v1743_v58, %v1999_v21 }
 0x2f4   : > { %v2383_v9 = vsel %vm1487_vm1, %v2255_v30, 2.0  ;;  %v6517_v37 = vsel %vm1486_vm2, %v1742_v53, %v1998_v0  ;;  %vm1488_vm3 = vcmp.ge.f32.partialorder %v6377_v49, 0.0  ;;  %v2382_v6 = vsel %vm1486_vm2, %v2254_v25, 2.0 }
 0x2f5   : > { %v1616_v32 = vmul.f32 2.0, %v4392_v62  ;;  %v1872_v46 = vadd.f32 2.0, %v4392_v62  ;;  %v1106_v22 = vsub.f32 0.0, %v978_v15  ;;  %v2633_v39 = vmul.f32 %v6434_v59, %v7706_v10 }
 0x2f6   : > { %4401 = vrcp.f32 %v2506_v24  ;;  %v2509_v50 = vadd.f32 %v2381_v2, %v6503_v17  ;;  %v981_v5 = vand.u32 2147483647, %v6499_v57  ;;  %v4396_v58 = vpop.eup %4395  ;;  %v2511_v47 = vadd.f32 %v2383_v9, %v6511_v31 }
 0x2f7   : > { %4403 = vpow2.f32 %v1313_v7  ;;  %v1108_v21 = vsub.f32 0.0, %v980_v38  ;;  %v6528_v30 = vadd.f32 %v842_v45, %v5145_v44  ;;  %v4398_v53 = vpop.eup %4397  ;;  %v6533_v0 = vmax.f32 %v3185_v63, %v2886_v54  ;;  %v844_v7 = vpop.f32.mrf.mxu1 }
 0x2f8   : > { %4405 = vrcp.f32 %v2508_v56  ;;  %v2510_v10 = vadd.f32 %v2382_v6, %v6517_v37  ;;  %v6537_v59 = vadd.f32 %v651_v4, %v5153_v48  ;;  %v4400_v55 = vpop.eup %4399  ;;  %v1744_v25 = vadd.f32 1.0, %v1616_v32 }
 0x2f9   : > { %v2000_v15 = vmul.f32 %v4392_v62, %v1872_v46  ;;  %v2256_v24 = vmul.f32 %v4392_v62, %v1616_v32  ;;  %v1311_v2 = vmul.f32 1.442695, %v1106_v22  ;;  %4407 = vrcp.f32 %v2509_v50  ;;  %v653_v32 = vpop.f32.mrf.mxu0 }
 0x2fa   : > { %v1617_v38 = vmul.f32 2.0, %v4396_v58  ;;  %v1873_v9 = vadd.f32 2.0, %v4396_v58  ;;  %v1109_v45 = vsub.f32 0.0, %v981_v5  ;;  %v6540_v13 = vadd.f32 %v6452_v60, %v2886_v54 }
 0x2fb   : > { %4409 = vrcp.f32 %v2511_v47  ;;  %v1315_v3 = vmul.f32 1.442695, %v1108_v21  ;;  %v983_v63 = vand.u32 2147483647, %v6528_v30  ;;  %v2888_v56 = vmul.f32 %v4394_v42, %v6420_v19  ;;  %v846_v47 = vpop.f32.mrf.mxu1 }
 0x2fc   : > { %4411 = vrcp.f32 %v2510_v10  ;;  %v982_v6 = vand.u32 2147483647, %v6537_v59  ;;  %v6546_v62 = vadd.f32 %v844_v7, %v5160_v52  ;;  %v2128_v46 = vsel %vm1488_vm3, %v1744_v25, %v2000_v15 }
 0x2fd   : > { %v2384_v60 = vsel %vm1488_vm3, %v2256_v24, 2.0  ;;  %vm1489_vm4 = vcmp.ge.f32.partialorder %v6395_v28, 0.0  ;;  %4413 = vpow2.f32 %v1311_v2  ;;  %v1745_v54 = vadd.f32 1.0, %v1617_v38  ;;  %v655_v24 = vpop.f32.mrf.mxu0 }
 0x2fe   : > { %v2001_v22 = vmul.f32 %v4396_v58, %v1873_v9  ;;  %v2257_v4 = vmul.f32 %v4396_v58, %v1617_v38  ;;  %v1317_v19 = vmul.f32 1.442695, %v1109_v45  ;;  %v6553_v42 = vmul.f32 %v4398_v53, %v2633_v39 }
 0x2ff   : > { %v2635_v50 = vmul.f32 %v6440_v11, %v7707_v27  ;;  %4415 = vpow2.f32 %v1315_v3  ;;  %v1111_v5 = vsub.f32 0.0, %v983_v63  ;;  %v6560_v21 = vmax.f32 %v3259_v33, %v2888_v56 }
 0x300   : > { %v2512_v10 = vadd.f32 %v2384_v60, %v2128_v46  ;;  %v1110_v25 = vsub.f32 0.0, %v982_v6  ;;  %v984_v15 = vand.u32 2147483647, %v6546_v62  ;;  %v6564_v58 = vadd.f32 %v6458_v29, %v2888_v56 }
 0x301   : > { %v6566_v39 = vmul.f32 %v4400_v55, %v2635_v50  ;;  %v2634_v27 = vmul.f32 %v6478_v34, %v6290_v1  ;;  %v6571_v11 = vadd.f32 %v653_v32, %v5140_v41  ;;  %v2129_v51 = vsel %vm1489_vm4, %v1745_v54, %v2001_v22 }
 0x302   : > { %v2385_v40 = vsel %vm1489_vm4, %v2257_v4, 2.0  ;;  %4417 = vpow2.f32 %v1317_v19  ;;  %v6578_v33 = vadd.f32 %v846_v47, %v5145_v44  ;;  %v3150_v53 = vmax.f32 %v6460_v8, %v6553_v42 }
 0x303   : > { %v4402_v29 = vpop.eup %4401  ;;  %v2636_v1 = vmul.f32 %v6487_v61, %v6302_v14  ;;  %v1321_v34 = vmul.f32 1.442695, %v1111_v5  ;;  %v6585_v55 = vadd.f32 %v655_v24, %v5153_v48  ;;  %v2966_v7 = vadd.f32 %v6462_v23, %v6553_v42  ;;  %v848_v61 = vpop.f32.mrf.mxu1 }
 0x304   : > { %v4404_v2 = vpop.eup %4403  ;;  %4419 = vrcp.f32 %v2512_v10  ;;  %v1319_v38 = vmul.f32 1.442695, %v1110_v25  ;;  %v1112_v9 = vsub.f32 0.0, %v984_v15  ;;  %v2637_v3 = vmul.f32 %v6503_v17, %v6308_v35 }
 0x305   : > { %v4406_v45 = vpop.eup %4405  ;;  %v2639_v8 = vmul.f32 %v6511_v31, %v6319_v12  ;;  %v2513_v63 = vadd.f32 %v2385_v40, %v2129_v51  ;;  %v985_v14 = vand.u32 2147483647, %v6571_v11  ;;  %v3224_v56 = vmax.f32 %v6467_v43, %v6566_v39 }
 0x306   : > { %v6596_v6 = vmul.f32 %v4402_v29, %v2634_v27  ;;  %v2638_v23 = vmul.f32 %v6517_v37, %v6328_v26  ;;  %v987_v32 = vand.u32 2147483647, %v6578_v33  ;;  %v4408_v60 = vpop.eup %4407  ;;  %v6603_v35 = vadd.f32 %v6494_v18, %v6566_v39 }
 0x307   : > { %vm1491_vm5 = vcmp.ge.f32.partialorder %v6446_v20, 0.0  ;;  %v1619_v12 = vmul.f32 2.0, %v4404_v2  ;;  %4421 = vpow2.f32 %v1321_v34  ;;  %v986_v17 = vand.u32 2147483647, %v6585_v55 }
 0x308   : > { %v4410_v31 = vpop.eup %4409  ;;  %v1875_v43 = vadd.f32 2.0, %v4404_v2  ;;  %4423 = vpow2.f32 %v1319_v38  ;;  %v1323_v54 = vmul.f32 1.442695, %v1112_v9  ;;  %v6608_v22 = vadd.f32 %v848_v61, %v5160_v52 }
 0x309   : > { %v4412_v26 = vpop.eup %4411  ;;  %v6610_v37 = vmul.f32 %v4406_v45, %v2636_v1  ;;  %v2640_v4 = vmul.f32 %v2128_v46, %v6377_v49  ;;  %4425 = vrcp.f32 %v2513_v63  ;;  %v1113_v18 = vsub.f32 0.0, %v985_v14 }
 0x30a   : > { %v4414_v19 = vpop.eup %4413  ;;  %v3187_v42 = vmax.f32 %v6533_v0, %v6596_v6  ;;  %v3003_v50 = vadd.f32 %v6540_v13, %v6596_v6  ;;  %v2893_v5 = vmul.f32 %v4408_v60, %v2637_v3  ;;  %v1115_v47 = vsub.f32 0.0, %v987_v32 }
 0x30b   : > { %v2895_v10 = vmul.f32 %v4410_v31, %v2639_v8  ;;  %v6618_v25 = vmul.f32 %v2129_v51, %v6395_v28  ;;  %v1747_v15 = vadd.f32 1.0, %v1619_v12  ;;  %v1114_v24 = vsub.f32 0.0, %v986_v17  ;;  %v659_v8 = vpop.f32.mrf.mxu0 }
 0x30c   : > { %v4416_v39 = vpop.eup %4415  ;;  %v2003_v27 = vmul.f32 %v4404_v2, %v1875_v43  ;;  %v2259_v49 = vmul.f32 %v4404_v2, %v1619_v12  ;;  %vm1490_vm6 = vcmp.ge.f32.partialorder %v6474_v36, 0.0  ;;  %4427 = vpow2.f32 %v1323_v54 }
 0x30d   : > { %v988_v46 = vand.u32 2147483647, %v6608_v22  ;;  %v3261_v0 = vmax.f32 %v6560_v21, %v6610_v37  ;;  %v1618_v13 = vmul.f32 2.0, %v4414_v19  ;;  %v1874_v40 = vadd.f32 2.0, %v4414_v19 }
 0x30e   : > { %v1325_v29 = vmul.f32 1.442695, %v1113_v18  ;;  %v3077_v28 = vadd.f32 %v6564_v58, %v6610_v37  ;;  %v6626_v51 = vmax.f32 %v3150_v53, %v2893_v5  ;;  %v6628_v1 = vadd.f32 %v2966_v7, %v2893_v5 }
 0x30f   : > { %vm1492_vm7 = vcmp.ge.f32.partialorder %v6483_v16, 0.0  ;;  %v1329_v34 = vmul.f32 1.442695, %v1115_v47  ;;  %v4418_v2 = vpop.eup %4417  ;;  %v2894_v38 = vmul.f32 %v4412_v26, %v2638_v23  ;;  %v1620_v9 = vmul.f32 2.0, %v4416_v39 }
 0x310   : > { %v1876_v45 = vadd.f32 2.0, %v4416_v39  ;;  %v1327_v3 = vmul.f32 1.442695, %v1114_v24  ;;  %v6631_v21 = vmax.f32 %v3224_v56, %v2895_v10  ;;  %v2131_v63 = vsel %vm1491_vm5, %v1747_v15, %v2003_v27 }
 0x311   : > { %v2387_v58 = vsel %vm1491_vm5, %v2259_v49, 2.0  ;;  %v1116_v53 = vsub.f32 0.0, %v988_v46  ;;  %v4420_v7 = vpop.eup %4419  ;;  %v1746_v14 = vadd.f32 1.0, %v1618_v13  ;;  %v2002_v61 = vmul.f32 %v4414_v19, %v1874_v40 }
 0x312   : > { %v2258_v6 = vmul.f32 %v4414_v19, %v1618_v13  ;;  %vm1493_vm8 = vcmp.ge.f32.partialorder %v6499_v57, 0.0  ;;  %4429 = vpow2.f32 %v1325_v29  ;;  %v1621_v23 = vmul.f32 2.0, %v4418_v2  ;;  %v852_v29 = vpop.f32.mrf.mxu1 }
 0x313   : > { %v1877_v32 = vadd.f32 2.0, %v4418_v2  ;;  %4431 = vpow2.f32 %v1329_v34  ;;  %v6639_v56 = vadd.f32 %v659_v8, %v5140_v41  ;;  %v1748_v60 = vadd.f32 1.0, %v1620_v9 }
 0x314   : > { %v2004_v12 = vmul.f32 %v4416_v39, %v1876_v45  ;;  %v2260_v17 = vmul.f32 %v4416_v39, %v1620_v9  ;;  %4433 = vpow2.f32 %v1327_v3  ;;  %v4422_v31 = vpop.eup %4421  ;;  %v6642_v43 = vadd.f32 %v6603_v35, %v2895_v10 }
 0x315   : > { %v6644_v54 = vmax.f32 %v3187_v42, %v2894_v38  ;;  %v2896_v26 = vmul.f32 %v4420_v7, %v2640_v4  ;;  %v1331_v37 = vmul.f32 1.442695, %v1116_v53  ;;  %v4424_v18 = vpop.eup %4423  ;;  %v6646_v19 = vadd.f32 %v3003_v50, %v2894_v38 }
 0x316   : > { %v2515_v5 = vadd.f32 %v2387_v58, %v2131_v63  ;;  %v2130_v47 = vsel %vm1490_vm6, %v1746_v14, %v2002_v61  ;;  %v2386_v15 = vsel %vm1490_vm6, %v2258_v6, 2.0  ;;  %v4426_v24 = vpop.eup %4425  ;;  %v1749_v39 = vadd.f32 1.0, %v1621_v23 }
 0x317   : > { %v2005_v27 = vmul.f32 %v4418_v2, %v1877_v32  ;;  %v2261_v49 = vmul.f32 %v4418_v2, %v1621_v23  ;;  %vm1495_vm9 = vcmp.ge.f32.partialorder %v6528_v30, 0.0  ;;  %v989_v35 = vand.u32 2147483647, %v6639_v56 }
 0x318   : > { %v6656_v4 = vsel %vm1492_vm7, %v1748_v60, %v2004_v12  ;;  %v2388_v42 = vsel %vm1492_vm7, %v2260_v17, 2.0  ;;  %v1623_v50 = vmul.f32 2.0, %v4422_v31  ;;  %v1879_v10 = vadd.f32 2.0, %v4422_v31  ;;  %v661_v12 = vpop.f32.mrf.mxu0 }
 0x319   : > { %vm1494_vm10 = vcmp.ge.f32.partialorder %v6537_v59, 0.0  ;;  %v6661_v46 = vmax.f32 %v3261_v0, %v2896_v26  ;;  %v1622_v13 = vmul.f32 2.0, %v4424_v18  ;;  %v1878_v40 = vadd.f32 2.0, %v4424_v18  ;;  %v4428_v34 = vpop.eup %4427 }
 0x31a   : > { %4435 = vpow2.f32 %v1331_v37  ;;  %v6663_v2 = vadd.f32 %v3077_v28, %v2896_v26  ;;  %v6666_v38 = vmul.f32 %v4426_v24, %v6618_v25  ;;  %v2514_v9 = vadd.f32 %v2386_v15, %v2130_v47 }
 0x31b   : > { %4437 = vrcp.f32 %v2515_v5  ;;  %v2516_v45 = vadd.f32 %v2388_v42, %v6656_v4  ;;  %v6671_v3 = vsel %vm1493_vm8, %v1749_v39, %v2005_v27  ;;  %v2389_v0 = vsel %vm1493_vm8, %v2261_v49, 2.0 }
 0x31c   : > { %v1117_v8 = vsub.f32 0.0, %v989_v35  ;;  %v1751_v58 = vadd.f32 1.0, %v1623_v50  ;;  %v2007_v53 = vmul.f32 %v4422_v31, %v1879_v10  ;;  %v2263_v7 = vmul.f32 %v4422_v31, %v1623_v50 }
 0x31d   : > { %vm1496_vm11 = vcmp.ge.f32.partialorder %v6546_v62, 0.0  ;;  %v6677_v25 = vadd.f32 %v852_v29, %v5145_v44  ;;  %v1750_v28 = vadd.f32 1.0, %v1622_v13  ;;  %v2006_v14 = vmul.f32 %v4424_v18, %v1878_v40 }
 0x31e   : > { %v1624_v61 = vmul.f32 2.0, %v4428_v34  ;;  %v1880_v6 = vadd.f32 2.0, %v4428_v34  ;;  %v6682_v32 = vmul.f32 %v2131_v63, %v6446_v20  ;;  %4439 = vrcp.f32 %v2514_v9 }
 0x31f   : > { %v2262_v60 = vmul.f32 %v4424_v18, %v1622_v13  ;;  %v4430_v17 = vpop.eup %4429  ;;  %v6686_v31 = vadd.f32 %v6628_v1, %v6666_v38  ;;  %v6689_v26 = vmul.f32 %v2130_v47, %v6474_v36  ;;  %4441 = vrcp.f32 %v2516_v45  ;;  %v854_v13 = vpop.f32.mrf.mxu1 }
 0x320   : > { %v1333_v37 = vmul.f32 1.442695, %v1117_v8  ;;  %v4432_v5 = vpop.eup %4431  ;;  %v2517_v15 = vadd.f32 %v2389_v0, %v6671_v3  ;;  %v6694_v20 = vsel %vm1495_vm9, %v1751_v58, %v2007_v53  ;;  %v2391_v63 = vsel %vm1495_vm9, %v2263_v7, 2.0 }
 0x321   : > { %v991_v18 = vand.u32 2147483647, %v6677_v25  ;;  %v4434_v24 = vpop.eup %4433  ;;  %v6701_v1 = vsel %vm1494_vm10, %v1750_v28, %v2006_v14  ;;  %v1752_v36 = vadd.f32 1.0, %v1624_v61  ;;  %v2008_v47 = vmul.f32 %v4428_v34, %v1880_v6 }
 0x322   : > { %v6704_v39 = vadd.f32 %v661_v12, %v5153_v48  ;;  %v2390_v27 = vsel %vm1494_vm10, %v2262_v60, 2.0  ;;  %v2264_v49 = vmul.f32 %v4428_v34, %v1624_v61  ;;  %vm1497_vm12 = vcmp.ge.f32.partialorder %v6571_v11, 0.0 }
 0x323   : > { %v1625_v35 = vmul.f32 2.0, %v4430_v17  ;;  %v1881_v42 = vadd.f32 2.0, %v4430_v17  ;;  %vm1499_vm13 = vcmp.ge.f32.partialorder %v6578_v33, 0.0  ;;  %v1627_v50 = vmul.f32 2.0, %v4432_v5 }
 0x324   : > { %7708 = vst [vmem:[#allocation23_spill] sm:$0xff] %v6704_v39  ;;  %v1883_v10 = vadd.f32 2.0, %v4432_v5  ;;  %vm1498_vm14 = vcmp.ge.f32.partialorder %v6585_v55, 0.0  ;;  %4443 = vpow2.f32 %v1333_v37  ;;  %v1626_v40 = vmul.f32 2.0, %v4434_v24 }
 0x325   : > { %4445 = vrcp.f32 %v2517_v15  ;;  %v1882_v29 = vadd.f32 2.0, %v4434_v24  ;;  %v1119_v9 = vsub.f32 0.0, %v991_v18  ;;  %v2519_v45 = vadd.f32 %v2391_v63, %v6694_v20 }
 0x326   : > { %v2518_v34 = vadd.f32 %v2390_v27, %v6701_v1  ;;  %v6715_v0 = vsel %vm1496_vm11, %v1752_v36, %v2008_v47  ;;  %v990_v8 = vand.u32 2147483647, %v6704_v39  ;;  %v2392_v53 = vsel %vm1496_vm11, %v2264_v49, 2.0  ;;  %v663_v47 = vpop.f32.mrf.mxu0 }
 0x327   : > { %v4436_v58 = vpop.eup %4435  ;;  %v1753_v7 = vadd.f32 1.0, %v1625_v35  ;;  %v2009_v28 = vmul.f32 %v4430_v17, %v1881_v42  ;;  %v6721_v14 = vadd.f32 %v854_v13, %v5160_v52  ;;  %v2265_v6 = vmul.f32 %v4430_v17, %v1625_v35 }
 0x328   : > { %v4438_v61 = vpop.eup %4437  ;;  %v1755_v60 = vadd.f32 1.0, %v1627_v50  ;;  %v2011_v12 = vmul.f32 %v4432_v5, %v1883_v10  ;;  %v2267_v37 = vmul.f32 %v4432_v5, %v1627_v50  ;;  %v1754_v15 = vadd.f32 1.0, %v1626_v40 }
 0x329   : > { %v2010_v63 = vmul.f32 %v4434_v24, %v1882_v29  ;;  %v2266_v18 = vmul.f32 %v4434_v24, %v1626_v40  ;;  %v1337_v36 = vmul.f32 1.442695, %v1119_v9  ;;  %4447 = vrcp.f32 %v2519_v45 }
 0x32a   : > { %v1628_v27 = vmul.f32 2.0, %v4436_v58  ;;  %v1884_v23 = vadd.f32 2.0, %v4436_v58  ;;  %v1118_v39 = vsub.f32 0.0, %v990_v8  ;;  %v2644_v49 = vmul.f32 %v6656_v4, %v6483_v16  ;;  %v856_v16 = vpop.f32.mrf.mxu1 }
 0x32b   : > { %4449 = vrcp.f32 %v2518_v34  ;;  %v2520_v42 = vadd.f32 %v2392_v53, %v6715_v0  ;;  %v992_v17 = vand.u32 2147483647, %v6721_v14  ;;  %v4440_v35 = vpop.eup %4439  ;;  %v6729_v5 = vsel %vm1497_vm12, %v1753_v7, %v2009_v28  ;;  %v665_v53 = vpop.f32.mrf.mxu0 }
 0x32c   : > { %v2393_v24 = vsel %vm1497_vm12, %v2265_v6, 2.0  ;;  %v6735_v50 = vsel %vm1499_vm13, %v1755_v60, %v2011_v12  ;;  %v6738_v10 = vadd.f32 %v663_v47, %v5140_v41  ;;  %v4442_v4 = vpop.eup %4441  ;;  %v2395_v13 = vsel %vm1499_vm13, %v2267_v37, 2.0 }
 0x32d   : > { %v6744_v40 = vsel %vm1498_vm14, %v1754_v15, %v2010_v63  ;;  %v2394_v29 = vsel %vm1498_vm14, %v2266_v18, 2.0  ;;  %4451 = vpow2.f32 %v1337_v36  ;;  %v1756_v9 = vadd.f32 1.0, %v1628_v27  ;;  %v858_v18 = vpop.f32.mrf.mxu1 }
 0x32e   : > { %v2012_v45 = vmul.f32 %v4436_v58, %v1884_v23  ;;  %v2268_v34 = vmul.f32 %v4436_v58, %v1628_v27  ;;  %v1335_v8 = vmul.f32 1.442695, %v1118_v39  ;;  %v6749_v7 = vmul.f32 %v4438_v61, %v6682_v32 }
 0x32f   : > { %v2521_v28 = vadd.f32 %v2393_v24, %v6729_v5  ;;  %v1120_v6 = vsub.f32 0.0, %v992_v17  ;;  %v6753_v60 = vadd.f32 %v856_v16, %v5145_v44  ;;  %v2645_v12 = vmul.f32 %v6671_v3, %v6499_v57 }
 0x330   : > { %4453 = vrcp.f32 %v2520_v42  ;;  %v2523_v37 = vadd.f32 %v2395_v13, %v6735_v50  ;;  %v993_v23 = vand.u32 2147483647, %v6738_v10  ;;  %v2647_v39 = vmul.f32 %v6694_v20, %v6528_v30 }
 0x331   : > { %v4444_v58 = vpop.eup %4443  ;;  %v2522_v32 = vadd.f32 %v2394_v29, %v6744_v40  ;;  %vm1500_vm15 = vcmp.ge.f32.partialorder %v6608_v22, 0.0  ;;  %v6764_v61 = vadd.f32 %v665_v53, %v5153_v48  ;;  %v6767_v63 = vmul.f32 %v4440_v35, %v6689_v26 }
 0x332   : > { %v4446_v15 = vpop.eup %4445  ;;  %v6769_v57 = vsel %vm1500_vm15, %v1756_v9, %v2012_v45  ;;  %v2396_v3 = vsel %vm1500_vm15, %v2268_v34, 2.0  ;;  %4455 = vpow2.f32 %v1335_v8  ;;  %v3226_v36 = vmax.f32 %v6631_v21, %v6749_v7 }
 0x333   : > { %4457 = vrcp.f32 %v2521_v28  ;;  %v1339_v30 = vmul.f32 1.442695, %v1120_v6  ;;  %v995_v20 = vand.u32 2147483647, %v6753_v60  ;;  %v1629_v47 = vmul.f32 2.0, %v4444_v58 }
 0x334   : > { %4459 = vrcp.f32 %v2523_v37  ;;  %v1885_v27 = vadd.f32 2.0, %v4444_v58  ;;  %v1121_v42 = vsub.f32 0.0, %v993_v23  ;;  %v2524_v26 = vadd.f32 %v2396_v3, %v6769_v57 }
 0x335   : > { %4461 = vrcp.f32 %v2522_v32  ;;  %v994_v17 = vand.u32 2147483647, %v6764_v61  ;;  %v6777_v35 = vadd.f32 %v858_v18, %v5160_v52  ;;  %v3042_v24 = vadd.f32 %v6642_v43, %v6749_v7 }
 0x336   : > { %v3189_v21 = vmax.f32 %v6644_v54, %v6767_v63  ;;  %v6783_v16 = vmul.f32 %v4442_v4, %v2644_v49  ;;  %v2646_v13 = vmul.f32 %v6701_v1, %v6537_v59  ;;  %v4448_v29 = vpop.eup %4447  ;;  %v3005_v9 = vadd.f32 %v6646_v19, %v6767_v63  ;;  %v669_v59 = vpop.f32.mrf.mxu0 }
 0x337   : > { %v2901_v45 = vmul.f32 %v4446_v15, %v2645_v12  ;;  %4463 = vpow2.f32 %v1339_v30  ;;  %v1123_v34 = vsub.f32 0.0, %v995_v20  ;;  %v1757_v53 = vadd.f32 1.0, %v1629_v47 }
 0x338   : > { %v4450_v8 = vpop.eup %4449  ;;  %v2013_v28 = vmul.f32 %v4444_v58, %v1885_v27  ;;  %v2269_v6 = vmul.f32 %v4444_v58, %v1629_v47  ;;  %v1341_v43 = vmul.f32 1.442695, %v1121_v42  ;;  %v2648_v54 = vmul.f32 %v6715_v0, %v6546_v62 }
 0x339   : > { %4465 = vrcp.f32 %v2524_v26  ;;  %v1122_v49 = vsub.f32 0.0, %v994_v17  ;;  %v996_v4 = vand.u32 2147483647, %v6777_v35  ;;  %v3263_v19 = vmax.f32 %v6661_v46, %v6783_v16 }
 0x33a   : > { %v4452_v1 = vpop.eup %4451  ;;  %v3079_v7 = vadd.f32 %v6663_v2, %v6783_v16  ;;  %v2903_v12 = vmul.f32 %v4448_v29, %v2647_v39  ;;  %vm1501_vm1 = vcmp.ge.f32.partialorder %v6639_v56, 0.0  ;;  %v7709_v37 = vmax.f32 %v6626_v51, %v6666_v38  ;;  %v862_v2 = vpop.f32.mrf.mxu1 }
 0x33b   : > { %v2902_v62 = vmul.f32 %v4450_v8, %v2646_v13  ;;  %v2649_v0 = vmul.f32 %v6729_v5, %v6571_v11  ;;  %v1345_v58 = vmul.f32 1.442695, %v1123_v34  ;;  %v6804_v32 = vsel %vm1501_vm1, %v1757_v53, %v2013_v28  ;;  %v7710_v13 = vld [vmem:[#allocation23_spill] sm:$0xff] }
 0x33c   : > { %v6800_v23 = vmax.f32 %v7709_v37, %v2901_v45  ;;  %v2397_v15 = vsel %vm1501_vm1, %v2269_v6, 2.0  ;;  %4467 = vpow2.f32 %v1341_v43  ;;  %v6807_v46 = vadd.f32 %v669_v59, %v5140_v41 }
 0x33d   : > { %v4454_v39 = vpop.eup %4453  ;;  %v1631_v63 = vmul.f32 2.0, %v4452_v1  ;;  %v1887_v3 = vadd.f32 2.0, %v4452_v1  ;;  %v1343_v18 = vmul.f32 1.442695, %v1122_v49  ;;  %v1124_v51 = vsub.f32 0.0, %v996_v4 }
 0x33e   : > { %v2969_v38 = vadd.f32 %v6686_v31, %v2901_v45  ;;  %v6810_v30 = vmax.f32 %v3226_v36, %v2903_v12  ;;  %v2651_v11 = vmul.f32 %v6735_v50, %v6578_v33  ;;  %vm1503_vm2 = vcmp.ge.f32.partialorder %v6677_v25, 0.0 }
 0x33f   : > { %v4456_v5 = vpop.eup %4455  ;;  %v3043_v20 = vadd.f32 %v3042_v24, %v2903_v12  ;;  %v2525_v47 = vadd.f32 %v2397_v15, %v6804_v32  ;;  %4469 = vpow2.f32 %v1345_v58  ;;  %v6817_v27 = vadd.f32 %v862_v2, %v5145_v44 }
 0x340   : > { %v4458_v42 = vpop.eup %4457  ;;  %v6819_v26 = vmax.f32 %v3189_v21, %v2902_v62  ;;  %v2904_v17 = vmul.f32 %v4454_v39, %v2648_v54  ;;  %v2650_v31 = vmul.f32 %v6744_v40, %v6585_v55  ;;  %v997_v36 = vand.u32 2147483647, %v6807_v46  ;;  %v671_v21 = vpop.f32.mrf.mxu0 }
 0x341   : > { %v4460_v33 = vpop.eup %4459  ;;  %v1759_v50 = vadd.f32 1.0, %v1631_v63  ;;  %v2015_v16 = vmul.f32 %v4452_v1, %v1887_v3  ;;  %vm1502_vm3 = vcmp.ge.f32.partialorder %v7710_v13, 0.0  ;;  %4471 = vpow2.f32 %v1343_v18 }
 0x342   : > { %v1347_v24 = vmul.f32 1.442695, %v1124_v51  ;;  %v4462_v29 = vpop.eup %4461  ;;  %v3006_v45 = vadd.f32 %v3005_v9, %v2902_v62  ;;  %v2271_v34 = vmul.f32 %v4452_v1, %v1631_v63  ;;  %v1630_v8 = vmul.f32 2.0, %v4456_v5 }
 0x343   : > { %v1886_v53 = vadd.f32 2.0, %v4456_v5  ;;  %v6825_v28 = vmul.f32 %v4458_v42, %v2649_v0  ;;  %v2652_v55 = vmul.f32 %v6769_v57, %v6608_v22  ;;  %4473 = vrcp.f32 %v2525_v47 }
 0x344   : > { %v999_v40 = vand.u32 2147483647, %v6817_v27  ;;  %v4464_v6 = vpop.eup %4463  ;;  %v6830_v43 = vmax.f32 %v3263_v19, %v2904_v17  ;;  %v3080_v54 = vadd.f32 %v3079_v7, %v2904_v17  ;;  %v6832_v49 = vmul.f32 %v4460_v33, %v2651_v11  ;;  %v864_v7 = vpop.f32.mrf.mxu1 }
 0x345   : > { %v1125_v4 = vsub.f32 0.0, %v997_v36  ;;  %v6834_v9 = vmul.f32 %v4462_v29, %v2650_v31  ;;  %v2143_v59 = vsel %vm1503_vm2, %v1759_v50, %v2015_v16  ;;  %4475 = vpow2.f32 %v1347_v24 }
 0x346   : > { %v6839_v1 = vadd.f32 %v671_v21, %v5153_v48  ;;  %v4466_v22 = vpop.eup %4465  ;;  %v2399_v57 = vsel %vm1503_vm2, %v2271_v34, 2.0  ;;  %v1758_v12 = vadd.f32 1.0, %v1630_v8  ;;  %v2014_v19 = vmul.f32 %v4456_v5, %v1886_v53 }
 0x347   : > { %v2270_v37 = vmul.f32 %v4456_v5, %v1630_v8  ;;  %vm1504_vm4 = vcmp.ge.f32.partialorder %v6721_v14, 0.0  ;;  %v3154_v62 = vmax.f32 %v6800_v23, %v6825_v28  ;;  %v1632_v0 = vmul.f32 2.0, %v4464_v6 }
 0x348   : > { %v1888_v58 = vadd.f32 2.0, %v4464_v6  ;;  %v1127_v15 = vsub.f32 0.0, %v999_v40  ;;  %v6847_v2 = vadd.f32 %v2969_v38, %v6825_v28  ;;  %v3228_v39 = vmax.f32 %v6810_v30, %v6832_v49 }
 0x349   : > { %v6852_v63 = vadd.f32 %v3043_v20, %v6832_v49  ;;  %v1349_v3 = vmul.f32 1.442695, %v1125_v4  ;;  %v4468_v18 = vpop.eup %4467  ;;  %v6854_v51 = vmul.f32 %v4466_v22, %v2652_v55  ;;  %v2653_v11 = vmul.f32 %v6804_v32, %v6639_v56  ;;  %v673_v32 = vpop.f32.mrf.mxu0 }
 0x34a   : > { %v2527_v5 = vadd.f32 %v2399_v57, %v2143_v59  ;;  %v6859_v47 = vadd.f32 %v864_v7, %v5160_v52  ;;  %v3191_v38 = vmax.f32 %v6819_v26, %v6834_v9  ;;  %v2142_v42 = vsel %vm1502_vm3, %v1758_v12, %v2014_v19 }
 0x34b   : > { %v2398_v20 = vsel %vm1502_vm3, %v2270_v37, 2.0  ;;  %v998_v17 = vand.u32 2147483647, %v6839_v1  ;;  %v1760_v31 = vadd.f32 1.0, %v1632_v0  ;;  %v2016_v36 = vmul.f32 %v4464_v6, %v1888_v58 }
 0x34c   : > { %v2272_v33 = vmul.f32 %v4464_v6, %v1632_v0  ;;  %vm1505_vm5 = vcmp.ge.f32.partialorder %v6738_v10, 0.0  ;;  %v1353_v56 = vmul.f32 1.442695, %v1127_v15  ;;  %v4470_v50 = vpop.eup %4469  ;;  %v6870_v16 = vadd.f32 %v3006_v45, %v6834_v9 }
 0x34d   : > { %v1633_v24 = vmul.f32 2.0, %v4468_v18  ;;  %v1889_v29 = vadd.f32 2.0, %v4468_v18  ;;  %4477 = vpow2.f32 %v1349_v3  ;;  %v3265_v34 = vmax.f32 %v6830_v43, %v6854_v51 }
 0x34e   : > { %4479 = vrcp.f32 %v2527_v5  ;;  %v2526_v8 = vadd.f32 %v2398_v20, %v2142_v42  ;;  %v1000_v53 = vand.u32 2147483647, %v6859_v47  ;;  %v4472_v21 = vpop.eup %4471  ;;  %v6876_v55 = vadd.f32 %v3080_v54, %v6854_v51 }
 0x34f   : > { %v6879_v40 = vmul.f32 %v2143_v59, %v6677_v25  ;;  %v1126_v6 = vsub.f32 0.0, %v998_v17  ;;  %v6882_v45 = vadd.f32 %v673_v32, %v5140_v41  ;;  %v2144_v4 = vsel %vm1504_vm4, %v1760_v31, %v2016_v36  ;;  %v866_v59 = vpop.f32.mrf.mxu1 }
 0x350   : > { %v2400_v22 = vsel %vm1504_vm4, %v2272_v33, 2.0  ;;  %vm1507_vm6 = vcmp.ge.f32.partialorder %v6753_v60, 0.0  ;;  %v1635_v57 = vmul.f32 2.0, %v4470_v50  ;;  %4481 = vpow2.f32 %v1353_v56  ;;  %v4474_v12 = vpop.eup %4473  ;;  %v675_v56 = vpop.f32.mrf.mxu0 }
 0x351   : > { %v1761_v54 = vadd.f32 1.0, %v1633_v24  ;;  %v2017_v19 = vmul.f32 %v4468_v18, %v1889_v29  ;;  %v2273_v37 = vmul.f32 %v4468_v18, %v1633_v24  ;;  %v1891_v25 = vadd.f32 2.0, %v4470_v50 }
 0x352   : > { %vm1506_vm7 = vcmp.ge.f32.partialorder %v6764_v61, 0.0  ;;  %v6891_v7 = vmul.f32 %v2142_v42, %v7710_v13  ;;  %4483 = vrcp.f32 %v2526_v8  ;;  %v1634_v0 = vmul.f32 2.0, %v4472_v21  ;;  %v4476_v15 = vpop.eup %4475 }
 0x353   : > { %v1128_v58 = vsub.f32 0.0, %v1000_v53  ;;  %v2528_v3 = vadd.f32 %v2400_v22, %v2144_v4  ;;  %v6894_v5 = vmul.f32 %v2144_v4, %v6721_v14  ;;  %v1890_v20 = vadd.f32 2.0, %v4472_v21 }
 0x354   : > { %v1001_v17 = vand.u32 2147483647, %v6882_v45  ;;  %v2909_v31 = vmul.f32 %v4474_v12, %v2653_v11  ;;  %v1763_v18 = vadd.f32 1.0, %v1635_v57  ;;  %v2275_v36 = vmul.f32 %v4470_v50, %v1635_v57 }
 0x355   : > { %v6898_v33 = vadd.f32 %v866_v59, %v5145_v44  ;;  %v2145_v13 = vsel %vm1505_vm5, %v1761_v54, %v2017_v19  ;;  %v2401_v42 = vsel %vm1505_vm5, %v2273_v37, 2.0  ;;  %v2019_v32 = vmul.f32 %v4470_v50, %v1891_v25  ;;  %v679_v19 = vpop.f32.mrf.mxu0 }
 0x356   : > { %vm1508_vm8 = vcmp.ge.f32.partialorder %v6777_v35, 0.0  ;;  %v1351_v14 = vmul.f32 1.442695, %v1126_v6  ;;  %v2274_v24 = vmul.f32 %v4472_v21, %v1634_v0  ;;  %v1636_v29 = vmul.f32 2.0, %v4476_v15  ;;  %v868_v6 = vpop.f32.mrf.mxu1 }
 0x357   : > { %v1892_v8 = vadd.f32 2.0, %v4476_v15  ;;  %v1355_v11 = vmul.f32 1.442695, %v1128_v58  ;;  %4485 = vrcp.f32 %v2528_v3  ;;  %v1762_v53 = vadd.f32 1.0, %v1634_v0 }
 0x358   : > { %v2018_v4 = vmul.f32 %v4472_v21, %v1890_v20  ;;  %v1129_v22 = vsub.f32 0.0, %v1001_v17  ;;  %v6908_v57 = vmax.f32 %v3154_v62, %v2909_v31  ;;  %v6911_v12 = vadd.f32 %v6847_v2, %v2909_v31 }
 0x359   : > { %v2529_v50 = vadd.f32 %v2401_v42, %v2145_v13  ;;  %v1003_v54 = vand.u32 2147483647, %v6898_v33  ;;  %v2147_v37 = vsel %vm1507_vm6, %v1763_v18, %v2019_v32  ;;  %v2403_v21 = vsel %vm1507_vm6, %v2275_v36, 2.0  ;;  %v872_v36 = vpop.f32.mrf.mxu1 }
 0x35a   : > { %4487 = vpow2.f32 %v1351_v14  ;;  %v6919_v25 = vadd.f32 %v675_v56, %v5153_v48  ;;  %v4478_v23 = vpop.eup %4477  ;;  %v2402_v28 = vsel %vm1506_vm7, %v2274_v24, 2.0  ;;  %v1764_v62 = vadd.f32 1.0, %v1636_v29 }
 0x35b   : > { %v2020_v2 = vmul.f32 %v4476_v15, %v1892_v8  ;;  %4489 = vpow2.f32 %v1355_v11  ;;  %v4480_v59 = vpop.eup %4479  ;;  %v2146_v0 = vsel %vm1506_vm7, %v1762_v53, %v2018_v4  ;;  %v2276_v58 = vmul.f32 %v4476_v15, %v1636_v29 }
 0x35c   : > { %v1357_v3 = vmul.f32 1.442695, %v1129_v22  ;;  %v6926_v20 = vadd.f32 %v679_v19, %v5140_v41  ;;  %v6929_v17 = vmul.f32 %v2145_v13, %v6738_v10  ;;  %4491 = vrcp.f32 %v2529_v50 }
 0x35d   : > { %v2531_v31 = vadd.f32 %v2403_v21, %v2147_v37  ;;  %vm1509_vm9 = vcmp.ge.f32.partialorder %v6807_v46, 0.0  ;;  %v1131_v18 = vsub.f32 0.0, %v1003_v54  ;;  %v4482_v56 = vpop.eup %4481  ;;  %v6933_v42 = vmul.f32 %v2147_v37, %v6753_v60  ;;  %v681_v37 = vpop.f32.mrf.mxu0 }
 0x35e   : > { %v1637_v32 = vmul.f32 2.0, %v4478_v23  ;;  %v1893_v14 = vadd.f32 2.0, %v4478_v23  ;;  %v1002_v15 = vand.u32 2147483647, %v6919_v25  ;;  %v2911_v24 = vmul.f32 %v4480_v59, %v6879_v40 }
 0x35f   : > { %v2530_v29 = vadd.f32 %v2402_v28, %v2146_v0  ;;  %v2148_v10 = vsel %vm1508_vm8, %v1764_v62, %v2020_v2  ;;  %v6940_v13 = vadd.f32 %v868_v6, %v5160_v52  ;;  %v4484_v8 = vpop.eup %4483  ;;  %v2404_v11 = vsel %vm1508_vm8, %v2276_v58, 2.0 }
 0x360   : > { %vm1511_vm10 = vcmp.ge.f32.partialorder %v6817_v27, 0.0  ;;  %4493 = vpow2.f32 %v1357_v3  ;;  %v1005_v60 = vand.u32 2147483647, %v6926_v20  ;;  %v6947_v53 = vadd.f32 %v872_v36, %v5145_v44 }
 0x361   : > { %4495 = vrcp.f32 %v2531_v31  ;;  %v1639_v40 = vmul.f32 2.0, %v4482_v56  ;;  %v1895_v4 = vadd.f32 2.0, %v4482_v56  ;;  %v1361_v22 = vmul.f32 1.442695, %v1131_v18 }
 0x362   : > { %v1765_v50 = vadd.f32 1.0, %v1637_v32  ;;  %v2021_v54 = vmul.f32 %v4478_v23, %v1893_v14  ;;  %v2277_v6 = vmul.f32 %v4478_v23, %v1637_v32  ;;  %v1130_v19 = vsub.f32 0.0, %v1002_v15 }
 0x363   : > { %v6950_v21 = vmul.f32 %v2146_v0, %v6764_v61  ;;  %4497 = vrcp.f32 %v2530_v29  ;;  %v2532_v28 = vadd.f32 %v2404_v11, %v2148_v10  ;;  %v1004_v62 = vand.u32 2147483647, %v6940_v13 }
 0x364   : > { %v6956_v2 = vmax.f32 %v3228_v39, %v2911_v24  ;;  %v2910_v59 = vmul.f32 %v4484_v8, %v6891_v7  ;;  %v1133_v58 = vsub.f32 0.0, %v1005_v60  ;;  %v1007_v3 = vand.u32 2147483647, %v6947_v53  ;;  %v4486_v23 = vpop.eup %4485 }
 0x365   : > { %v1767_v31 = vadd.f32 1.0, %v1639_v40  ;;  %v2023_v18 = vmul.f32 %v4482_v56, %v1895_v4  ;;  %4499 = vpow2.f32 %v1361_v22  ;;  %v6961_v61 = vadd.f32 %v681_v37, %v5153_v48 }
 0x366   : > { %v2149_v0 = vsel %vm1509_vm9, %v1765_v50, %v2021_v54  ;;  %v2405_v30 = vsel %vm1509_vm9, %v2277_v6, 2.0  ;;  %v2279_v49 = vmul.f32 %v4482_v56, %v1639_v40  ;;  %v1359_v39 = vmul.f32 1.442695, %v1130_v19  ;;  %v874_v19 = vpop.f32.mrf.mxu1 }
 0x367   : > { %v4488_v36 = vpop.eup %4487  ;;  %v6968_v7 = vadd.f32 %v6852_v63, %v2911_v24  ;;  %v6971_v32 = vmul.f32 %v2148_v10, %v6777_v35  ;;  %4501 = vrcp.f32 %v2532_v28  ;;  %v1132_v14 = vsub.f32 0.0, %v1004_v62 }
 0x368   : > { %v4490_v15 = vpop.eup %4489  ;;  %v6976_v29 = vmax.f32 %v3191_v38, %v2910_v59  ;;  %v2912_v8 = vmul.f32 %v4486_v23, %v6894_v5  ;;  %v1365_v11 = vmul.f32 1.442695, %v1133_v58  ;;  %v1135_v56 = vsub.f32 0.0, %v1007_v3  ;;  %v683_v38 = vpop.f32.mrf.mxu0 }
 0x369   : > { %v6980_v60 = vadd.f32 %v6870_v16, %v2910_v59  ;;  %v2533_v63 = vadd.f32 %v2405_v30, %v2149_v0  ;;  %v2151_v35 = vsel %vm1511_vm10, %v1767_v31, %v2023_v18  ;;  %v1006_v24 = vand.u32 2147483647, %v6961_v61  ;;  %v4492_v10 = vpop.eup %4491 }
 0x36a   : > { %v2407_v40 = vsel %vm1511_vm10, %v2279_v49, 2.0  ;;  %vm1510_vm11 = vcmp.ge.f32.partialorder %v6839_v1, 0.0  ;;  %v1638_v26 = vmul.f32 2.0, %v4488_v36  ;;  %v1894_v9 = vadd.f32 2.0, %v4488_v36 }
 0x36b   : > { %4503 = vpow2.f32 %v1359_v39  ;;  %v6989_v5 = vmul.f32 %v2149_v0, %v6807_v46  ;;  %v1640_v16 = vmul.f32 2.0, %v4490_v15  ;;  %v1896_v4 = vadd.f32 2.0, %v4490_v15 }
 0x36c   : > { %v1363_v22 = vmul.f32 1.442695, %v1132_v14  ;;  %v6994_v50 = vmax.f32 %v3265_v34, %v2912_v8  ;;  %v6997_v54 = vadd.f32 %v6876_v55, %v2912_v8  ;;  %4505 = vpow2.f32 %v1365_v11 }
 0x36d   : > { %v1369_v6 = vmul.f32 1.442695, %v1135_v56  ;;  %v4494_v37 = vpop.eup %4493  ;;  %v7000_v28 = vmul.f32 %v4492_v10, %v6929_v17  ;;  %v2535_v46 = vadd.f32 %v2407_v40, %v2151_v35  ;;  %v1134_v62 = vsub.f32 0.0, %v1006_v24 }
 0x36e   : > { %v7003_v59 = vadd.f32 %v683_v38, %v5140_v41  ;;  %v4496_v58 = vpop.eup %4495  ;;  %4507 = vrcp.f32 %v2533_v63  ;;  %v1766_v43 = vadd.f32 1.0, %v1638_v26  ;;  %v2022_v51 = vmul.f32 %v4488_v36, %v1894_v9 }
 0x36f   : > { %v2278_v34 = vmul.f32 %v4488_v36, %v1638_v26  ;;  %v1768_v3 = vadd.f32 1.0, %v1640_v16  ;;  %v2024_v55 = vmul.f32 %v4490_v15, %v1896_v4  ;;  %4509 = vpow2.f32 %v1363_v22 }
 0x370   : > { %v7006_v23 = vadd.f32 %v874_v19, %v5160_v52  ;;  %v4498_v31 = vpop.eup %4497  ;;  %v2280_v18 = vmul.f32 %v4490_v15, %v1640_v16  ;;  %v1641_v17 = vmul.f32 2.0, %v4494_v37  ;;  %v1897_v0 = vadd.f32 2.0, %v4494_v37 }
 0x371   : > { %4511 = vpow2.f32 %v1369_v6  ;;  %v7009_v30 = vmul.f32 %v2151_v35, %v6817_v27  ;;  %v1367_v49 = vmul.f32 1.442695, %v1134_v62  ;;  %v1009_v39 = vand.u32 2147483647, %v7003_v59 }
 0x372   : > { %4513 = vrcp.f32 %v2535_v46  ;;  %v4500_v14 = vpop.eup %4499  ;;  %v3156_v36 = vmax.f32 %v6908_v57, %v7000_v28  ;;  %v7015_v8 = vmul.f32 %v4496_v58, %v6933_v42  ;;  %vm1512_vm12 = vcmp.ge.f32.partialorder %v6859_v47, 0.0 }
 0x373   : > { %vm1513_vm13 = vcmp.ge.f32.partialorder %v6882_v45, 0.0  ;;  %v7020_v15 = vmul.f32 %v4498_v31, %v6950_v21  ;;  %v2150_v27 = vsel %vm1510_vm11, %v1766_v43, %v2022_v51  ;;  %v2406_v11 = vsel %vm1510_vm11, %v2278_v34, 2.0 }
 0x374   : > { %v1008_v56 = vand.u32 2147483647, %v7006_v23  ;;  %v4502_v63 = vpop.eup %4501  ;;  %v7027_v35 = vsel %vm1512_vm12, %v1768_v3, %v2024_v55  ;;  %v2408_v42 = vsel %vm1512_vm12, %v2280_v18, 2.0  ;;  %v1769_v24 = vadd.f32 1.0, %v1641_v17 }
 0x375   : > { %v2025_v10 = vmul.f32 %v4494_v37, %v1897_v0  ;;  %v1643_v40 = vmul.f32 2.0, %v4500_v14  ;;  %v1899_v26 = vadd.f32 2.0, %v4500_v14  ;;  %4515 = vpow2.f32 %v1367_v49 }
 0x376   : > { %v1137_v9 = vsub.f32 0.0, %v1009_v39  ;;  %v7031_v21 = vadd.f32 %v6911_v12, %v7000_v28  ;;  %v2281_v16 = vmul.f32 %v4494_v37, %v1641_v17  ;;  %vm1515_vm14 = vcmp.ge.f32.partialorder %v6898_v33, 0.0 }
 0x377   : > { %v7038_v22 = vadd.f32 %v6968_v7, %v7015_v8  ;;  %v7041_v6 = vmul.f32 %v4502_v63, %v6971_v32  ;;  %v2534_v19 = vadd.f32 %v2406_v11, %v2150_v27  ;;  %v1136_v46 = vsub.f32 0.0, %v1008_v56 }
 0x378   : > { %v4504_v4 = vpop.eup %4503  ;;  %v7047_v62 = vadd.f32 %v6980_v60, %v7020_v15  ;;  %v7050_v37 = vmul.f32 %v2150_v27, %v6839_v1  ;;  %v2536_v58 = vadd.f32 %v2408_v42, %v7027_v35  ;;  %v7055_v7 = vsel %vm1513_vm13, %v1769_v24, %v2025_v10  ;;  %v876_v1 = vpop.f32.mrf.mxu1 }
 0x379   : > { %v4506_v43 = vpop.eup %4505  ;;  %v1771_v32 = vadd.f32 1.0, %v1643_v40  ;;  %v2027_v51 = vmul.f32 %v4500_v14, %v1899_v26  ;;  %vm1514_vm15 = vcmp.ge.f32.partialorder %v6919_v25, 0.0  ;;  %v1373_v34 = vmul.f32 1.442695, %v1137_v9 }
 0x37a   : > { %v2409_v3 = vsel %vm1513_vm13, %v2281_v16, 2.0  ;;  %v2283_v60 = vmul.f32 %v4500_v14, %v1643_v40  ;;  %v1642_v55 = vmul.f32 2.0, %v4504_v4  ;;  %v1898_v31 = vadd.f32 2.0, %v4504_v4  ;;  %v685_v14 = vpop.f32.mrf.mxu0 }
 0x37b   : > { %v4508_v18 = vpop.eup %4507  ;;  %v7064_v0 = vadd.f32 %v6997_v54, %v7041_v6  ;;  %4517 = vrcp.f32 %v2534_v19  ;;  %v1371_v49 = vmul.f32 1.442695, %v1136_v46  ;;  %vm1517_vm1 = vcmp.ge.f32.partialorder %v6926_v20, 0.0 }
 0x37c   : > { %v4510_v39 = vpop.eup %4509  ;;  %4519 = vrcp.f32 %v2536_v58  ;;  %v1645_v27 = vmul.f32 2.0, %v4506_v43  ;;  %v1901_v11 = vadd.f32 2.0, %v4506_v43  ;;  %v2537_v63 = vadd.f32 %v2409_v3, %v7055_v7  ;;  %v878_v58 = vpop.f32.mrf.mxu1 }
 0x37d   : > { %v7070_v42 = vsel %vm1515_vm14, %v1771_v32, %v2027_v51  ;;  %4521 = vpow2.f32 %v1373_v34  ;;  %v7073_v54 = vadd.f32 %v876_v1, %v5145_v44  ;;  %v2411_v10 = vsel %vm1515_vm14, %v2283_v60, 2.0 }
 0x37e   : > { %v4512_v56 = vpop.eup %4511  ;;  %v1770_v40 = vadd.f32 1.0, %v1642_v55  ;;  %v2026_v26 = vmul.f32 %v4504_v4, %v1898_v31  ;;  %v2282_v9 = vmul.f32 %v4504_v4, %v1642_v55  ;;  %vm1516_vm2 = vcmp.ge.f32.partialorder %v6940_v13, 0.0  ;;  %v882_v57 = vpop.f32.mrf.mxu1 }
 0x37f   : > { %v4514_v24 = vpop.eup %4513  ;;  %v1644_v16 = vmul.f32 2.0, %v4510_v39  ;;  %v1900_v19 = vadd.f32 2.0, %v4510_v39  ;;  %vm1519_vm3 = vcmp.ge.f32.partialorder %v6947_v53, 0.0  ;;  %4523 = vpow2.f32 %v1371_v49 }
 0x380   : > { %v7080_v46 = vadd.f32 %v685_v14, %v5153_v48  ;;  %v1773_v32 = vadd.f32 1.0, %v1645_v27  ;;  %v2029_v51 = vmul.f32 %v4506_v43, %v1901_v11  ;;  %v1647_v34 = vmul.f32 2.0, %v4512_v56 }
 0x381   : > { %v1903_v3 = vadd.f32 2.0, %v4512_v56  ;;  %v2917_v60 = vmul.f32 %v4508_v18, %v6989_v5  ;;  %v2919_v31 = vmul.f32 %v4514_v24, %v7009_v30  ;;  %4525 = vrcp.f32 %v2537_v63 }
 0x382   : > { %v2285_v4 = vmul.f32 %v4506_v43, %v1645_v27  ;;  %v4516_v55 = vpop.eup %4515  ;;  %v2539_v1 = vadd.f32 %v2411_v10, %v7070_v42  ;;  %v2410_v49 = vsel %vm1514_vm15, %v2282_v9, 2.0  ;;  %v1011_v14 = vand.u32 2147483647, %v7073_v54  ;;  %v689_v43 = vpop.f32.mrf.mxu0 }
 0x383   : > { %v7089_v17 = vadd.f32 %v878_v58, %v5160_v52  ;;  %v7093_v11 = vsel %vm1514_vm15, %v1770_v40, %v2026_v26  ;;  %v1772_v5 = vadd.f32 1.0, %v1644_v16  ;;  %v2028_v18 = vmul.f32 %v4510_v39, %v1900_v19 }
 0x384   : > { %v1010_v30 = vand.u32 2147483647, %v7080_v46  ;;  %v2284_v27 = vmul.f32 %v4510_v39, %v1644_v16  ;;  %v7098_v63 = vsel %vm1517_vm1, %v1773_v32, %v2029_v51  ;;  %v1775_v24 = vadd.f32 1.0, %v1647_v34 }
 0x385   : > { %7711 = vst [vmem:[#allocation21_spill] sm:$0xff] %v7089_v17  ;;  %v2031_v10 = vmul.f32 %v4512_v56, %v1903_v3  ;;  %vm1518_vm4 = vcmp.ge.f32.partialorder %v6961_v61, 0.0  ;;  %v2413_v9 = vsel %vm1517_vm1, %v2285_v4, 2.0  ;;  %v2287_v58 = vmul.f32 %v4512_v56, %v1647_v34 }
 0x386   : > { %v1646_v40 = vmul.f32 2.0, %v4516_v55  ;;  %v1902_v26 = vadd.f32 2.0, %v4516_v55  ;;  %v2538_v19 = vadd.f32 %v2410_v49, %v7093_v11  ;;  %v1139_v12 = vsub.f32 0.0, %v1011_v14 }
 0x387   : > { %v1012_v38 = vand.u32 2147483647, %v7089_v17  ;;  %v7106_v39 = vadd.f32 %v689_v43, %v5140_v41  ;;  %v7111_v16 = vmax.f32 %v3156_v36, %v2917_v60  ;;  %v7114_v32 = vadd.f32 %v7031_v21, %v2917_v60 }
 0x388   : > { %4527 = vrcp.f32 %v2539_v1  ;;  %v1138_v56 = vsub.f32 0.0, %v1010_v30  ;;  %v4518_v51 = vpop.eup %4517  ;;  %v2156_v34 = vsel %vm1516_vm2, %v1772_v5, %v2028_v18  ;;  %v2412_v3 = vsel %vm1516_vm2, %v2284_v27, 2.0 }
 0x389   : > { %v2541_v4 = vadd.f32 %v2413_v9, %v7098_v63  ;;  %v7123_v49 = vsel %vm1519_vm3, %v1775_v24, %v2031_v10  ;;  %v4520_v28 = vpop.eup %4519  ;;  %v2415_v36 = vsel %vm1519_vm3, %v2287_v58, 2.0  ;;  %v1774_v21 = vadd.f32 1.0, %v1646_v40 }
 0x38a   : > { %v2030_v60 = vmul.f32 %v4516_v55, %v1902_v26  ;;  %v2286_v1 = vmul.f32 %v4516_v55, %v1646_v40  ;;  %v4522_v14 = vpop.eup %4521  ;;  %4529 = vrcp.f32 %v2538_v19  ;;  %v1377_v5 = vmul.f32 1.442695, %v1139_v12 }
 0x38b   : > { %v1140_v18 = vsub.f32 0.0, %v1012_v38  ;;  %v1013_v30 = vand.u32 2147483647, %v7106_v39  ;;  %v7712_v43 = vmax.f32 %v6956_v2, %v7015_v8  ;;  %v2918_v24 = vmul.f32 %v4518_v51, %v7050_v37 }
 0x38c   : > { %v1375_v10 = vmul.f32 1.442695, %v1138_v56  ;;  %v7135_v9 = vadd.f32 %v882_v57, %v5145_v44  ;;  %v4524_v58 = vpop.eup %4523  ;;  %v7138_v55 = vadd.f32 %v7038_v22, %v2919_v31  ;;  %v2664_v38 = vmul.f32 %v7027_v35, %v6859_v47  ;;  %v691_v56 = vpop.f32.mrf.mxu0 }
 0x38d   : > { %v7131_v27 = vmax.f32 %v7712_v43, %v2919_v31  ;;  %v2540_v12 = vadd.f32 %v2412_v3, %v2156_v34  ;;  %v2543_v40 = vadd.f32 %v2415_v36, %v7123_v49  ;;  %4531 = vrcp.f32 %v2541_v4 }
 0x38e   : > { %v7145_v2 = vsel %vm1518_vm4, %v1774_v21, %v2030_v60  ;;  %v2414_v8 = vsel %vm1518_vm4, %v2286_v1, 2.0  ;;  %v1649_v37 = vmul.f32 2.0, %v4522_v14  ;;  %v4526_v26 = vpop.eup %4525  ;;  %v1905_v19 = vadd.f32 2.0, %v4522_v14 }
 0x38f   : > { %4533 = vpow2.f32 %v1377_v5  ;;  %v1379_v22 = vmul.f32 1.442695, %v1140_v18  ;;  %v1141_v31 = vsub.f32 0.0, %v1013_v30  ;;  %v7713_v47 = vmax.f32 %v6976_v29, %v7020_v15 }
 0x390   : > { %vm1520_vm5 = vcmp.ge.f32.partialorder %v7006_v23, 0.0  ;;  %vm1521_vm6 = vcmp.ge.f32.partialorder %v7003_v59, 0.0  ;;  %4535 = vpow2.f32 %v1375_v10  ;;  %v1015_v51 = vand.u32 2147483647, %v7135_v9 }
 0x391   : > { %v7152_v35 = vmax.f32 %v7713_v47, %v2918_v24  ;;  %v2920_v3 = vmul.f32 %v4520_v28, %v2664_v38  ;;  %4537 = vrcp.f32 %v2540_v12  ;;  %v1648_v4 = vmul.f32 2.0, %v4524_v58 }
 0x392   : > { %v1904_v57 = vadd.f32 2.0, %v4524_v58  ;;  %4539 = vrcp.f32 %v2543_v40  ;;  %v2542_v36 = vadd.f32 %v2414_v8, %v7145_v2  ;;  %v1777_v21 = vadd.f32 1.0, %v1649_v37 }
 0x393   : > { %v7159_v60 = vadd.f32 %v691_v56, %v5153_v48  ;;  %v2033_v29 = vmul.f32 %v4522_v14, %v1905_v19  ;;  %v2289_v15 = vmul.f32 %v4522_v14, %v1649_v37  ;;  %4541 = vpow2.f32 %v1379_v22  ;;  %v4078_v19 = vld [vmem:[#allocation12 + $0xb8] sm:$0xff]   ;;  %v4079_v22 = vld [vmem:[#allocation12 + $0x70] sm:$0xff]  }
 0x394   : > { %v1381_v1 = vmul.f32 1.442695, %v1141_v31  ;;  %v7162_v5 = vadd.f32 %v7047_v62, %v2918_v24  ;;  %v2665_v28 = vmul.f32 %v7055_v7, %v6882_v45  ;;  %v2667_v18 = vmul.f32 %v7070_v42, %v6898_v33  ;;  %v884_v45 = vpop.f32.mrf.mxu1  ;;  %v4075_v24 = vld [vmem:[#allocation12 + $0x78] sm:$0xff]  }
 0x395   : > { %v1143_v30 = vsub.f32 0.0, %v1015_v51  ;;  %v4528_v43 = vpop.eup %4527  ;;  %v2666_v10 = vmul.f32 %v7093_v11, %v6919_v25  ;;  %v1776_v38 = vadd.f32 1.0, %v1648_v4  ;;  %v2032_v12 = vmul.f32 %v4524_v58, %v1904_v57  ;;  %v693_v11 = vpop.f32.mrf.mxu0  ;;  %3919 = vmatprep.subr.bf16.mxu0 %v4075_v24  ;;  %v4081_v51 = vld [vmem:[#allocation12 + $0xf0] sm:$0xff]   ;;  %v4087_v24 = vld [vmem:[#allocation12 + $0x60] sm:$0xff]  }
 0x396   : > { %v2288_v40 = vmul.f32 %v4524_v58, %v1648_v4  ;;  %v7170_v14 = vmul.f32 %v4526_v26, %v2665_v28  ;;  %v7173_v8 = vmul.f32 %v2156_v34, %v6940_v13  ;;  %4543 = vrcp.f32 %v2542_v36  ;;  %v4076_v13 = vld [vmem:[#allocation12 + $0x38] sm:$0xff]  }
 0x397   : > { %v1014_v62 = vand.u32 2147483647, %v7159_v60  ;;  %v7714_v33 = vmax.f32 %v6994_v50, %v7041_v6  ;;  %v2161_v25 = vsel %vm1521_vm6, %v1777_v21, %v2033_v29  ;;  %v2417_v42 = vsel %vm1521_vm6, %v2289_v15, 2.0  ;;  %v4530_v34 = vpop.eup %4529  ;;  %v4077_v26 = vld [vmem:[#allocation12 + $0xf8] sm:$0xff]   ;;  %3920 = vmatpush3.bf16.msra.mxu0 %v4076_v13  ;;  %v4083_v15 = vld [vmem:[#allocation12 + $0x68] sm:$0xff]  }
 0x398   : > { %4545 = vpow2.f32 %v1381_v1  ;;  %v7186_v58 = vadd.f32 %v7064_v0, %v2920_v3  ;;  %v7188_v37 = vmul.f32 %v4528_v43, %v2667_v18  ;;  %v2669_v50 = vmul.f32 %v7098_v63, %v6926_v20  ;;  %3941 = vmatprep.subr.bf16.mxu1 %v4077_v26  ;;  %3921 = vmatprep.subr.bf16.mxu0 %v4079_v22 }
 0x399   : > { %v7179_v7 = vmax.f32 %v7714_v33, %v2920_v3  ;;  %v1385_v6 = vmul.f32 1.442695, %v1143_v30  ;;  %v7194_v31 = vmul.f32 %v7123_v49, %v6947_v53  ;;  %v2160_v56 = vsel %vm1520_vm5, %v1776_v38, %v2032_v12  ;;  %v886_v53 = vpop.f32.mrf.mxu1  ;;  %v4080_v49 = vld [vmem:[#allocation12 + $0x30] sm:$0xff]   ;;  %3942 = vmatpush3.bf16.msra.mxu1 %v4078_v19  ;;  %v4085_v30 = vld [vmem:[#allocation12 + $0xe8] sm:$0xff]  }
 0x39a   : > { %7716 = vst [vmem:[#allocation20_spill] sm:$0xff] %v7186_v58  ;;  %v2416_v0 = vsel %vm1520_vm5, %v2288_v40, 2.0  ;;  %v7201_v47 = vadd.f32 %v884_v45, %v5160_v52  ;;  %v3158_v20 = vmax.f32 %v7111_v16, %v7170_v14  ;;  %v2545_v63 = vadd.f32 %v2417_v42, %v2161_v25  ;;  %v4532_v57 = vpop.eup %4531  ;;  %v4082_v16 = vld [vmem:[#allocation12 + $0xb0] sm:$0xff]   ;;  %3943 = vmatprep.subr.bf16.mxu1 %v4081_v51 }
 0x39b   : > { %7715 = vst [vmem:[#allocation22_spill] sm:$0xff] %v7179_v7  ;;  %v1142_v3 = vsub.f32 0.0, %v1014_v62  ;;  %v7206_v4 = vadd.f32 %v693_v11, %v5140_v41  ;;  %v7210_v36 = vadd.f32 %v7114_v32, %v7170_v14  ;;  %v7212_v21 = vmul.f32 %v4530_v34, %v2666_v10  ;;  %v695_v62 = vpop.f32.mrf.mxu0  ;;  %3922 = vmatpush3.bf16.msra.mxu0 %v4080_v49  ;;  %v4086_v11 = vld [vmem:[#allocation12 + $0xa8] sm:$0xff]  }
 0x39c   : > { %v7216_v29 = vmul.f32 %v7145_v2, %v6961_v61  ;;  %v4534_v1 = vpop.eup %4533  ;;  %v3232_v28 = vmax.f32 %v7131_v27, %v7188_v37  ;;  %v7222_v18 = vadd.f32 %v7138_v55, %v7188_v37  ;;  %v2544_v32 = vadd.f32 %v2416_v0, %v2160_v56  ;;  %3923 = vmatprep.subr.bf16.mxu0 %v4083_v15  ;;  %v4091_v15 = vld [vmem:[#allocation12 + $0x58] sm:$0xff]  }
 0x39d   : > { %4547 = vpow2.f32 %v1385_v6  ;;  %v4536_v43 = vpop.eup %4535  ;;  %v7225_v61 = vmul.f32 %v2160_v56, %v7006_v23  ;;  %v7228_v2 = vmul.f32 %v2161_v25, %v7003_v59  ;;  %v1016_v10 = vand.u32 2147483647, %v7201_v47  ;;  %v4084_v23 = vld [vmem:[#allocation12 + $0x28] sm:$0xff]   ;;  %3944 = vmatpush3.bf16.msra.mxu1 %v4082_v16  ;;  %v4089_v6 = vld [vmem:[#allocation12 + $0xe0] sm:$0xff]   ;;  %v4094_v37 = vld [vmem:[#allocation12 + $0x98] sm:$0xff]  }
 0x39e   : > { %v7232_v38 = vadd.f32 %v886_v53, %v5145_v44  ;;  %v4538_v12 = vpop.eup %4537  ;;  %v2925_v40 = vmul.f32 %v4532_v57, %v2669_v50  ;;  %4549 = vrcp.f32 %v2545_v63  ;;  %vm1523_vm7 = vcmp.ge.f32.partialorder %v7073_v54, 0.0  ;;  %3945 = vmatprep.subr.bf16.mxu1 %v4085_v30  ;;  %v4088_v63 = vld [vmem:[#allocation12 + $0x20] sm:$0xff]  }
 0x39f   : > { %v1383_v55 = vmul.f32 1.442695, %v1142_v3  ;;  %v1017_v14 = vand.u32 2147483647, %v7206_v4  ;;  %v4540_v45 = vpop.eup %4539  ;;  %v3195_v59 = vmax.f32 %v7152_v35, %v7212_v21  ;;  %v7240_v33 = vadd.f32 %v7162_v5, %v7212_v21  ;;  %3924 = vmatpush3.bf16.msra.mxu0 %v4084_v23  ;;  %v4090_v16 = vld [vmem:[#allocation12 + $0xa0] sm:$0xff]   ;;  %v4098_v35 = vld [vmem:[#allocation12 + $0x90] sm:$0xff]  }
 0x3a0   : > { %v1651_v25 = vmul.f32 2.0, %v4534_v1  ;;  %v1907_v42 = vadd.f32 2.0, %v4534_v1  ;;  %v4542_v13 = vpop.eup %4541  ;;  %4551 = vrcp.f32 %v2544_v32  ;;  %vm1522_vm8 = vcmp.ge.f32.partialorder %v7080_v46, 0.0  ;;  %3925 = vmatprep.subr.bf16.mxu0 %v4087_v24  ;;  %v4092_v24 = vld [vmem:[#allocation12 + $0x18] sm:$0xff]   ;;  %v4099_v21 = vld [vmem:[#allocation12 + $0x48] sm:$0xff]  }
 0x3a1   : > { %v1650_v34 = vmul.f32 2.0, %v4536_v43  ;;  %v1906_v50 = vadd.f32 2.0, %v4536_v43  ;;  %v7244_v26 = vmul.f32 %v4538_v12, %v7173_v8  ;;  %v1144_v19 = vsub.f32 0.0, %v1016_v10  ;;  %3946 = vmatpush3.bf16.msra.mxu1 %v4086_v11  ;;  %v7256_v12 = vpop.f32.mrf.mxu1 }
 0x3a2   : > { %v1019_v5 = vand.u32 2147483647, %v7232_v38  ;;  %v7248_v22 = vadd.f32 %v695_v62, %v5153_v48  ;;  %v7250_v56 = vmax.f32 %v3158_v20, %v2925_v40  ;;  %v2927_v0 = vmul.f32 %v4540_v45, %v7194_v31  ;;  %3947 = vmatprep.subr.bf16.mxu1 %v4089_v6 }
 0x3a3   : > { %7717 = vst [vmem:[#allocation23_spill] sm:$0xff] %v7244_v26  ;;  %4553 = vpow2.f32 %v1383_v55  ;;  %v1145_v51 = vsub.f32 0.0, %v1017_v14  ;;  %v4544_v3 = vpop.eup %4543  ;;  %v1779_v53 = vadd.f32 1.0, %v1651_v25  ;;  %v2035_v49 = vmul.f32 %v4534_v1, %v1907_v42  ;;  %v699_v55 = vpop.f32.mrf.mxu0  ;;  %v4093_v14 = vld [vmem:[#allocation12 + $0xd8] sm:$0xff]   ;;  %3926 = vmatpush3.bf16.msra.mxu0 %v4088_v63 }
 0x3a4   : > { %v2291_v57 = vmul.f32 %v4534_v1, %v1651_v25  ;;  %vm1524_vm9 = vcmp.ge.f32.partialorder %v7089_v17, 0.0  ;;  %v1652_v8 = vmul.f32 2.0, %v4542_v13  ;;  %v1778_v20 = vadd.f32 1.0, %v1650_v34  ;;  %3927 = vmatprep.subr.bf16.mxu0 %v4091_v15 }
 0x3a5   : > { %v7254_v32 = vpop.eup %4545  ;;  %v2034_v30 = vmul.f32 %v4536_v43, %v1906_v50  ;;  %v2290_v31 = vmul.f32 %v4536_v43, %v1650_v34  ;;  %v1908_v10 = vadd.f32 2.0, %v4542_v13  ;;  %v7259_v1 = vadd.f32 %v7210_v36, %v2925_v40  ;;  %3948 = vmatpush3.bf16.msra.mxu1 %v4090_v16 }
 0x3a6   : > { %v1387_v62 = vmul.f32 1.442695, %v1144_v19  ;;  %v1147_v23 = vsub.f32 0.0, %v1019_v5  ;;  %v1018_v45 = vand.u32 2147483647, %v7248_v22  ;;  %v7265_v25 = vmax.f32 %v3232_v28, %v2927_v0  ;;  %v4095_v28 = vld [vmem:[#allocation12 + $0x50] sm:$0xff]   ;;  %v892_v19 = vpop.f32.mrf.mxu1  ;;  %v701_v5 = vpop.f32.mrf.mxu0  ;;  %3949 = vmatprep.subr.bf16.mxu1 %v4093_v14 }
 0x3a7   : > { %v7268_v43 = vadd.f32 %v7222_v18, %v2927_v0  ;;  %v7271_v42 = vmul.f32 %v4544_v3, %v7216_v29  ;;  %v1389_v11 = vmul.f32 1.442695, %v1145_v51  ;;  %v7275_v36 = vsel %vm1523_vm7, %v1779_v53, %v2035_v49  ;;  %v4097_v0 = vld [vmem:[#allocation12 + $0xd0] sm:$0xff]   ;;  %3928 = vmatpush3.bf16.msra.mxu0 %v4092_v24 }
 0x3a8   : > { %v2419_v40 = vsel %vm1523_vm7, %v2291_v57, 2.0  ;;  %v1780_v34 = vadd.f32 1.0, %v1652_v8  ;;  %v1653_v27 = vmul.f32 2.0, %v7254_v32  ;;  %v7282_v29 = vsel %vm1522_vm8, %v1778_v20, %v2034_v30  ;;  %3929 = vmatprep.subr.bf16.mxu0 %v4095_v28  ;;  %v7310_v14 = vpop.f32.mrf.mxu1 }
 0x3a9   : > { %7718 = vst [vmem:[#allocation24_spill] sm:$0xff] %v7268_v43  ;;  %v2418_v18 = vsel %vm1522_vm8, %v2290_v31, 2.0  ;;  %v2036_v50 = vmul.f32 %v4542_v13, %v1908_v10  ;;  %v2292_v6 = vmul.f32 %v4542_v13, %v1652_v8  ;;  %4555 = vpow2.f32 %v1387_v62  ;;  %v4096_v8 = vld [vmem:[#allocation12 + $0x10] sm:$0xff]   ;;  %3950 = vmatpush3.bf16.msra.mxu1 %v4094_v37  ;;  %v4101_v62 = vld [vmem:[#allocation12 + $0xc8] sm:$0xff]  }
 0x3aa   : > { %v4548_v51 = vpop.eup %4547  ;;  %v1393_v63 = vmul.f32 1.442695, %v1147_v23  ;;  %v1146_v3 = vsub.f32 0.0, %v1018_v45  ;;  %v7287_v53 = vadd.f32 %v699_v55, %v5140_v41  ;;  %v7293_v49 = vmax.f32 %v3195_v59, %v7271_v42  ;;  %3951 = vmatprep.subr.bf16.mxu1 %v4097_v0  ;;  %v703_v0 = vpop.f32.mrf.mxu0 }
 0x3ab   : > { %v2547_v57 = vadd.f32 %v2419_v40, %v7275_v36  ;;  %v1909_v13 = vadd.f32 2.0, %v7254_v32  ;;  %4557 = vpow2.f32 %v1389_v11  ;;  %v4550_v16 = vpop.eup %4549  ;;  %v2546_v15 = vadd.f32 %v2418_v18, %v7282_v29  ;;  %3930 = vmatpush3.bf16.msra.mxu0 %v4096_v8  ;;  %v4100_v18 = vld [vmem:[#allocation12 + $0x8] sm:$0xff]  }
 0x3ac   : > { %vm1525_vm10 = vcmp.ge.f32.partialorder %v7106_v39, 0.0  ;;  %v2293_v20 = vmul.f32 %v7254_v32, %v1653_v27  ;;  %v7301_v30 = vadd.f32 %v701_v5, %v5153_v48  ;;  %v7305_v59 = vsel %vm1524_vm9, %v1780_v34, %v2036_v50  ;;  %3931 = vmatprep.subr.bf16.mxu0 %v4099_v21 }
 0x3ad   : > { %7719 = vst [vmem:[#allocation25_spill] sm:$0xff] %v7305_v59  ;;  %v2420_v31 = vsel %vm1524_vm9, %v2292_v6, 2.0  ;;  %vm1527_vm11 = vcmp.ge.f32.partialorder %v7135_v9, 0.0  ;;  %v1655_v10 = vmul.f32 2.0, %v4548_v51  ;;  %v1911_v55 = vadd.f32 2.0, %v4548_v51  ;;  %v4552_v23 = vpop.eup %4551  ;;  %3952 = vmatpush3.bf16.msra.mxu1 %v4098_v35 }
 0x3ae   : > { %4559 = vpow2.f32 %v1393_v63  ;;  %v1391_v45 = vmul.f32 1.442695, %v1146_v3  ;;  %v1021_v11 = vand.u32 2147483647, %v7287_v53  ;;  %v7314_v24 = vadd.f32 %v892_v19, %v5145_v44  ;;  %v896_v3 = vpop.f32.mrf.mxu1  ;;  %3953 = vmatprep.subr.bf16.mxu1 %v4101_v62  ;;  %v4106_v62 = vld [vmem:[#allocation12 + $0x80] sm:$0xff]  }
 0x3af   : > { %v7317_v40 = vmul.f32 %v4550_v16, %v7228_v2  ;;  %v1781_v34 = vadd.f32 1.0, %v1653_v27  ;;  %v2037_v37 = vmul.f32 %v7254_v32, %v1909_v13  ;;  %v7322_v28 = vadd.f32 %v7256_v12, %v5160_v52  ;;  %v4102_v2 = vld [vmem:[#allocation12 + $0x88] sm:$0xff]   ;;  %v4103_v27 = vld [vmem:[#allocation12 + $0x40] sm:$0xff]   ;;  %3932 = vmatpush3.bf16.msra.mxu0 %v4100_v18 }
 0x3b0   : > { %v4554_v50 = vpop.eup %4553  ;;  %4561 = vrcp.f32 %v2547_v57  ;;  %v2548_v6 = vadd.f32 %v2420_v31, %v7305_v59  ;;  %v2421_v19 = vsel %vm1525_vm10, %v2293_v20, 2.0  ;;  %v1149_v5 = vsub.f32 0.0, %v1021_v11  ;;  %v4105_v13 = vld [vmem:[#allocation12 + $0xc0] sm:$0xff]   ;;  %3933 = vmatprep.subr.bf16.mxu0 %v4103_v27 }
 0x3b1   : > { %4563 = vrcp.f32 %v2546_v15  ;;  %v1783_v32 = vadd.f32 1.0, %v1655_v10  ;;  %v2039_v63 = vmul.f32 %v4548_v51, %v1911_v55  ;;  %v1022_v12 = vand.u32 2147483647, %v7301_v30  ;;  %v4104_v31 = vld [vmem:[#allocation12] sm:$0xff]   ;;  %3954 = vmatpush3.bf16.msra.mxu1 %v4102_v2 }
 0x3b2   : > { %v2295_v57 = vmul.f32 %v4548_v51, %v1655_v10  ;;  %4565 = vpow2.f32 %v1391_v45  ;;  %v1397_v8 = vmul.f32 1.442695, %v1149_v5  ;;  %v1023_v16 = vand.u32 2147483647, %v7314_v24  ;;  %3955 = vmatprep.subr.bf16.mxu1 %v4105_v13 }
 0x3b3   : > { %v7331_v20 = vsel %vm1525_vm10, %v1781_v34, %v2037_v37  ;;  %v1654_v35 = vmul.f32 2.0, %v4554_v50  ;;  %v1150_v21 = vsub.f32 0.0, %v1022_v12  ;;  %v7334_v15 = vadd.f32 %v703_v0, %v5140_v41  ;;  %v705_v37 = vpop.f32.mrf.mxu0  ;;  %3934 = vmatpush3.bf16.msra.mxu0 %v4104_v31 }
 0x3b4   : > { %v7338_v55 = vadd.f32 %v7240_v33, %v7271_v42  ;;  %vm1526_vm12 = vcmp.ge.f32.partialorder %v7159_v60, 0.0  ;;  %v1020_v51 = vand.u32 2147483647, %v7322_v28  ;;  %4567 = vpow2.f32 %v1397_v8 }
 0x3b5   : > { %v7343_v10 = vadd.f32 %v896_v3, %v5145_v44  ;;  %4569 = vrcp.f32 %v2548_v6  ;;  %v1910_v41 = vadd.f32 2.0, %v4554_v50  ;;  %v1399_v45 = vmul.f32 1.442695, %v1150_v21  ;;  %3956 = vmatpush3.bf16.msra.mxu1 %v4106_v62 }
 0x3b6   : > { %v1025_v11 = vand.u32 2147483647, %v7334_v15  ;;  %v2549_v33 = vadd.f32 %v2421_v19, %v7331_v20  ;;  %v7349_v42 = vsel %vm1527_vm11, %v1783_v32, %v2039_v63  ;;  %v2423_v34 = vsel %vm1527_vm11, %v2295_v57, 2.0  ;;  %v7353_v18 = vpop.eup %4555 }
 0x3b7   : > { %v1151_v44 = vsub.f32 0.0, %v1023_v16  ;;  %v7356_v6 = vmul.f32 %v4552_v23, %v7225_v61  ;;  %v1782_v0 = vadd.f32 1.0, %v1654_v35  ;;  %4571 = vpow2.f32 %v1399_v45 }
 0x3b8   : > { %v4558_v19 = vpop.eup %4557  ;;  %v1148_v2 = vsub.f32 0.0, %v1020_v51  ;;  %v7362_v27 = vadd.f32 %v7310_v14, %v5160_v52  ;;  %v1153_v32 = vsub.f32 0.0, %v1025_v11  ;;  %v1027_v63 = vand.u32 2147483647, %v7343_v10 }
 0x3b9   : > { %7720 = vst [vmem:[#allocation26_spill] sm:$0xff] %v7356_v6  ;;  %v2551_v12 = vadd.f32 %v2423_v34, %v7349_v42  ;;  %v2038_v61 = vmul.f32 %v4554_v50, %v1910_v41  ;;  %v2294_v23 = vmul.f32 %v4554_v50, %v1654_v35  ;;  %v7367_v3 = vadd.f32 %v705_v37, %v5153_v48 }
 0x3ba   : > { %4573 = vrcp.f32 %v2549_v33  ;;  %v7370_v13 = vmul.f32 2.0, %v7353_v18  ;;  %vm1529_vm13 = vcmp.ge.f32.partialorder %v7206_v4, 0.0  ;;  %v1401_v57 = vmul.f32 1.442695, %v1151_v44 }
 0x3bb   : > { %v1405_v14 = vmul.f32 1.442695, %v1153_v32  ;;  %v4560_v8 = vpop.eup %4559  ;;  %v1657_v16 = vmul.f32 2.0, %v4558_v19  ;;  %v1913_v21 = vadd.f32 2.0, %v4558_v19  ;;  %v1155_v31 = vsub.f32 0.0, %v1027_v63 }
 0x3bc   : > { %v1026_v51 = vand.u32 2147483647, %v7367_v3  ;;  %v1912_v62 = vadd.f32 2.0, %v7353_v18  ;;  %v1395_v50 = vmul.f32 1.442695, %v1148_v2  ;;  %v7380_v41 = vsel %vm1526_vm12, %v1782_v0, %v2038_v61 }
 0x3bd   : > { %v1024_v48 = vand.u32 2147483647, %v7362_v27  ;;  %4575 = vpow2.f32 %v1405_v14  ;;  %v7376_v35 = vpop.eup %4561  ;;  %v2422_v45 = vsel %vm1526_vm12, %v2294_v23, 2.0  ;;  %v1409_v11 = vmul.f32 1.442695, %v1155_v31 }
 0x3be   : > { %4577 = vrcp.f32 %v2551_v12  ;;  %v7384_v33 = vpop.eup %4563  ;;  %v7388_v34 = vadd.f32 %v7259_v1, %v7317_v40  ;;  %v7392_v44 = vmul.f32 %v7275_v36, %v7073_v54  ;;  %v1659_v37 = vmul.f32 2.0, %v4560_v8 }
 0x3bf   : > { %4579 = vpow2.f32 %v1401_v57  ;;  %v4566_v2 = vpop.eup %4565  ;;  %v1785_v32 = vadd.f32 1.0, %v1657_v16  ;;  %v2041_v0 = vmul.f32 %v4558_v19, %v1913_v21  ;;  %v2297_v63 = vmul.f32 %v4558_v19, %v1657_v16 }
 0x3c0   : > { %v1154_v12 = vsub.f32 0.0, %v1026_v51  ;;  %v2550_v61 = vadd.f32 %v2422_v45, %v7380_v41  ;;  %v1784_v23 = vadd.f32 1.0, %v7370_v13  ;;  %vm1531_vm14 = vcmp.ge.f32.partialorder %v7232_v38, 0.0 }
 0x3c1   : > { %4581 = vpow2.f32 %v1395_v50  ;;  %v1152_v1 = vsub.f32 0.0, %v1024_v48  ;;  %v4568_v14 = vpop.eup %4567  ;;  %v2040_v31 = vmul.f32 %v7353_v18, %v1912_v62  ;;  %v1915_v54 = vadd.f32 2.0, %v4560_v8 }
 0x3c2   : > { %vm1530_vm15 = vcmp.ge.f32.partialorder %v7248_v22, 0.0  ;;  %4583 = vpow2.f32 %v1409_v11  ;;  %v1407_v36 = vmul.f32 1.442695, %v1154_v12  ;;  %v7399_v57 = vpop.eup %4569  ;;  %vm1528_vm1 = vcmp.ge.f32.partialorder %v7201_v47, 0.0 }
 0x3c3   : > { %7721 = vst [vmem:[#allocation27_spill] sm:$0xff] %v7399_v57  ;;  %v1658_v19 = vmul.f32 2.0, %v4566_v2  ;;  %v1914_v16 = vadd.f32 2.0, %v4566_v2  ;;  %v1661_v21 = vmul.f32 2.0, %v4568_v14  ;;  %v1917_v51 = vadd.f32 2.0, %v4568_v14 }
 0x3c4   : > { %v7404_v50 = vsel %vm1529_vm13, %v1785_v32, %v2041_v0  ;;  %v2425_v62 = vsel %vm1529_vm13, %v2297_v63, 2.0  ;;  %v1787_v48 = vadd.f32 1.0, %v1659_v37  ;;  %4585 = vpow2.f32 %v1407_v36  ;;  %v4572_v45 = vpop.eup %4571 }
 0x3c5   : > { %v1789_v11 = vadd.f32 1.0, %v1661_v21  ;;  %v2045_v12 = vmul.f32 %v4568_v14, %v1917_v51  ;;  %v2301_v5 = vmul.f32 %v4568_v14, %v1661_v21  ;;  %v1403_v6 = vmul.f32 1.442695, %v1152_v1 }
 0x3c6   : > { %v2043_v57 = vmul.f32 %v4560_v8, %v1915_v54  ;;  %v2299_v58 = vmul.f32 %v4560_v8, %v1659_v37  ;;  %v1662_v7 = vmul.f32 2.0, %v4572_v45  ;;  %v1918_v26 = vadd.f32 2.0, %v4572_v45 }
 0x3c7   : > { %v1786_v59 = vadd.f32 1.0, %v1658_v19  ;;  %v2042_v17 = vmul.f32 %v4566_v2, %v1914_v16  ;;  %v2298_v43 = vmul.f32 %v4566_v2, %v1658_v19  ;;  %vm1533_vm2 = vcmp.ge.f32.partialorder %v7287_v53, 0.0  ;;  %v4574_v32 = vpop.eup %4573  ;;  %v898_v19 = vpop.f32.mrf.mxu1 }
 0x3c8   : > { %4587 = vrcp.f32 %v2550_v61  ;;  %v2553_v0 = vadd.f32 %v2425_v62, %v7404_v50  ;;  %v7410_v63 = vsel %vm1533_vm2, %v1789_v11, %v2045_v12  ;;  %v2429_v36 = vsel %vm1533_vm2, %v2301_v5, 2.0 }
 0x3c9   : > { %v7414_v14 = vmul.f32 %v7282_v29, %v7080_v46  ;;  %v2677_v8 = vmul.f32 %v7331_v20, %v7106_v39  ;;  %v7420_v37 = vmul.f32 %v7349_v42, %v7135_v9  ;;  %4589 = vpow2.f32 %v1403_v6 }
 0x3ca   : > { %v4576_v2 = vpop.eup %4575  ;;  %v7424_v61 = vsel %vm1531_vm14, %v1787_v48, %v2043_v57  ;;  %v1790_v1 = vadd.f32 1.0, %v1662_v7  ;;  %v2046_v54 = vmul.f32 %v4572_v45, %v1918_v26  ;;  %v2302_v5 = vmul.f32 %v4572_v45, %v1662_v7 }
 0x3cb   : > { %v7426_v16 = vpop.eup %4577  ;;  %v2427_v46 = vsel %vm1531_vm14, %v2299_v58, 2.0  ;;  %v7432_v39 = vsel %vm1530_vm15, %v1786_v59, %v2042_v17  ;;  %v2426_v9 = vsel %vm1530_vm15, %v2298_v43, 2.0  ;;  %v2557_v29 = vadd.f32 %v2429_v36, %v7410_v63 }
 0x3cc   : > { %v4580_v20 = vpop.eup %4579  ;;  %v7439_v26 = vmul.f32 %v7380_v41, %v7159_v60  ;;  %v7443_v7 = vsel %vm1528_vm1, %v1784_v23, %v2040_v31  ;;  %v7447_v58 = vmul.f32 %v7353_v18, %v7370_v13  ;;  %4591 = vrcp.f32 %v2553_v0 }
 0x3cd   : > { %vm1534_vm3 = vcmp.ge.f32.partialorder %v7301_v30, 0.0  ;;  %v1665_v17 = vmul.f32 2.0, %v4576_v2  ;;  %v1921_v43 = vadd.f32 2.0, %v4576_v2  ;;  %v7451_v59 = vadd.f32 %v898_v19, %v5160_v52 }
 0x3ce   : > { %v4582_v42 = vpop.eup %4581  ;;  %v2555_v60 = vadd.f32 %v2427_v46, %v7424_v61  ;;  %v2554_v6 = vadd.f32 %v2426_v9, %v7432_v39  ;;  %v7455_v41 = vsel %vm1534_vm3, %v1790_v1, %v2046_v54  ;;  %v2430_v23 = vsel %vm1534_vm3, %v2302_v5, 2.0 }
 0x3cf   : > { %7722 = vst [vmem:[#allocation28_spill] sm:$0xff] %v7451_v59  ;;  %v4584_v31 = vpop.eup %4583  ;;  %4593 = vrcp.f32 %v2557_v29  ;;  %v1663_v18 = vmul.f32 2.0, %v4580_v20  ;;  %v1793_v13 = vadd.f32 1.0, %v1665_v17  ;;  %v2049_v57 = vmul.f32 %v4576_v2, %v1921_v43 }
 0x3d0   : > { %v2933_v21 = vmul.f32 %v4574_v32, %v2677_v8  ;;  %v1919_v51 = vadd.f32 2.0, %v4580_v20  ;;  %vm1537_vm4 = vcmp.ge.f32.partialorder %v7334_v15, 0.0  ;;  %v2305_v62 = vmul.f32 %v4576_v2, %v1665_v17 }
 0x3d1   : > { %v4586_v52 = vpop.eup %4585  ;;  %v1660_v48 = vmul.f32 2.0, %v4582_v42  ;;  %v2558_v45 = vadd.f32 %v2430_v23, %v7455_v41  ;;  %v7459_v11 = vsel %vm1537_vm4, %v1793_v13, %v2049_v57  ;;  %v1028_v12 = vand.u32 2147483647, %v7451_v59 }
 0x3d2   : > { %v2433_v0 = vsel %vm1537_vm4, %v2305_v62, 2.0  ;;  %v1667_v36 = vmul.f32 2.0, %v4584_v31  ;;  %v1923_v1 = vadd.f32 2.0, %v4584_v31  ;;  %v1666_v54 = vmul.f32 2.0, %v4586_v52 }
 0x3d3   : > { %4595 = vrcp.f32 %v2554_v6  ;;  %v1916_v5 = vadd.f32 2.0, %v4582_v42  ;;  %v1791_v19 = vadd.f32 1.0, %v1663_v18  ;;  %v2561_v32 = vadd.f32 %v2433_v0, %v7459_v11 }
 0x3d4   : > { %v2047_v8 = vmul.f32 %v4580_v20, %v1919_v51  ;;  %v2303_v46 = vmul.f32 %v4580_v20, %v1663_v18  ;;  %v1922_v2 = vadd.f32 2.0, %v4586_v52  ;;  %v2306_v9 = vmul.f32 %v4586_v52, %v1666_v54 }
 0x3d5   : > { %v4588_v29 = vpop.eup %4587  ;;  %4597 = vrcp.f32 %v2561_v32  ;;  %vm1538_vm5 = vcmp.ge.f32.partialorder %v7367_v3, 0.0  ;;  %v1794_v17 = vadd.f32 1.0, %v1666_v54  ;;  %v1156_v43 = vsub.f32 0.0, %v1028_v12 }
 0x3d6   : > { %v4590_v23 = vpop.eup %4589  ;;  %4599 = vrcp.f32 %v2558_v45  ;;  %v1795_v13 = vadd.f32 1.0, %v1667_v36  ;;  %v2051_v57 = vmul.f32 %v4584_v31, %v1923_v1  ;;  %v2307_v62 = vmul.f32 %v4584_v31, %v1667_v36 }
 0x3d7   : > { %vm1535_vm6 = vcmp.ge.f32.partialorder %v7314_v24, 0.0  ;;  %v2050_v6 = vmul.f32 %v4586_v52, %v1922_v2  ;;  %v2434_v51 = vsel %vm1538_vm5, %v2306_v9, 2.0  ;;  %v1411_v20 = vmul.f32 1.442695, %v1156_v43 }
 0x3d8   : > { %v1788_v18 = vadd.f32 1.0, %v1660_v48  ;;  %v7467_v0 = vsel %vm1535_vm6, %v1791_v19, %v2047_v8  ;;  %v2431_v32 = vsel %vm1535_vm6, %v2303_v46, 2.0  ;;  %vm1539_vm7 = vcmp.ge.f32.partialorder %v7343_v10, 0.0 }
 0x3d9   : > { %v4592_v54 = vpop.eup %4591  ;;  %v2044_v12 = vmul.f32 %v4582_v42, %v1916_v5  ;;  %v1664_v59 = vmul.f32 2.0, %v4590_v23  ;;  %v7472_v45 = vsel %vm1538_vm5, %v1794_v17, %v2050_v6  ;;  %4601 = vpow2.f32 %v1411_v20 }
 0x3da   : > { %v1920_v31 = vadd.f32 2.0, %v4590_v23  ;;  %v7474_v52 = vsel %vm1539_vm7, %v1795_v13, %v2051_v57  ;;  %v2435_v36 = vsel %vm1539_vm7, %v2307_v62, 2.0  ;;  %v2562_v1 = vadd.f32 %v2434_v51, %v7472_v45 }
 0x3db   : > { %v2681_v19 = vmul.f32 %v7404_v50, %v7206_v4  ;;  %4603 = vrcp.f32 %v2555_v60  ;;  %v2300_v8 = vmul.f32 %v4582_v42, %v1660_v48  ;;  %v2559_v46 = vadd.f32 %v2431_v32, %v7467_v0 }
 0x3dc   : > { %v4594_v5 = vpop.eup %4593  ;;  %v2930_v2 = vmul.f32 %v7384_v33, %v7414_v14  ;;  %v2424_v9 = vsel %vm1528_vm1, %v7447_v58, 2.0  ;;  %vm1532_vm8 = vcmp.ge.f32.partialorder %v7322_v28, 0.0  ;;  %4605 = vrcp.f32 %v2562_v1 }
 0x3dd   : > { %v7723_v17 = vmax.f32 %v7250_v56, %v7317_v40  ;;  %v2937_v4 = vmul.f32 %v4592_v54, %v2681_v19  ;;  %v2685_v50 = vmul.f32 %v7410_v63, %v7287_v53  ;;  %v2563_v42 = vadd.f32 %v2435_v36, %v7474_v52 }
 0x3de   : > { %v2977_v60 = vadd.f32 %v7388_v34, %v2933_v21  ;;  %v7493_v33 = vsel %vm1532_vm8, %v1788_v18, %v2044_v12  ;;  %v1792_v14 = vadd.f32 1.0, %v1664_v59  ;;  %v2048_v48 = vmul.f32 %v4590_v23, %v1920_v31 }
 0x3df   : > { %v3161_v43 = vmax.f32 %v7723_v17, %v2933_v21  ;;  %v2428_v58 = vsel %vm1532_vm8, %v2300_v8, 2.0  ;;  %v2941_v13 = vmul.f32 %v4594_v5, %v2685_v50  ;;  %4607 = vrcp.f32 %v2559_v46 }
 0x3e0   : > { %v2304_v57 = vmul.f32 %v4590_v23, %v1664_v59  ;;  %v4596_v62 = vpop.eup %4595  ;;  %v7497_v56 = vmul.f32 %v7376_v35, %v7392_v44  ;;  %v2934_v40 = vmul.f32 %v4588_v29, %v7439_v26  ;;  %v2552_v53 = vadd.f32 %v2424_v9, %v7443_v7 }
 0x3e1   : > { %vm1536_vm9 = vcmp.ge.f32.partialorder %v7362_v27, 0.0  ;;  %v3162_v34 = vmax.f32 %v3161_v43, %v2937_v4  ;;  %v2978_v63 = vadd.f32 %v2977_v60, %v2937_v4  ;;  %v2689_v21 = vmul.f32 %v7459_v11, %v7334_v15 }
 0x3e2   : > { %4609 = vrcp.f32 %v2563_v42  ;;  %v4598_v6 = vpop.eup %4597  ;;  %v3197_v59 = vmax.f32 %v7293_v49, %v2930_v2  ;;  %v2682_v23 = vmul.f32 %v7432_v39, %v7248_v22  ;;  %v2556_v35 = vadd.f32 %v2428_v58, %v7493_v33 }
 0x3e3   : > { %v7508_v44 = vsel %vm1536_vm9, %v1792_v14, %v2048_v48  ;;  %v4600_v26 = vpop.eup %4599  ;;  %v3163_v29 = vmax.f32 %v3162_v34, %v2941_v13  ;;  %v2979_v51 = vadd.f32 %v2978_v63, %v2941_v13  ;;  %v2432_v20 = vsel %vm1536_vm9, %v2304_v57, 2.0 }
 0x3e4   : > { %v2945_v18 = vmul.f32 %v4598_v6, %v2689_v21  ;;  %v3234_v32 = vmax.f32 %v7265_v25, %v7497_v56  ;;  %v3013_v15 = vadd.f32 %v7338_v55, %v2930_v2  ;;  %v2938_v11 = vmul.f32 %v4596_v62, %v2682_v23 }
 0x3e5   : > { %v2686_v49 = vmul.f32 %v7455_v41, %v7301_v30  ;;  %v3198_v54 = vmax.f32 %v3197_v59, %v2934_v40  ;;  %4611 = vrcp.f32 %v2552_v53  ;;  %v2560_v1 = vadd.f32 %v2432_v20, %v7508_v44 }
 0x3e6   : > { %v3164_v22 = vmax.f32 %v3163_v29, %v2945_v18  ;;  %v2980_v39 = vadd.f32 %v2979_v51, %v2945_v18  ;;  %v4602_v12 = vpop.eup %4601  ;;  %v3014_v31 = vadd.f32 %v3013_v15, %v2934_v40  ;;  %4613 = vrcp.f32 %v2556_v35  ;;  %v7725_v40 = vld [vmem:[#allocation24_spill] sm:$0xff] }
 0x3e7   : > { %v2942_v36 = vmul.f32 %v4600_v26, %v2686_v49  ;;  %v1668_v46 = vmul.f32 2.0, %v4602_v12  ;;  %v1924_v25 = vadd.f32 2.0, %v4602_v12  ;;  %v2935_v55 = vmul.f32 %v7426_v16, %v7420_v37  ;;  %v7724_v37 = vld [vmem:[#allocation28_spill] sm:$0xff] }
 0x3e8   : > { %v2981_v19 = vrot.slane %v2980_v39, 4  ;;  %v3165_v8 = vrot.slane %v3164_v22, 4  ;;  %v4604_v5 = vpop.eup %4603  ;;  %v3199_v2 = vmax.f32 %v3198_v54, %v2938_v11  ;;  %v3015_v30 = vadd.f32 %v3014_v31, %v2938_v11  ;;  %v7730_v31 = vld [vmem:[#allocation20_spill] sm:$0xff] }
 0x3e9   : > { %v2690_v41 = vmul.f32 %v7472_v45, %v7367_v3  ;;  %v4606_v9 = vpop.eup %4605  ;;  %v1796_v4 = vadd.f32 1.0, %v1668_v46  ;;  %v2052_v50 = vmul.f32 %v4602_v12, %v1924_v25  ;;  %v2308_v48 = vmul.f32 %v4602_v12, %v1668_v46 }
 0x3ea   : > { %v2982_v17 = vadd.f32 %v2981_v19, %v2980_v39  ;;  %v3166_v43 = vmax.f32 %v3164_v22, %v3165_v8  ;;  %v3200_v42 = vmax.f32 %v3199_v2, %v2942_v36  ;;  %v3016_v60 = vadd.f32 %v3015_v30, %v2942_v36  ;;  %v7728_v39 = vld [vmem:[#allocation23_spill] sm:$0xff] }
 0x3eb   : > { %v2946_v14 = vmul.f32 %v4606_v9, %v2690_v41  ;;  %v2683_v58 = vmul.f32 %v7424_v61, %v7232_v38  ;;  %4615 = vrcp.f32 %v2560_v1  ;;  %vm1540_vm10 = vcmp.ge.f32.partialorder %v7724_v37, 0.0  ;;  %v7726_v38 = vld [vmem:[#allocation21_spill] sm:$0xff]  ;;  %v7732_v9 = vld [vmem:[#allocation26_spill] sm:$0xff] }
 0x3ec   : > { %v2983_v13 = vrot.slane %v2982_v17, 2  ;;  %v4608_v16 = vpop.eup %4607  ;;  %v3167_v57 = vrot.slane %v3166_v43, 2  ;;  %v7523_v45 = vsel %vm1540_vm10, %v1796_v4, %v2052_v50  ;;  %v3050_v53 = vadd.f32 %v7725_v40, %v7497_v56  ;;  %v7727_v61 = vld [vmem:[#allocation25_spill] sm:$0xff] }
 0x3ed   : > { %v3201_v62 = vmax.f32 %v3200_v42, %v2946_v14  ;;  %v3017_v3 = vadd.f32 %v3016_v60, %v2946_v14  ;;  %v2939_v34 = vmul.f32 %v4604_v5, %v2683_v58  ;;  %v2687_v63 = vmul.f32 %v7467_v0, %v7314_v24 }
 0x3ee   : > { %v2436_v21 = vsel %vm1540_vm10, %v2308_v48, 2.0  ;;  %v2676_v59 = vmul.f32 %v7727_v61, %v7726_v38  ;;  %v3235_v23 = vmax.f32 %v3234_v32, %v2935_v55  ;;  %v3051_v29 = vadd.f32 %v3050_v53, %v2935_v55  ;;  %v7729_v32 = vld [vmem:[#allocation22_spill] sm:$0xff] }
 0x3ef   : > { %v4610_v6 = vpop.eup %4609  ;;  %v3018_v35 = vrot.slane %v3017_v3, 4  ;;  %v3202_v26 = vrot.slane %v3201_v62, 4  ;;  %v2943_v51 = vmul.f32 %v4608_v16, %v2687_v63  ;;  %v2691_v20 = vmul.f32 %v7474_v52, %v7343_v10  ;;  %v7731_v52 = vld [vmem:[#allocation27_spill] sm:$0xff] }
 0x3f0   : > { %v2564_v18 = vadd.f32 %v2436_v21, %v7523_v45  ;;  %v2984_v56 = vadd.f32 %v2983_v13, %v2982_v17  ;;  %v3168_v15 = vmax.f32 %v3166_v43, %v3167_v57  ;;  %v3236_v24 = vmax.f32 %v3235_v23, %v2939_v34 }
 0x3f1   : > { %v3019_v11 = vadd.f32 %v3018_v35, %v3017_v3  ;;  %v3203_v49 = vmax.f32 %v3201_v62, %v3202_v26  ;;  %v3052_v0 = vadd.f32 %v3051_v29, %v2939_v34  ;;  %v2947_v54 = vmul.f32 %v4610_v6, %v2691_v20 }
 0x3f2   : > { %4617 = vrcp.f32 %v2564_v18  ;;  %v4612_v22 = vpop.eup %4611  ;;  %v3269_v12 = vmax.f32 %v7729_v32, %v7728_v39  ;;  %v3085_v36 = vadd.f32 %v7730_v31, %v7728_v39  ;;  %v2932_v8 = vmul.f32 %v7731_v52, %v2676_v59 }
 0x3f3   : > { %v3020_v1 = vrot.slane %v3019_v11, 2  ;;  %v3204_v19 = vrot.slane %v3203_v49, 2  ;;  %v4614_v10 = vpop.eup %4613  ;;  %v2680_v46 = vmul.f32 %v7443_v7, %v7201_v47  ;;  %v3237_v25 = vmax.f32 %v3236_v24, %v2943_v51 }
 0x3f4   : > { %v3053_v5 = vadd.f32 %v3052_v0, %v2943_v51  ;;  %v2985_v55 = vrot.slane %v2984_v56, 1  ;;  %v3169_v2 = vrot.slane %v3168_v15, 1  ;;  %v3270_v17 = vmax.f32 %v3269_v12, %v7732_v9 }
 0x3f5   : > { %v3021_v30 = vadd.f32 %v3020_v1, %v3019_v11  ;;  %v3205_v41 = vmax.f32 %v3203_v49, %v3204_v19  ;;  %v2684_v43 = vmul.f32 %v7493_v33, %v7322_v28  ;;  %v3238_v4 = vmax.f32 %v3237_v25, %v2947_v54  ;;  %v7733_v19 = vld [vmem:[#allocation19_spill] sm:$0xff] }
 0x3f6   : > { %v3054_v50 = vadd.f32 %v3053_v5, %v2947_v54  ;;  %v2936_v42 = vmul.f32 %v4612_v22, %v2680_v46  ;;  %v3086_v48 = vadd.f32 %v3085_v36, %v7732_v9  ;;  %v3271_v58 = vmax.f32 %v3270_v17, %v2932_v8 }
 0x3f7   : > { %v3022_v60 = vrot.slane %v3021_v30, 1  ;;  %v3206_v14 = vrot.slane %v3205_v41, 1  ;;  %v2940_v47 = vmul.f32 %v4614_v10, %v2684_v43  ;;  %v2986_v13 = vadd.f32 %v2985_v55, %v2984_v56 }
 0x3f8   : > { %v4616_v7 = vpop.eup %4615  ;;  %v3170_v16 = vmax.f32 %v3168_v15, %v3169_v2  ;;  %v3087_v3 = vadd.f32 %v3086_v48, %v2932_v8  ;;  %v2688_v40 = vmul.f32 %v7508_v44, %v7362_v27  ;;  %v3055_v53 = vrot.slane %v3054_v50, 4 }
 0x3f9   : > { %v3023_v57 = vadd.f32 %v3022_v60, %v3021_v30  ;;  %v3207_v62 = vmax.f32 %v3205_v41, %v3206_v14  ;;  %v3239_v28 = vrot.slane %v3238_v4, 4  ;;  %v3272_v33 = vmax.f32 %v3271_v58, %v2936_v42  ;;  %v3133_v60 = vld [vmem:[#allocation3] sm:$0xf] }
 0x3fa   : > { %v3088_v21 = vadd.f32 %v3087_v3, %v2936_v42  ;;  %v2944_v6 = vmul.f32 %v4616_v7, %v2688_v40  ;;  %v3056_v59 = vadd.f32 %v3055_v53, %v3054_v50  ;;  %v2692_v35 = vmul.f32 %v7523_v45, %v7724_v37  ;;  %v2949_v42 = vld [vmem:[#allocation2] sm:$0xf]  ;;  %v3323_v53 = vld [vmem:[#allocation10] sm:$0xf] }
 0x3fb   : > { %v3102_v34 = vcombine.low %v2986_v13, %v3023_v57  ;;  %v3286_v63 = vcombine.low %v3170_v16, %v3207_v62  ;;  %v3273_v38 = vmax.f32 %v3272_v33, %v2940_v47  ;;  %v3240_v23 = vmax.f32 %v3238_v4, %v3239_v28  ;;  %v3321_v3 = vld [vmem:[%s7612_s3] sm:$0xf] }
 0x3fc   : > { %v3089_v61 = vadd.f32 %v3088_v21, %v2940_v47  ;;  %v3057_v18 = vrot.slane %v3056_v59, 2  ;;  %v4856_v15 = vmov 1966171168  }
 0x3fd   : > { %v3274_v29 = vmax.f32 %v3273_v38, %v2944_v6  ;;  %v3241_v27 = vrot.slane %v3240_v23, 2  ;;  %v3105_v11 = vunpack.c.l.s4 %v4856_v15  ;;  %v7736_v15 = vsub.s32 3, %v7733_v19 }
 0x3fe   : > { %v3090_v51 = vadd.f32 %v3089_v61, %v2944_v6  ;;  %v3058_v0 = vadd.f32 %v3057_v18, %v3056_v59 }
 0x3ff   : > { %v4618_v26 = vpop.eup %4617  ;;  %v3242_v54 = vmax.f32 %v3240_v23, %v3241_v27  ;;  %v3106_v32 = vunpack.c.0.s8 %v3105_v11 }
 0x400   : > { %v2948_v20 = vmul.f32 %v4618_v26, %v2692_v35  ;;  %v3059_v37 = vrot.slane %v3058_v0, 1 }
 0x401   : > { %v3243_v45 = vrot.slane %v3242_v54, 1  ;;  %v3109_v10 = vsub.s32 %v3106_v32, %v7733_v19 }
 0x402   : > { %v3275_v44 = vmax.f32 %v3274_v29, %v2948_v20  ;;  %v3091_v56 = vadd.f32 %v3090_v51, %v2948_v20  ;;  %v3060_v46 = vadd.f32 %v3059_v37, %v3058_v0  ;;  %v7738_v0 = vsub.s32 2, %v7733_v19 }
 0x403   : > { %v3244_v25 = vmax.f32 %v3242_v54, %v3243_v45  ;;  %v3110_v2 = vrot.slane %v3102_v34, %v3109_v10  ;;  %v3294_v30 = vrot.slane %v3286_v63, %v3109_v10  ;;  %v3430_v45 = vld [vmem:[%s7615_s6] sm:$0x1] }
 0x404   : > { %v3092_v49 = vrot.slane %v3091_v56, 4  ;;  %v3276_v24 = vrot.slane %v3275_v44, 4 }
 0x406   : > { %v3093_v22 = vadd.f32 %v3092_v49, %v3091_v56  ;;  %v3277_v39 = vmax.f32 %v3275_v44, %v3276_v24  ;;  %v7735_v44 = vsub.s32 1, %v7733_v19  ;;  %v7737_v49 = vsub.s32 0, %v7733_v19 }
 0x408   : > { %v3094_v12 = vrot.slane %v3093_v22, 2  ;;  %v3278_v31 = vrot.slane %v3277_v39, 2 }
 0x40a   : > { %v3095_v36 = vadd.f32 %v3094_v12, %v3093_v22  ;;  %v3279_v1 = vmax.f32 %v3277_v39, %v3278_v31 }
 0x40c   : > { %v3096_v52 = vrot.slane %v3095_v36, 1  ;;  %v3280_v8 = vrot.slane %v3279_v1, 1 }
 0x40e   : > { %v3097_v5 = vadd.f32 %v3096_v52, %v3095_v36  ;;  %v3281_v55 = vmax.f32 %v3279_v1, %v3280_v8 }
 0x410   : > { %v3103_v41 = vcombine.low %v3060_v46, %v3097_v5  ;;  %v3287_v9 = vcombine.low %v3244_v25, %v3281_v55 }
 0x412   : > { %v3117_v17 = vrot.slane %v3103_v41, %v3109_v10  ;;  %v3301_v43 = vrot.slane %v3287_v9, %v3109_v10 }
 0x414   : > { %v3118_v4 = vcombine.low %v3110_v2, %v3117_v17  ;;  %v3302_v50 = vcombine.low %v3294_v30, %v3301_v43 }
 0x416   : > { %v3125_v14 = vrot.slane %v3118_v4, %v3109_v10  ;;  %v3309_v48 = vrot.slane %v3302_v50, %v3109_v10 }
 0x418   : > { %v3127_v58 = vadd.f32 %v3125_v14, %v2949_v42  ;;  %v3311_v47 = vmax.f32 %v3133_v60, %v3309_v48 }
 0x41a   : > { %3132 = vst.msk [vmem:[#allocation2] sm:$0xf] %vm5061_vm0, %v3127_v58  ;;  %3312 = vst.msk [vmem:[#allocation3] sm:$0xf] %vm5061_vm0, %v3311_v47 }
 0x421   : > { %v3316_v13 = vld [vmem:[#allocation2] sm:$0xf]  ;;  %v3318_v16 = vld [vmem:[#allocation3] sm:$0xf] }
 0x422   : > { %v3317_v57 = vmul.f32 0.001953125, %v3316_v13  ;;  %v3319_v62 = vmul.f32 0.5, %v3318_v16 }
 0x424   : > { %v3320_v40 = vadd.f32 %v3319_v62, %v3317_v57 }
 0x426   : > { %v3322_v28 = vmul.f32 %v3321_v3, %v3320_v40 }
 0x428   : > { %v3324_v33 = vadd.f32 %v3323_v53, %v3322_v28 }
 0x42a   : > { %v3325_v34 = vand.u32 2147483647, %v3324_v33  ;;  %vm3329_vm0 = vcmp.ge.f32.partialorder %v3324_v33, 0.0 }
 0x42c   : > { %v3326_v63 = vsub.f32 0.0, %v3325_v34 }
 0x42e   : > { %v3327_v21 = vmul.f32 1.442695, %v3326_v63 }
 0x430   : > { %4619 = vpow2.f32 %v3327_v21 }
 0x43d   : > { %v4620_v6 = vpop.eup %4619 }
 0x43e   : > { %v3330_v38 = vmul.f32 2.0, %v4620_v6  ;;  %v3332_v61 = vadd.f32 2.0, %v4620_v6 }
 0x440   : > { %v3331_v59 = vadd.f32 1.0, %v3330_v38  ;;  %v3333_v23 = vmul.f32 %v4620_v6, %v3332_v61  ;;  %v3335_v35 = vmul.f32 %v4620_v6, %v3330_v38 }
 0x442   : > { %v3334_v26 = vsel %vm3329_vm0, %v3331_v59, %v3333_v23  ;;  %v3336_v29 = vsel %vm3329_vm0, %v3335_v35, 2.0 }
 0x443   : > { %v3337_v51 = vadd.f32 %v3336_v29, %v3334_v26  ;;  %v3338_v20 = vmul.f32 %v3334_v26, %v3324_v33 }
 0x445   : > { %4621 = vrcp.f32 %v3337_v51 }
 0x452   : > { %v4622_v18 = vpop.eup %4621 }
 0x453   : > { %v3340_v27 = vmul.f32 %v4622_v18, %v3338_v20 }
 0x455   : > { %v3349_v56 = vrot.slane %v3340_v27, %v7735_v44  ;;  %v3357_v11 = vrot.slane %v3340_v27, %v7736_v15  ;;  %v3345_v24 = vrot.slane %v3340_v27, %v7737_v49  ;;  %v3353_v54 = vrot.slane %v3340_v27, %v7738_v0 }
 0x457   : > { %v3363_v22 = vpack.c.bf16 %v3349_v56, %v3349_v56  ;;  %v3365_v39 = vpack.c.bf16 %v3357_v11, %v3357_v11  ;;  %v3362_v32 = vpack.c.bf16 %v3345_v24, %v3345_v24  ;;  %v3364_v12 = vpack.c.bf16 %v3353_v54, %v3353_v54 }
 0x459   : > { %3655 = vmatprep.mubr.bf16.mxu0 %v3363_v22  ;;  %3695 = vmatprep.mubr.bf16.mxu1 %v3365_v39 }
 0x45a   : > { %3656 = vmatmul.mubr.bf16.vlgmr.msra.gmra.mxu0 %v3362_v32  ;;  %3696 = vmatmul.mubr.bf16.vlgmr.msra.gmra.mxu1 %v3364_v12 }
 0x51a   : > { %v3935_v31 = vpop.f32.mrf.mxu0  ;;  %v3957_v37 = vpop.f32.mrf.mxu1 }
 0x51c   : > { %v3936_v36 = vpop.f32.mrf.mxu0  ;;  %v3958_v1 = vpop.f32.mrf.mxu1 }
 0x51d   : > { %v3937_v19 = vadd.f32 %v3936_v36, %v3935_v31  ;;  %v3959_v46 = vadd.f32 %v3958_v1, %v3957_v37 }
 0x51e   : > { %v3938_v10 = vpop.f32.mrf.mxu0  ;;  %v3960_v52 = vpop.f32.mrf.mxu1 }
 0x51f   : > { %v3658_v8 = vadd.f32 %v3937_v19, %v3430_v45 }
 0x520   : > { %v3939_v25 = vpop.f32.mrf.mxu0  ;;  %v3961_v5 = vpop.f32.mrf.mxu1 }
 0x521   : > { %v3698_v55 = vadd.f32 %v3959_v46, %v3658_v8 }
 0x523   : > { %3703 = vst [vmem:[%s361_s10] sm:$0x1] %v3698_v55 }
 0x524   : > { %4768 = shalt.err (!%p4765_p6)
}
 0x525   : > { %s4769_s15 = scalar_lea.hbm %s3715_s14, 16  ;;  %s4773_s1 = scalar_lea.hbm %s7616_s7, 32 }
 0x526   : > { %p4770_p4 = scmp.ne.s32.totalorder %s3715_s14, %s4769_s15  ;;  %p4774_p8 = scmp.lt.s32.totalorder %s3715_s14, %s7616_s7 }
 0x527   : > { %p4775_p10 = scmp.lt.s32.totalorder %s4773_s1, %s4769_s15 }
 0x528   : > { %p4771_p0 = pnand %p4770_p4, %p5015_p5 }
 0x529   : > { %p4776_p2 = por %p4775_p10, %p4774_p8 }
 0x52a   : > { %p4772_p3 = pneg %p4771_p0 }
 0x52c   : > { %p4777_p11 = pnand %p4776_p2, %p4772_p3 }
 0x52e   : > { %4780 = shalt.err (!%p4777_p11)
}
 0x52f   : > { %3981 = dma.vmem_to_hbm [thread:$0]  (%p5015_p5), %s3718_s16, 16, %s3715_s14, %s3705_s20  }
 0x530 PF: > { %s3729_s8 = sand.u32 1, %s4823_s24   ;;  %p7739_p7 = scmp.ge.s32.totalorder %s4843_s29, 2 }
 0x531   : > { %s3730_s9 = scalar_lea.sflag [#allocation6], %s3729_s8 }
 0x532   : > { %p4001_p12 = pnand %p7739_p7, %p5022_p9 }
 0x534   : > { %p4002_p13 = pneg %p4001_p12 }
 0x536   : > { %4818 = dma.done.wait (%p4002_p13), %s3730_s9, 16  }
 0x537   : > { %4820 = vsyncadd (%p4002_p13), %s3730_s9, 4294967280  ;;  %s25_s29 = sadd.s32 1, %s4843_s29   ;;  %s7740_s24 = smov %s4827_s25 }
 0x538   : > { %p22_p1 = scmp.ge.s32.totalorder %s25_s29, 4   ;;  %s7741_s25 = smov %s4831_s26 }
 0x539   : > { %s7742_s26 = smov %s5020_s12  ;;  %s7743_s27 = smov %s4839_s28 }
 0x53a   : > { %s7744_s28 = smov %s7746_s21  ;;  %24 = sbr.rel (!%p22_p1) target bundleno = 13 (0xd), region = 117 }
 0x53f   :  { %3734 = vsyncpa [#allocation5], 1 }
 0x540   :  { %3736 = vsyncpa [#allocation5 + $0x1], 1 }
 0x541   :  { %3737 = vsyncpa [#allocation8], 1 }
 0x542   :  { %3738 = vsyncpa [#allocation11], 1 }
 0x543   :  { %3739 = vsyncpa [#allocation6], 1 }
 0x544   :  { %3741 = vsyncpa [#allocation6 + $0x1], 1 }

</bundles_post_ra>
